<compile_context>
chip_gen: v7x
topology: tpu7x:2x2x1
jax: 0.10.0
libtpu: 0.0.40
codegen_flags: <defaults>
</compile_context>

<pallas_src>
import jax
import jax.numpy as jnp
from jax.experimental import pallas as pl
from jax.experimental.pallas import tpu as pltpu

_LANE = 128
_LN_EPS = 1e-5


def _round_up(n, m=_LANE):
    return ((n + m - 1) // m) * m


def _silu(v):
    # x*sigmoid(x) == 0.5*x*(1 + tanh(x/2)): divide-free; tanh runs on the EUP.
    return 0.5 * v * (1.0 + jnp.tanh(0.5 * v))


def _beta_coef(n, m):
    # Matches upstream KAGN GRAMLayer.beta(): ((m+n)(m-n)n^2) / (m^2/(4n^2-1)).
    return ((m + n) * (m - n) * n ** 2) / (m ** 2 / (4.0 * n ** 2 - 1.0))


# --------------------------------- kernel ------------------------------------

def _gram_layer_body(x, degree, cout_true, w_ref, aff_ref, eff_ref, eff_off):
    """One GRAMLayer on an f32 (tb, cin_p) activation; returns f32 (tb, cout_p).

    Padded input lanes are zero on entry; padded output lanes come out as exact
    zeros (zero weight cols + zero bias/ln params), so layers chain safely."""
    wdt = w_ref.dtype                                  # matmul operand dtype (bf16)

    # LHS of the single fused contraction: [SiLU(x) | SiLU(P_1) | ... | SiLU(P_deg)]
    parts = [_silu(x).astype(wdt)]                     # base branch slice
    if degree >= 1:
        z = jnp.tanh(x)
        parts.append(_silu(z).astype(wdt))             # P_1 = z
        p_prev, p_cur = None, z
        for i in range(2, degree + 1):
            coef = eff_ref[eff_off + i]                # scalar from SMEM
            p_nxt = z * p_cur - coef if i == 2 else z * p_cur - coef * p_prev
            parts.append(_silu(p_nxt).astype(wdt))
            p_prev, p_cur = p_cur, p_nxt
    lhs = parts[0] if len(parts) == 1 else jnp.concatenate(parts, axis=-1)

    # One MXU pass per layer (base + all Gram degrees), f32 accumulation.
    y = jnp.dot(lhs, w_ref[...], preferred_element_type=jnp.float32)
    y = y + aff_ref[0:1, :]                            # folded degree-0 term

    # Masked LayerNorm over the true out_features (padded lanes of y are 0).
    ln_g, ln_b, msk = aff_ref[1:2, :], aff_ref[2:3, :], aff_ref[3:4, :]
    inv_n = 1.0 / float(cout_true)
    mean = jnp.sum(y, axis=-1, keepdims=True) * inv_n
    d = (y - mean) * msk
    var = jnp.sum(d * d, axis=-1, keepdims=True) * inv_n
    y = d * jax.lax.rsqrt(var + _LN_EPS) * ln_g + ln_b  # padded lanes -> exactly 0
    return _silu(y)


def _make_kagn_kernel(degrees, couts, dp1_max):
    n_layers = len(degrees)

    def kernel(*refs):
        x_ref, eff_ref, o_ref = refs[0], refs[1], refs[-1]
        x = x_ref[...].astype(jnp.float32)
        for li in range(n_layers):
            w_ref, aff_ref = refs[2 + 2 * li], refs[3 + 2 * li]
            x = _gram_layer_body(x, degrees[li], couts[li], w_ref, aff_ref,
                                 eff_ref, li * dp1_max)
        o_ref[...] = x.astype(o_ref.dtype)

    return kernel


# ---------------------- one-time parameter preparation ------------------------

def prepare_layer_params(p, matmul_dtype=jnp.bfloat16):
    out_f, in_f = p["base_w"].shape
    dp1 = p["beta_w"].shape[0]
    degree = dp1 - 1
    cin_p, cout_p = _round_up(in_f), _round_up(out_f)

    # Effective recursion coefficients: eff[i] = beta(i-1, i) for i >= 2.
    eff = jnp.zeros((dp1,), jnp.float32)
    for i in range(2, dp1):
        eff = eff.at[i].set(jnp.float32(_beta_coef(i - 1, i))
                            * p["beta_w"][i - 1].astype(jnp.float32))

    # Fused, lane-padded weight: rows [base_W^T ; gram_W[:,:,1] ; ... ; gram_W[:,:,deg]]
    blocks = [p["base_w"].T.astype(jnp.float32)] + \
             [p["gram_w"][:, :, d].astype(jnp.float32) for d in range(1, dp1)]
    w = jnp.zeros(((degree + 1) * cin_p, cout_p), jnp.float32)
    for d, blk in enumerate(blocks):
        w = w.at[d * cin_p:d * cin_p + in_f, :out_f].set(blk)

    # degree-0 Gram term is constant in x: SiLU(1) * sum_l gram_W[l, :, 0].
    bias0 = _silu(jnp.float32(1.0)) * jnp.sum(
        p["gram_w"][:, :, 0].astype(jnp.float32), axis=0)

    # Per-layer affine pack (rows: bias0, ln_gamma, ln_beta, LN mask), lane-padded.
    aff = jnp.zeros((4, cout_p), jnp.float32)
    aff = aff.at[0, :out_f].set(bias0)
    aff = aff.at[1, :out_f].set(p["ln_g"].astype(jnp.float32))
    aff = aff.at[2, :out_f].set(p["ln_b"].astype(jnp.float32))
    aff = aff.at[3, :out_f].set(1.0)

    return dict(degree=degree, cin=in_f, cout=out_f, cin_p=cin_p, cout_p=cout_p,
                w_fused=w.astype(matmul_dtype), affine=aff, eff_beta=eff)


def prepare_kagn_params(params_list, matmul_dtype=jnp.bfloat16):
    layers = [prepare_layer_params(p, matmul_dtype) for p in params_list]
    dp1_max = max(lp["degree"] + 1 for lp in layers)
    eff = jnp.zeros((len(layers), dp1_max), jnp.float32)
    for li, lp in enumerate(layers):
        eff = eff.at[li, :lp["degree"] + 1].set(lp["eff_beta"])
    return dict(layers=layers, eff=eff.reshape(-1), dp1_max=dp1_max)


# --------------------------------- wrapper ------------------------------------

def _weight_index_map(i):            # grid-invariant: weights DMA'd once per call
    return (0, 0)


def kagn_forward(x, prepared, *, tb=256, min_tiles=2):
    """Fused forward over the full GRAMLayer stack in a single pallas_call."""
    layers, eff_flat, dp1_max = prepared["layers"], prepared["eff"], prepared["dp1_max"]
    B, cin0 = x.shape
    assert cin0 == layers[0]["cin"], (cin0, layers[0]["cin"])
    cin0_p = layers[0]["cin_p"]
    cout_last, cout_last_p = layers[-1]["cout"], layers[-1]["cout_p"]

    # Batch tile: as large as requested (amortize per-step overhead), but keep at
    # least `min_tiles` grid steps when the batch allows (both v7x TensorCores).
    tb_eff = max(8, (min(tb, _round_up(B, 8)) // 8) * 8)
    while tb_eff > 128 and -(-B // tb_eff) < min_tiles:
        tb_eff //= 2
    n_tiles = -(-B // tb_eff)
    b_pad = n_tiles * tb_eff

    # Lane-dense, zero-padded input slab (padded rows/lanes stay zero in-kernel).
    xp = jnp.zeros((b_pad, cin0_p), x.dtype).at[:B, :cin0].set(x)

    in_specs = [
        pl.BlockSpec((tb_eff, cin0_p), lambda i: (i, 0)),
        pl.BlockSpec(memory_space=pltpu.MemorySpace.SMEM),   # merged Gram coeffs
    ]
    inputs = [xp, eff_flat]
    flops, trans = 0, 0
    bytes_acc = xp.size * xp.dtype.itemsize
    for lp in layers:
        for arr in (lp["w_fused"], lp["affine"]):
            in_specs.append(pl.BlockSpec(arr.shape, _weight_index_map))
            inputs.append(arr)
            bytes_acc += arr.size * arr.dtype.itemsize
        k = (lp["degree"] + 1) * lp["cin_p"]
        flops += 2 * b_pad * k * lp["cout_p"]
        trans += b_pad * ((lp["degree"] + 2) * lp["cin_p"] + lp["cout_p"])
    bytes_acc += b_pad * cout_last_p * x.dtype.itemsize

    kernel = _make_kagn_kernel(tuple(lp["degree"] for lp in layers),
                               tuple(lp["cout"] for lp in layers), dp1_max)

    out = pl.pallas_call(
        kernel,
        out_shape=jax.ShapeDtypeStruct((b_pad, cout_last_p), x.dtype),
        grid_spec=pltpu.PrefetchScalarGridSpec(
            num_scalar_prefetch=0,
            grid=(n_tiles,),
            in_specs=in_specs,
            out_specs=pl.BlockSpec((tb_eff, cout_last_p), lambda i: (i, 0)),
        ),
        compiler_params=pltpu.CompilerParams(
            dimension_semantics=("parallel",)),
        cost_estimate=pl.CostEstimate(flops=int(flops),
                                      transcendentals=int(trans),
                                      bytes_accessed=int(bytes_acc)),
    )(*inputs)

    return out[:B, :cout_last]


# ----------------------- parameter construction (synthetic) -------------------

def init_layer_params(key, in_f, out_f, degree):
    """Mirrors GRAMLayer.init_weights (xavier_uniform / scaled normal)."""
    dp1 = degree + 1
    ks = jax.random.split(key, 3)

    def xavier(k, shape, fan_in, fan_out):
        lim = (6.0 / (fan_in + fan_out)) ** 0.5
        return jax.random.uniform(k, shape, jnp.float32, -lim, lim)

    return dict(
        beta_w=jax.random.normal(ks[0], (dp1,), jnp.float32) * (1.0 / (in_f * dp1)),
        gram_w=xavier(ks[1], (in_f, out_f, dp1), out_f * dp1, in_f * dp1),
        base_w=xavier(ks[2], (out_f, in_f), in_f, out_f),
        ln_g=jnp.ones((out_f,), jnp.float32),
        ln_b=jnp.zeros((out_f,), jnp.float32),
    )


# ------------------------------ pure-JAX reference ----------------------------

def _gram_layer_ref(x, p, matmul_dtype=jnp.float32):
    """GRAMLayer forward. matmul_dtype=f32 == PyTorch math; bf16 mirrors the
    kernel's fused contraction with MXU operand casts."""
    dp1 = p["beta_w"].shape[0]
    degree = dp1 - 1
    parts = [_silu(x)]
    if degree >= 1:
        z = jnp.tanh(x)
        parts.append(_silu(z))
        p0, p1 = jnp.ones_like(z), z
        for i in range(2, dp1):
            p2 = z * p1 - _beta_coef(i - 1, i) * p["beta_w"][i - 1] * p0
            parts.append(_silu(p2))
            p0, p1 = p1, p2
    lhs = jnp.concatenate(parts, axis=-1).astype(matmul_dtype)
    rhs = jnp.concatenate([p["base_w"].T]
                          + [p["gram_w"][:, :, d] for d in range(1, dp1)],
                          axis=0).astype(matmul_dtype)
    y = jnp.dot(lhs, rhs, preferred_element_type=jnp.float32)
    y = y + _silu(jnp.float32(1.0)) * jnp.sum(p["gram_w"][:, :, 0], axis=0)[None, :]
    mean = y.mean(-1, keepdims=True)
    var = ((y - mean) ** 2).mean(-1, keepdims=True)
    y = (y - mean) * jax.lax.rsqrt(var + _LN_EPS) * p["ln_g"] + p["ln_b"]
    return _silu(y)


def _kagn_ref(x, params_list, matmul_dtype=jnp.float32):
    for p in params_list:
        x = _gram_layer_ref(x, p, matmul_dtype)
    return x


# ----------------------------------- main -------------------------------------

if __name__ == "__main__":
    layers_hidden = [32, 64, 16]      # two GRAMLayers: 32->64, 64->16
    degree = 3
    batch = 512                       # 2 batch tiles of 256 -> both v7x TCs busy

    key = jax.random.PRNGKey(0)
    keys = jax.random.split(key, len(layers_hidden))
    kx, layer_keys = keys[0], keys[1:]

    raw_params = [
        init_layer_params(k, i, o, degree)
        for k, i, o in zip(layer_keys, layers_hidden[:-1], layers_hidden[1:])
    ]
    # One-time host-side weight prep (base+gram fusion, lane padding, bf16 casts,
    # beta-coefficient folding, degree-0 bias fold).
    prepared = prepare_kagn_params(raw_params, matmul_dtype=jnp.bfloat16)

    x = jax.random.normal(kx, (batch, layers_hidden[0]), jnp.float32)

    out = jax.block_until_ready(kagn_forward(x, prepared, tb=256))

    # Tight check against a reference with identical bf16 operand casts / fused math.
    ref_bf16 = _kagn_ref(x, raw_params, matmul_dtype=jnp.bfloat16)
    # Loose sanity band against the full-f32 (PyTorch-equivalent) math.
    ref_f32 = _kagn_ref(x, raw_params, matmul_dtype=jnp.float32)

    assert out.shape == (batch, layers_hidden[-1]), out.shape
    err_bf16 = float(jnp.max(jnp.abs(out - ref_bf16)))
    err_f32 = float(jnp.max(jnp.abs(out - ref_f32)))
    assert jnp.allclose(out, ref_bf16, atol=5e-3, rtol=5e-3), err_bf16
    assert jnp.allclose(out, ref_f32, atol=1e-1, rtol=1e-1), err_f32
    print("KERNEL_OK")
</pallas_src>

<mosaic_0001>
module attributes {stable_mosaic.version = 11 : i64} {
  func.func @kernel(%arg0: i32, %arg1: memref<256x128xf32, #tpu.memory_space<vmem>>, %arg2: memref<8xf32, #tpu.memory_space<smem>>, %arg3: memref<512x128xbf16, #tpu.memory_space<vmem>>, %arg4: memref<4x128xf32, #tpu.memory_space<vmem>>, %arg5: memref<512x128xbf16, #tpu.memory_space<vmem>>, %arg6: memref<4x128xf32, #tpu.memory_space<vmem>>, %arg7: memref<256x128xf32, #tpu.memory_space<vmem>>) attributes {dimension_semantics = [#tpu.dimension_semantics<parallel>], iteration_bounds = array<i64: 2>, scalar_prefetch = 0 : i64, scratch_operands = 0 : i64, tpu.core_type = #tpu.core_type<tc>, window_params = [{transform_indices = @transform_0, window_bounds = array<i64: 256, 128>}, {transform_indices = @transform_1, window_bounds = array<i64: 8>}, {pipeline_mode = #tpu.pipeline_mode<synchronous>, transform_indices = @transform_2, window_bounds = array<i64: 512, 128>}, {pipeline_mode = #tpu.pipeline_mode<synchronous>, transform_indices = @transform_3, window_bounds = array<i64: 4, 128>}, {pipeline_mode = #tpu.pipeline_mode<synchronous>, transform_indices = @transform_4, window_bounds = array<i64: 512, 128>}, {pipeline_mode = #tpu.pipeline_mode<synchronous>, transform_indices = @transform_5, window_bounds = array<i64: 4, 128>}, {transform_indices = @transform_6, window_bounds = array<i64: 256, 128>}]} {
    %c0 = arith.constant 0 : index
    %c0_0 = arith.constant 0 : index
    %0 = vector.load %arg1[%c0, %c0_0] : memref<256x128xf32, #tpu.memory_space<vmem>>, vector<256x128xf32>
    %cst = arith.constant 5.000000e-01 : f32
    %1 = vector.broadcast %cst : f32 to vector<256x128xf32>
    %2 = arith.mulf %1, %0 : vector<256x128xf32>
    %cst_1 = arith.constant 5.000000e-01 : f32
    %3 = vector.broadcast %cst_1 : f32 to vector<256x128xf32>
    %4 = arith.mulf %3, %0 : vector<256x128xf32>
    %5 = math.tanh %4 : vector<256x128xf32>
    %cst_2 = arith.constant 1.000000e+00 : f32
    %6 = vector.broadcast %cst_2 : f32 to vector<256x128xf32>
    %7 = arith.addf %6, %5 : vector<256x128xf32>
    %8 = arith.mulf %2, %7 : vector<256x128xf32>
    %9 = arith.truncf %8 : vector<256x128xf32> to vector<256x128xbf16>
    %10 = math.tanh %0 : vector<256x128xf32>
    %cst_3 = arith.constant 5.000000e-01 : f32
    %11 = vector.broadcast %cst_3 : f32 to vector<256x128xf32>
    %12 = arith.mulf %11, %10 : vector<256x128xf32>
    %cst_4 = arith.constant 5.000000e-01 : f32
    %13 = vector.broadcast %cst_4 : f32 to vector<256x128xf32>
    %14 = arith.mulf %13, %10 : vector<256x128xf32>
    %15 = math.tanh %14 : vector<256x128xf32>
    %cst_5 = arith.constant 1.000000e+00 : f32
    %16 = vector.broadcast %cst_5 : f32 to vector<256x128xf32>
    %17 = arith.addf %16, %15 : vector<256x128xf32>
    %18 = arith.mulf %12, %17 : vector<256x128xf32>
    %19 = arith.truncf %18 : vector<256x128xf32> to vector<256x128xbf16>
    %c2 = arith.constant 2 : index
    %20 = memref.load %arg2[%c2] : memref<8xf32, #tpu.memory_space<smem>>
    %21 = arith.mulf %10, %10 : vector<256x128xf32>
    %22 = vector.broadcast %20 : f32 to vector<256x128xf32>
    %23 = arith.subf %21, %22 : vector<256x128xf32>
    %cst_6 = arith.constant 5.000000e-01 : f32
    %24 = vector.broadcast %cst_6 : f32 to vector<256x128xf32>
    %25 = arith.mulf %24, %23 : vector<256x128xf32>
    %cst_7 = arith.constant 5.000000e-01 : f32
    %26 = vector.broadcast %cst_7 : f32 to vector<256x128xf32>
    %27 = arith.mulf %26, %23 : vector<256x128xf32>
    %28 = math.tanh %27 : vector<256x128xf32>
    %cst_8 = arith.constant 1.000000e+00 : f32
    %29 = vector.broadcast %cst_8 : f32 to vector<256x128xf32>
    %30 = arith.addf %29, %28 : vector<256x128xf32>
    %31 = arith.mulf %25, %30 : vector<256x128xf32>
    %32 = arith.truncf %31 : vector<256x128xf32> to vector<256x128xbf16>
    %c3 = arith.constant 3 : index
    %33 = memref.load %arg2[%c3] : memref<8xf32, #tpu.memory_space<smem>>
    %34 = arith.mulf %10, %23 : vector<256x128xf32>
    %35 = vector.broadcast %33 : f32 to vector<256x128xf32>
    %36 = arith.mulf %35, %10 : vector<256x128xf32>
    %37 = arith.subf %34, %36 : vector<256x128xf32>
    %cst_9 = arith.constant 5.000000e-01 : f32
    %38 = vector.broadcast %cst_9 : f32 to vector<256x128xf32>
    %39 = arith.mulf %38, %37 : vector<256x128xf32>
    %cst_10 = arith.constant 5.000000e-01 : f32
    %40 = vector.broadcast %cst_10 : f32 to vector<256x128xf32>
    %41 = arith.mulf %40, %37 : vector<256x128xf32>
    %42 = math.tanh %41 : vector<256x128xf32>
    %cst_11 = arith.constant 1.000000e+00 : f32
    %43 = vector.broadcast %cst_11 : f32 to vector<256x128xf32>
    %44 = arith.addf %43, %42 : vector<256x128xf32>
    %45 = arith.mulf %39, %44 : vector<256x128xf32>
    %46 = arith.truncf %45 : vector<256x128xf32> to vector<256x128xbf16>
    %47 = tpu.concatenate %9, %19, %32, %46 in 1 : vector<256x128xbf16>, vector<256x128xbf16>, vector<256x128xbf16>, vector<256x128xbf16> -> vector<256x512xbf16>
    %c0_12 = arith.constant 0 : index
    %c0_13 = arith.constant 0 : index
    %48 = vector.load %arg3[%c0_12, %c0_13] : memref<512x128xbf16, #tpu.memory_space<vmem>>, vector<512x128xbf16>
    %cst_14 = arith.constant dense<0.000000e+00> : vector<256x128xf32>
    %49 = tpu.matmul %47, %48, %cst_14 {dimension_numbers = #tpu.dot_dimension_numbers<[1], [0], [0], [1], [0, 0, 1, 1], [], []>} : vector<256x512xbf16>, vector<512x128xbf16>, vector<256x128xf32> -> vector<256x128xf32>
    %c0_15 = arith.constant 0 : index
    %c0_16 = arith.constant 0 : index
    %50 = vector.load %arg4[%c0_15, %c0_16] : memref<4x128xf32, #tpu.memory_space<vmem>>, vector<1x128xf32>
    %51 = vector.broadcast %50 : vector<1x128xf32> to vector<256x128xf32>
    %52 = arith.addf %49, %51 : vector<256x128xf32>
    %c1 = arith.constant 1 : index
    %c0_17 = arith.constant 0 : index
    %53 = vector.load %arg4[%c1, %c0_17] : memref<4x128xf32, #tpu.memory_space<vmem>>, vector<1x128xf32>
    %c2_18 = arith.constant 2 : index
    %c0_19 = arith.constant 0 : index
    %54 = vector.load %arg4[%c2_18, %c0_19] : memref<4x128xf32, #tpu.memory_space<vmem>>, vector<1x128xf32>
    %c3_20 = arith.constant 3 : index
    %c0_21 = arith.constant 0 : index
    %55 = vector.load %arg4[%c3_20, %c0_21] : memref<4x128xf32, #tpu.memory_space<vmem>>, vector<1x128xf32>
    %cst_22 = arith.constant dense<0.000000e+00> : vector<256xf32>
    %56 = vector.multi_reduction <add>, %52, %cst_22 [1] : vector<256x128xf32> to vector<256xf32>
    %57 = vector.shape_cast %56 : vector<256xf32> to vector<256x1xf32>
    %cst_23 = arith.constant 1.562500e-02 : f32
    %58 = vector.broadcast %cst_23 : f32 to vector<256x1xf32>
    %59 = arith.mulf %57, %58 : vector<256x1xf32>
    %60 = vector.broadcast %59 : vector<256x1xf32> to vector<256x128xf32>
    %61 = arith.subf %52, %60 : vector<256x128xf32>
    %62 = vector.broadcast %55 : vector<1x128xf32> to vector<256x128xf32>
    %63 = arith.mulf %61, %62 : vector<256x128xf32>
    %64 = arith.mulf %63, %63 : vector<256x128xf32>
    %cst_24 = arith.constant dense<0.000000e+00> : vector<256xf32>
    %65 = vector.multi_reduction <add>, %64, %cst_24 [1] : vector<256x128xf32> to vector<256xf32>
    %66 = vector.shape_cast %65 : vector<256xf32> to vector<256x1xf32>
    %cst_25 = arith.constant 1.562500e-02 : f32
    %67 = vector.broadcast %cst_25 : f32 to vector<256x1xf32>
    %68 = arith.mulf %66, %67 : vector<256x1xf32>
    %cst_26 = arith.constant 9.99999974E-6 : f32
    %69 = vector.broadcast %cst_26 : f32 to vector<256x1xf32>
    %70 = arith.addf %68, %69 : vector<256x1xf32>
    %71 = math.rsqrt %70 : vector<256x1xf32>
    %72 = vector.broadcast %71 : vector<256x1xf32> to vector<256x128xf32>
    %73 = arith.mulf %63, %72 : vector<256x128xf32>
    %74 = vector.broadcast %53 : vector<1x128xf32> to vector<256x128xf32>
    %75 = arith.mulf %73, %74 : vector<256x128xf32>
    %76 = vector.broadcast %54 : vector<1x128xf32> to vector<256x128xf32>
    %77 = arith.addf %75, %76 : vector<256x128xf32>
    %cst_27 = arith.constant 5.000000e-01 : f32
    %78 = vector.broadcast %cst_27 : f32 to vector<256x128xf32>
    %79 = arith.mulf %78, %77 : vector<256x128xf32>
    %cst_28 = arith.constant 5.000000e-01 : f32
    %80 = vector.broadcast %cst_28 : f32 to vector<256x128xf32>
    %81 = arith.mulf %80, %77 : vector<256x128xf32>
    %82 = math.tanh %81 : vector<256x128xf32>
    %cst_29 = arith.constant 1.000000e+00 : f32
    %83 = vector.broadcast %cst_29 : f32 to vector<256x128xf32>
    %84 = arith.addf %83, %82 : vector<256x128xf32>
    %85 = arith.mulf %79, %84 : vector<256x128xf32>
    %cst_30 = arith.constant 5.000000e-01 : f32
    %86 = vector.broadcast %cst_30 : f32 to vector<256x128xf32>
    %87 = arith.mulf %86, %85 : vector<256x128xf32>
    %cst_31 = arith.constant 5.000000e-01 : f32
    %88 = vector.broadcast %cst_31 : f32 to vector<256x128xf32>
    %89 = arith.mulf %88, %85 : vector<256x128xf32>
    %90 = math.tanh %89 : vector<256x128xf32>
    %cst_32 = arith.constant 1.000000e+00 : f32
    %91 = vector.broadcast %cst_32 : f32 to vector<256x128xf32>
    %92 = arith.addf %91, %90 : vector<256x128xf32>
    %93 = arith.mulf %87, %92 : vector<256x128xf32>
    %94 = arith.truncf %93 : vector<256x128xf32> to vector<256x128xbf16>
    %95 = math.tanh %85 : vector<256x128xf32>
    %cst_33 = arith.constant 5.000000e-01 : f32
    %96 = vector.broadcast %cst_33 : f32 to vector<256x128xf32>
    %97 = arith.mulf %96, %95 : vector<256x128xf32>
    %cst_34 = arith.constant 5.000000e-01 : f32
    %98 = vector.broadcast %cst_34 : f32 to vector<256x128xf32>
    %99 = arith.mulf %98, %95 : vector<256x128xf32>
    %100 = math.tanh %99 : vector<256x128xf32>
    %cst_35 = arith.constant 1.000000e+00 : f32
    %101 = vector.broadcast %cst_35 : f32 to vector<256x128xf32>
    %102 = arith.addf %101, %100 : vector<256x128xf32>
    %103 = arith.mulf %97, %102 : vector<256x128xf32>
    %104 = arith.truncf %103 : vector<256x128xf32> to vector<256x128xbf16>
    %c6 = arith.constant 6 : index
    %105 = memref.load %arg2[%c6] : memref<8xf32, #tpu.memory_space<smem>>
    %106 = arith.mulf %95, %95 : vector<256x128xf32>
    %107 = vector.broadcast %105 : f32 to vector<256x128xf32>
    %108 = arith.subf %106, %107 : vector<256x128xf32>
    %cst_36 = arith.constant 5.000000e-01 : f32
    %109 = vector.broadcast %cst_36 : f32 to vector<256x128xf32>
    %110 = arith.mulf %109, %108 : vector<256x128xf32>
    %cst_37 = arith.constant 5.000000e-01 : f32
    %111 = vector.broadcast %cst_37 : f32 to vector<256x128xf32>
    %112 = arith.mulf %111, %108 : vector<256x128xf32>
    %113 = math.tanh %112 : vector<256x128xf32>
    %cst_38 = arith.constant 1.000000e+00 : f32
    %114 = vector.broadcast %cst_38 : f32 to vector<256x128xf32>
    %115 = arith.addf %114, %113 : vector<256x128xf32>
    %116 = arith.mulf %110, %115 : vector<256x128xf32>
    %117 = arith.truncf %116 : vector<256x128xf32> to vector<256x128xbf16>
    %c7 = arith.constant 7 : index
    %118 = memref.load %arg2[%c7] : memref<8xf32, #tpu.memory_space<smem>>
    %119 = arith.mulf %95, %108 : vector<256x128xf32>
    %120 = vector.broadcast %118 : f32 to vector<256x128xf32>
    %121 = arith.mulf %120, %95 : vector<256x128xf32>
    %122 = arith.subf %119, %121 : vector<256x128xf32>
    %cst_39 = arith.constant 5.000000e-01 : f32
    %123 = vector.broadcast %cst_39 : f32 to vector<256x128xf32>
    %124 = arith.mulf %123, %122 : vector<256x128xf32>
    %cst_40 = arith.constant 5.000000e-01 : f32
    %125 = vector.broadcast %cst_40 : f32 to vector<256x128xf32>
    %126 = arith.mulf %125, %122 : vector<256x128xf32>
    %127 = math.tanh %126 : vector<256x128xf32>
    %cst_41 = arith.constant 1.000000e+00 : f32
    %128 = vector.broadcast %cst_41 : f32 to vector<256x128xf32>
    %129 = arith.addf %128, %127 : vector<256x128xf32>
    %130 = arith.mulf %124, %129 : vector<256x128xf32>
    %131 = arith.truncf %130 : vector<256x128xf32> to vector<256x128xbf16>
    %132 = tpu.concatenate %94, %104, %117, %131 in 1 : vector<256x128xbf16>, vector<256x128xbf16>, vector<256x128xbf16>, vector<256x128xbf16> -> vector<256x512xbf16>
    %c0_42 = arith.constant 0 : index
    %c0_43 = arith.constant 0 : index
    %133 = vector.load %arg5[%c0_42, %c0_43] : memref<512x128xbf16, #tpu.memory_space<vmem>>, vector<512x128xbf16>
    %cst_44 = arith.constant dense<0.000000e+00> : vector<256x128xf32>
    %134 = tpu.matmul %132, %133, %cst_44 {dimension_numbers = #tpu.dot_dimension_numbers<[1], [0], [0], [1], [0, 0, 1, 1], [], []>} : vector<256x512xbf16>, vector<512x128xbf16>, vector<256x128xf32> -> vector<256x128xf32>
    %c0_45 = arith.constant 0 : index
    %c0_46 = arith.constant 0 : index
    %135 = vector.load %arg6[%c0_45, %c0_46] : memref<4x128xf32, #tpu.memory_space<vmem>>, vector<1x128xf32>
    %136 = vector.broadcast %135 : vector<1x128xf32> to vector<256x128xf32>
    %137 = arith.addf %134, %136 : vector<256x128xf32>
    %c1_47 = arith.constant 1 : index
    %c0_48 = arith.constant 0 : index
    %138 = vector.load %arg6[%c1_47, %c0_48] : memref<4x128xf32, #tpu.memory_space<vmem>>, vector<1x128xf32>
    %c2_49 = arith.constant 2 : index
    %c0_50 = arith.constant 0 : index
    %139 = vector.load %arg6[%c2_49, %c0_50] : memref<4x128xf32, #tpu.memory_space<vmem>>, vector<1x128xf32>
    %c3_51 = arith.constant 3 : index
    %c0_52 = arith.constant 0 : index
    %140 = vector.load %arg6[%c3_51, %c0_52] : memref<4x128xf32, #tpu.memory_space<vmem>>, vector<1x128xf32>
    %cst_53 = arith.constant dense<0.000000e+00> : vector<256xf32>
    %141 = vector.multi_reduction <add>, %137, %cst_53 [1] : vector<256x128xf32> to vector<256xf32>
    %142 = vector.shape_cast %141 : vector<256xf32> to vector<256x1xf32>
    %cst_54 = arith.constant 6.250000e-02 : f32
    %143 = vector.broadcast %cst_54 : f32 to vector<256x1xf32>
    %144 = arith.mulf %142, %143 : vector<256x1xf32>
    %145 = vector.broadcast %144 : vector<256x1xf32> to vector<256x128xf32>
    %146 = arith.subf %137, %145 : vector<256x128xf32>
    %147 = vector.broadcast %140 : vector<1x128xf32> to vector<256x128xf32>
    %148 = arith.mulf %146, %147 : vector<256x128xf32>
    %149 = arith.mulf %148, %148 : vector<256x128xf32>
    %cst_55 = arith.constant dense<0.000000e+00> : vector<256xf32>
    %150 = vector.multi_reduction <add>, %149, %cst_55 [1] : vector<256x128xf32> to vector<256xf32>
    %151 = vector.shape_cast %150 : vector<256xf32> to vector<256x1xf32>
    %cst_56 = arith.constant 6.250000e-02 : f32
    %152 = vector.broadcast %cst_56 : f32 to vector<256x1xf32>
    %153 = arith.mulf %151, %152 : vector<256x1xf32>
    %cst_57 = arith.constant 9.99999974E-6 : f32
    %154 = vector.broadcast %cst_57 : f32 to vector<256x1xf32>
    %155 = arith.addf %153, %154 : vector<256x1xf32>
    %156 = math.rsqrt %155 : vector<256x1xf32>
    %157 = vector.broadcast %156 : vector<256x1xf32> to vector<256x128xf32>
    %158 = arith.mulf %148, %157 : vector<256x128xf32>
    %159 = vector.broadcast %138 : vector<1x128xf32> to vector<256x128xf32>
    %160 = arith.mulf %158, %159 : vector<256x128xf32>
    %161 = vector.broadcast %139 : vector<1x128xf32> to vector<256x128xf32>
    %162 = arith.addf %160, %161 : vector<256x128xf32>
    %cst_58 = arith.constant 5.000000e-01 : f32
    %163 = vector.broadcast %cst_58 : f32 to vector<256x128xf32>
    %164 = arith.mulf %163, %162 : vector<256x128xf32>
    %cst_59 = arith.constant 5.000000e-01 : f32
    %165 = vector.broadcast %cst_59 : f32 to vector<256x128xf32>
    %166 = arith.mulf %165, %162 : vector<256x128xf32>
    %167 = math.tanh %166 : vector<256x128xf32>
    %cst_60 = arith.constant 1.000000e+00 : f32
    %168 = vector.broadcast %cst_60 : f32 to vector<256x128xf32>
    %169 = arith.addf %168, %167 : vector<256x128xf32>
    %170 = arith.mulf %164, %169 : vector<256x128xf32>
    %c0_61 = arith.constant 0 : index
    %c0_62 = arith.constant 0 : index
    %171 = vector.load %arg7[%c0_61, %c0_62] : memref<256x128xf32, #tpu.memory_space<vmem>>, vector<256x128xf32>
    tpu.vector_store %arg7[%c0_61, %c0_62], %170 {strides = array<i32>} : memref<256x128xf32, #tpu.memory_space<vmem>>, vector<256x128xf32>,
    return
  }
  func.func @transform_0(%arg0: i32) -> (i32, i32) {
    %c0_i32 = arith.constant 0 : i32
    %c0_i32_0 = arith.constant 0 : i32
    return %arg0, %c0_i32 : i32, i32
  }
  func.func @transform_1(%arg0: i32) -> i32 {
    %c0_i32 = arith.constant 0 : i32
    %c0_i32_0 = arith.constant 0 : i32
    return %c0_i32 : i32
  }
  func.func @transform_2(%arg0: i32) -> (i32, i32) {
    %c0_i32 = arith.constant 0 : i32
    %c0_i32_0 = arith.constant 0 : i32
    %c0_i32_1 = arith.constant 0 : i32
    return %c0_i32, %c0_i32_0 : i32, i32
  }
  func.func @transform_3(%arg0: i32) -> (i32, i32) {
    %c0_i32 = arith.constant 0 : i32
    %c0_i32_0 = arith.constant 0 : i32
    %c0_i32_1 = arith.constant 0 : i32
    return %c0_i32, %c0_i32_0 : i32, i32
  }
  func.func @transform_4(%arg0: i32) -> (i32, i32) {
    %c0_i32 = arith.constant 0 : i32
    %c0_i32_0 = arith.constant 0 : i32
    %c0_i32_1 = arith.constant 0 : i32
    return %c0_i32, %c0_i32_0 : i32, i32
  }
  func.func @transform_5(%arg0: i32) -> (i32, i32) {
    %c0_i32 = arith.constant 0 : i32
    %c0_i32_0 = arith.constant 0 : i32
    %c0_i32_1 = arith.constant 0 : i32
    return %c0_i32, %c0_i32_0 : i32, i32
  }
  func.func @transform_6(%arg0: i32) -> (i32, i32) {
    %c0_i32 = arith.constant 0 : i32
    %c0_i32_0 = arith.constant 0 : i32
    return %arg0, %c0_i32 : i32, i32
  }
}

</mosaic_0001>

<bundles_post_ra>
// kernel: tpu_custom_call.1
= control target key start
LH: loop header
LB: loop body
LE: loop exit
PB: predicated region body
PF: predicated region fallthrough
CT: control target
= control target key end

     0   :  { %11 = vsyncpa [#allocation3], 0  ;;  %s9058_s0 = inlined_call_operand.hbm [shape: f32[512,128], index: 0, kind: input, shape index: {}]   ;;  %s9059_s1 = inlined_call_operand.vmem [shape: f32[8], index: 1, kind: input, shape index: {}]   ;;  %s9060_s2 = inlined_call_operand.hbm [shape: bf16[512,128], index: 2, kind: input, shape index: {}]   ;;  %s9061_s3 = inlined_call_operand.vmem [shape: f32[4,128], index: 3, kind: input, shape index: {}]   ;;  %s9062_s4 = inlined_call_operand.hbm [shape: bf16[512,128], index: 4, kind: input, shape index: {}]   ;;  %s9063_s5 = inlined_call_operand.vmem [shape: f32[4,128], index: 5, kind: input, shape index: {}]   ;;  %s9064_s6 = inlined_call_operand.hbm [shape: f32[512,128], index: 6, kind: output, shape index: {}]  }
   0x1   :  { %13 = vsyncpa [#allocation3 + $0x1], 0 }
   0x2   :  { %14 = vsyncpa [#allocation5], 0 }
   0x3   :  { %15 = vsyncpa [#allocation8], 0 }
   0x4   :  { %16 = vsyncpa [#allocation4], 0 }
   0x5   :  { %18 = vsyncpa [#allocation4 + $0x1], 0  ;;  %s6206_s21 = smov 0   ;;  %s6208_s22 = smov 0  }
   0x6   :  { %s6210_s23 = smov 0   ;;  %s6212_s24 = smov 0  }
   0x7 LB: > { %s6227_s25 = sadd.s32 4294967295, %s6158_s24   ;;  %s4390_s26 = sadd.s32 4294967294, %s6158_s24   ;;  %s6158_s24 = sphi %s6212_s24, %s9100_s24   ;;  %s6154_s23 = sphi %s6210_s23, %s9099_s23   ;;  %s6150_s22 = sphi %s6208_s22, %s9098_s22   ;;  %s6146_s21 = sphi %s6206_s21, %s9097_s21  }
   0x8   : > { %p44_p0 = scmp.ne.s32.totalorder %s6150_s22, %s6146_s21  ;;  %p9065_p1 = scmp.eq.s32.totalorder %s6227_s25, 0 }
   0x9   : > { %p179_p3 = scmp.eq.s32.totalorder %s4390_s26, 1  ;;  %p4391_p5 = scmp.ge.s32.totalorder %s6158_s24, 1 }
   0xa   : > { %p6236_p4 = por %p9065_p1, %p44_p0  ;;  %p186_p7 = scmp.lt.s32.totalorder %s6158_s24, 3 }
   0xb   : > { %p6241_p6 = por %p179_p3, %p44_p0  ;;  %s6160_s30 = smov [#allocation7]  }
   0xc   : > { %s9072_s27 = scalar_select %p6236_p4, 1, 0 }
   0xd   : > { %s9073_s28 = scalar_select %p6241_p6, 1, 0 }
   0xe   : > { %p6246_p8 = pnand %p4391_p5, %p186_p7  ;;  %s209_s7 = sshll.u32 %s6160_s30, 4  ;;  %s6250_s7 = int_to_ptr.vmem [resolvable:$true] %s209_s7 }
   0xf   : > { %s199_s10 = sshll.u32 %s9059_s1, 4  ;;  %s6161_s12 = smov [#allocation9]   ;;  %s6264_s10 = int_to_ptr.vmem [resolvable:$true] %s199_s10 }
  0x10   : > { %s9074_s29 = scalar_select %p6246_p8, 1, 0 }
  0x11   : > { %p4952_p9 = pneg %p6246_p8  ;;  %s6266_s13 = sshll.u32 %s6161_s12, 4  ;;  %s226_s13 = int_to_ptr.vmem [resolvable:$true] %s6266_s13 }
  0x12   : > { %s5983_s16 = scalar_lea.hbm %s9060_s2, 4096 }
  0x13   : > { %p6260_p11 = pnand %p4952_p9, %p9065_p1  ;;  %p5984_p12 = scmp.ne.s32.totalorder %s9060_s2, %s5983_s16 }
  0x14   : > { %p5990_p5 = scmp.lt.u32.totalorder %s5983_s16, %s9060_s2 }
  0x15   : > { %p6276_p13 = pneg %p6260_p11 }
  0x17   : > { %p5986_p0 = pnand %p6276_p13, %p5984_p12 }
  0x19   : > { %p5987_p3 = pneg %p5986_p0 }
  0x1b   : > { %p5992_p7 = pnand %p5990_p5, %p5987_p3 }
  0x1d   : > { %5995 = shalt.err (!%p5992_p7)
}
  0x1e   : > { %s5996_s30 = scalar_lea.vmem %s6250_s7, 4096  ;;  %p6004_p2 = scmp.lt.s32.totalorder %s6250_s7, %s6250_s7 }
  0x1f   : > { %p5997_p9 = scmp.ne.s32.totalorder %s6250_s7, %s5996_s30  ;;  %p6005_p6 = scmp.lt.s32.totalorder %s5996_s30, %s5996_s30 }
  0x21   : > { %p5999_p10 = pnand %p5997_p9, %p6276_p13  ;;  %p6006_p12 = por %p6005_p6, %p6004_p2 }
  0x23   : > { %p6000_p1 = pneg %p5999_p10 }
  0x25   : > { %p6007_p0 = pnand %p6006_p12, %p6000_p1 }
  0x27   : > { %6010 = shalt.err (!%p6007_p0)
}
  0x28   : > { %s6162_s8 = smov 64   ;;  %s6163_s9 = smov 4  }
  0x29   : > { %4958 = dma.hbm_to_vmem [thread:$0]  (!%p6260_p11), %s9060_s2, 4096, %s6250_s7, [#allocation8], %s6162_s8, %s6162_s8, %s6163_s9  }
  0x2a   : > { %s6011_s15 = scalar_lea.vmem %s6264_s10, 16  ;;  %p6019_p10 = scmp.lt.s32.totalorder %s6264_s10, %s6264_s10 }
  0x2b   : > { %p6012_p2 = scmp.ne.s32.totalorder %s6264_s10, %s6011_s15  ;;  %p6020_p3 = scmp.lt.s32.totalorder %s6011_s15, %s6011_s15 }
  0x2d   : > { %p6014_p1 = pnand %p6012_p2, %p6276_p13  ;;  %p6021_p5 = por %p6020_p3, %p6019_p10 }
  0x2f   : > { %p6015_p6 = pneg %p6014_p1 }
  0x31   : > { %p6022_p7 = pnand %p6021_p5, %p6015_p6 }
  0x33   : > { %6025 = shalt.err (!%p6022_p7)
}
  0x34   : > { %s6164_s16 = smov [#allocation6]   ;;  %s6026_s18 = scalar_lea.hbm %s9062_s4, 4096 }
  0x35   : > { %4955 = dma.vmem_to_smem (!%p6260_p11), %s6264_s10, 16, %s6164_s16, [#allocation5]  }
  0x36   : > { %p6027_p9 = scmp.ne.s32.totalorder %s9062_s4, %s6026_s18  ;;  %p6033_p2 = scmp.lt.u32.totalorder %s6026_s18, %s9062_s4 }
  0x38   : > { %p6029_p12 = pnand %p6027_p9, %p6276_p13 }
  0x3a   : > { %p6030_p0 = pneg %p6029_p12 }
  0x3c   : > { %p6035_p1 = pnand %p6033_p2, %p6030_p0 }
  0x3e   : > { %6038 = shalt.err (!%p6035_p1)
}
  0x3f   : > { %s6039_s14 = scalar_lea.vmem %s226_s13, 4096  ;;  %p6047_p5 = scmp.lt.s32.totalorder %s226_s13, %s226_s13 }
  0x40   : > { %p6040_p6 = scmp.ne.s32.totalorder %s226_s13, %s6039_s14  ;;  %p6048_p7 = scmp.lt.s32.totalorder %s6039_s14, %s6039_s14 }
  0x42   : > { %p6042_p10 = pnand %p6040_p6, %p6276_p13  ;;  %p6049_p4 = por %p6048_p7, %p6047_p5 }
  0x44   : > { %p6043_p3 = pneg %p6042_p10 }
  0x46   : > { %p6050_p8 = pnand %p6049_p4, %p6043_p3 }
  0x48   : > { %6053 = shalt.err (!%p6050_p8)
}
  0x49   : > { %4961 = dma.hbm_to_vmem [thread:$0]  (!%p6260_p11), %s9062_s4, 4096, %s226_s13, [#allocation8], %s6162_s8, %s6162_s8, %s6163_s9  }
  0x4a   : > { %s6332_s19 = sadd.s32 1, %s6158_s24   ;;  %s31_s16 = sadd.s32 1, %s6154_s23 }
  0x4b   : > { %s28_s11 = ssub.s32 %s6158_s24, %s6332_s19  ;;  %p38_p8 = scmp.ne.s32.totalorder %s6154_s23, %s6150_s22 }
  0x4c   : > { %p29_p4 = scmp.eq.s32.totalorder %s28_s11, 0  ;;  %p39_p13 = scmp.eq.s32.totalorder %s6158_s24, 0 }
  0x4d   : > { %p4973_p9 = scmp.lt.s32.totalorder %s6158_s24, 2  ;;  %p9077_p0 = scmp.eq.s32.totalorder %s6227_s25, 1 }
  0x4e   : > { %s6342_s7 = scalar_select %p29_p4, %s6154_s23, %s31_s16  }
  0x4f   : > { %p40_p12 = por %p39_p13, %p38_p8  ;;  %p6346_p2 = por %p9077_p0, %p38_p8 }
  0x50   : > { %s242_s18 = sand.u32 1, %s6154_s23   ;;  %s4486_s20 = sshll.u32 %s6158_s24, 12 }
  0x51   : > { %s4396_s13 = sshll.u32 %s242_s18, 8  ;;  %s6355_s26 = scalar_lea.hbm %s9058_s0, %s4486_s20 }
  0x52   : > { %s246_s30 = scalar_lea.vmem [#allocation2], %s4396_s13  ;;  %p6357_p11 = pnand %p4973_p9, %p40_p12 }
  0x53   : > { %s253_s12 = sshll.u32 %s246_s30, 4  ;;  %s6363_s10 = scalar_lea.sflag [#allocation3], %s242_s18  ;;  %s6361_s12 = int_to_ptr.vmem [resolvable:$true] %s253_s12 }
  0x54   : > { %s6054_s15 = scalar_lea.hbm %s6355_s26, 4096  ;;  %p6056_p6 = pneg %p6357_p11 }
  0x55   : > { %p6055_p1 = scmp.ne.s32.totalorder %s6355_s26, %s6054_s15  ;;  %s6059_s20 = scalar_lea.hbm %s9058_s0, 8192 }
  0x56   : > { %p6060_p5 = scmp.lt.u32.totalorder %s6355_s26, %s9058_s0  ;;  %p6061_p7 = scmp.lt.u32.totalorder %s6059_s20, %s6054_s15 }
  0x57   : > { %p6057_p10 = pnand %p6056_p6, %p6055_p1  ;;  %p6063_p8 = scmp.lt.u32.totalorder %s6054_s15, %s6355_s26 }
  0x58   : > { %p6062_p4 = por %p6061_p7, %p6060_p5 }
  0x59   : > { %p6058_p3 = pneg %p6057_p10 }
  0x5a   : > { %p6064_p13 = por %p6063_p8, %p6062_p4 }
  0x5c   : > { %p6065_p9 = pnand %p6064_p13, %p6058_p3 }
  0x5e   : > { %6068 = shalt.err (!%p6065_p9)
}
  0x5f   : > { %s6069_s18 = scalar_lea.vmem %s6361_s12, 4096  ;;  %s6165_s9 = smov [#allocation2]  }
  0x60   : > { %p6070_p12 = scmp.ne.s32.totalorder %s6361_s12, %s6069_s18  ;;  %s6074_s30 = sshll.u32 %s6165_s9, 4  ;;  %s6075_s30 = int_to_ptr.vmem [resolvable:$false] %s6074_s30 }
  0x61   : > { %s6076_s11 = scalar_lea.vmem %s6075_s30, 8192  ;;  %p6077_p10 = scmp.lt.s32.totalorder %s6361_s12, %s6075_s30 }
  0x62   : > { %p6072_p0 = pnand %p6070_p12, %p6056_p6  ;;  %p6078_p5 = scmp.lt.s32.totalorder %s6076_s11, %s6069_s18 }
  0x64   : > { %p6073_p1 = pneg %p6072_p0  ;;  %p6079_p7 = por %p6078_p5, %p6077_p10 }
  0x66   : > { %p6080_p4 = pnand %p6079_p7, %p6073_p1 }
  0x68   : > { %6083 = shalt.err (!%p6080_p4)
}
  0x69   : > { %s6166_s15 = smov 128   ;;  %s6167_s16 = smov 8  }
  0x6a   : > { %4965 = dma.hbm_to_vmem [thread:$0]  (!%p6357_p11), %s6355_s26, 4096, %s6361_s12, %s6363_s10, %s6166_s15, %s6166_s15, %s6167_s16  }
  0x6b   : > { %p9080_p6 = scmp.ne.s32.totalorder %s9074_s29, 0 }
  0x6d   : > { %265 = sbr.rel (%p9080_p6) target bundleno = 1583 (0x62f), region = 44 }
  0x74   : > { %s6394_s20 = sand.u32 1, %s6150_s22   ;;  %p9081_p3 = scmp.ne.s32.totalorder %s9072_s27, 0 }
  0x75   : > { %s4400_s13 = sshll.u32 %s6394_s20, 8  ;;  %s268_s8 = scalar_lea.sflag [#allocation3], %s6394_s20 }
  0x76   : > { %s6400_s18 = scalar_lea.vmem [#allocation2], %s4400_s13 }
  0x77   : > { %6129 = dma.done.wait (%p9081_p3), %s268_s8, 4096  }
  0x78   : > { %6131 = vsyncadd (%p9081_p3), %s268_s8, 4294963200  ;;  %p9082_p11 = scmp.eq.s32.totalorder %s6227_s25, 0 }
  0x7a   : > { %6133 = dma.done.wait (%p9082_p11), [#allocation5], 16   ;;  %p9083_p8 = pmov %p9082_p11 }
  0x7c   : > { %6135 = vsyncadd (%p9083_p8), [#allocation5], 4294967280  ;;  %p9084_p13 = pmov %p9083_p8 }
  0x7d   : > { %p9085_p9 = pmov %p9083_p8 }
  0x7e   : > { %6137 = dma.done.wait (%p9084_p13), [#allocation8], 8192  }
  0x7f   : > { %6139 = vsyncadd (%p9085_p9), [#allocation8], 4294959104 }
  0x80   : > { %288 = sfence }
  0x81   : > { %v5019_v0 = vld [vmem:[#allocation7 + $0x40] sm:$0xff]   ;;  %v5021_v2 = vld [vmem:[#allocation7 + $0x48] sm:$0xff]   ;;  %v5025_v6 = vld [vmem:[#allocation7 + $0x50] sm:$0xff]   ;;  %s4405_s27 = sld [smem:[#allocation6 + $0x2]]  ;;  %s4406_s29 = sld [smem:[#allocation6 + $0x3]] }
  0x82   : > { %v5020_v1 = vld [vmem:[#allocation7] sm:$0xff]   ;;  %4488 = vmatprep.subr.bf16.mxu0 %v5019_v0  ;;  %v5022_v3 = vld [vmem:[#allocation7 + $0x8] sm:$0xff]   ;;  %v5026_v7 = vld [vmem:[#allocation7 + $0x10] sm:$0xff]   ;;  %s7415_s16 = sld [smem:[#allocation6 + $0x7]]  ;;  %s7420_s8 = sld [smem:[#allocation6 + $0x6]] }
  0x83   : > { %4489 = vmatpush3.bf16.msra.mxu0 %v5020_v1  ;;  %v5023_v4 = vld [vmem:[#allocation7 + $0xc0] sm:$0xff]   ;;  %v5027_v8 = vld [vmem:[#allocation7 + $0xc8] sm:$0xff]   ;;  %v5029_v10 = vld [vmem:[#allocation7 + $0x58] sm:$0xff]   ;;  %s8884_s26 = scalar_lea.vmem [#allocation10], %s4400_s13  ;;  %s4487_s13 = sshll.u32 %s6227_s25, 12 }
  0x84   : > { %4490 = vmatprep.subr.bf16.mxu0 %v5021_v2  ;;  %v5024_v5 = vld [vmem:[#allocation7 + $0x80] sm:$0xff]   ;;  %4600 = vmatprep.subr.bf16.mxu1 %v5023_v4  ;;  %v5028_v9 = vld [vmem:[#allocation7 + $0x88] sm:$0xff]   ;;  %v5030_v11 = vld [vmem:[#allocation7 + $0x18] sm:$0xff]   ;;  %s4286_s12 = sshll.u32 %s8884_s26, 4  ;;  %s9010_s9 = scalar_lea.hbm %s9064_s6, %s4487_s13  ;;  %s9012_s12 = int_to_ptr.vmem [resolvable:$true] %s4286_s12 }
  0x85   : > { %4601 = vmatpush3.bf16.msra.mxu1 %v5024_v5  ;;  %v5031_v12 = vld [vmem:[#allocation7 + $0xd0] sm:$0xff]   ;;  %v5033_v14 = vld [vmem:[#allocation7 + $0x60] sm:$0xff]   ;;  %v5035_v16 = vld [vmem:[#allocation7 + $0xd8] sm:$0xff]   ;;  %s4273_s30 = scalar_lea.sflag [#allocation4], %s6394_s20  ;;  %s6084_s11 = scalar_lea.vmem %s9012_s12, 4096 }
  0x86   : > { %4602 = vmatprep.subr.bf16.mxu1 %v5027_v8  ;;  %v5032_v13 = vld [vmem:[#allocation7 + $0x90] sm:$0xff]   ;;  %v5034_v15 = vld [vmem:[#allocation7 + $0x20] sm:$0xff]   ;;  %v5036_v17 = vld [vmem:[#allocation7 + $0x98] sm:$0xff]   ;;  %p6085_p12 = scmp.ne.s32.totalorder %s9012_s12, %s6084_s11  ;;  %s6168_s25 = smov [#allocation10]  }
  0x87   : > { %4491 = vmatpush3.bf16.msra.mxu0 %v5022_v3  ;;  %v5037_v18 = vld [vmem:[#allocation7 + $0x68] sm:$0xff]   ;;  %v5039_v20 = vld [vmem:[#allocation7 + $0xe0] sm:$0xff]   ;;  %v5041_v22 = vld [vmem:[#allocation7 + $0x70] sm:$0xff]   ;;  %v6437_v46 = vstv %s4405_s27  ;;  %v6439_v47 = vstv %s4406_s29  ;;  %s6088_s15 = sshll.u32 %s6168_s25, 4  ;;  %s6089_s15 = int_to_ptr.vmem [resolvable:$false] %s6088_s15 }
  0x88   : > { %4492 = vmatprep.subr.bf16.mxu0 %v5025_v6  ;;  %v5038_v19 = vld [vmem:[#allocation7 + $0x28] sm:$0xff]   ;;  %v5040_v21 = vld [vmem:[#allocation7 + $0xa0] sm:$0xff]   ;;  %v5042_v23 = vld [vmem:[#allocation7 + $0x30] sm:$0xff]   ;;  %p6086_p0 = pnand %p6085_p12, %p6346_p2  ;;  %p6091_p10 = scmp.lt.s32.totalorder %s9012_s12, %s6089_s15 }
  0x89   : > { %4603 = vmatpush3.bf16.msra.mxu1 %v5028_v9  ;;  %v5043_v24 = vld [vmem:[#allocation7 + $0xe8] sm:$0xff]   ;;  %v5045_v26 = vld [vmem:[#allocation7 + $0x78] sm:$0xff]   ;;  %v5047_v28 = vld [vmem:[#allocation7 + $0xf0] sm:$0xff]  }
  0x8a   : > { %4604 = vmatprep.subr.bf16.mxu1 %v5031_v12  ;;  %v5044_v25 = vld [vmem:[#allocation7 + $0xa8] sm:$0xff]   ;;  %v5046_v27 = vld [vmem:[#allocation7 + $0x38] sm:$0xff]   ;;  %v5048_v29 = vld [vmem:[#allocation7 + $0xb0] sm:$0xff]   ;;  %p6087_p1 = pneg %p6086_p0 }
  0x8b   : > { %4493 = vmatpush3.bf16.msra.mxu0 %v5026_v7  ;;  %v316_v30 = vld [vmem:[%s6400_s18] sm:$0xff]  ;;  %v317_v31 = vld [vmem:[%s6400_s18 + $0x8] sm:$0xff]  ;;  %v5049_v34 = vld [vmem:[#allocation7 + $0xf8] sm:$0xff]  }
  0x8c   : > { %4494 = vmatprep.subr.bf16.mxu0 %v5029_v10  ;;  %5083 = vtanh.f32 %v316_v30  ;;  %v6416_v32 = vmul.f32 0.5, %v316_v30  ;;  %v6418_v33 = vmul.f32 0.5, %v317_v31  ;;  %v5050_v35 = vld [vmem:[#allocation7 + $0xb8] sm:$0xff]   ;;  %v318_v36 = vld [vmem:[%s6400_s18 + $0x10] sm:$0xff]  ;;  %v320_v40 = vld [vmem:[%s6400_s18 + $0x20] sm:$0xff] }
  0x8d   : > { %4605 = vmatpush3.bf16.msra.mxu1 %v5032_v13  ;;  %5085 = vtanh.f32 %v317_v31  ;;  %v319_v37 = vld [vmem:[%s6400_s18 + $0x18] sm:$0xff]  ;;  %v6424_v38 = vmul.f32 0.5, %v318_v36  ;;  %v321_v41 = vld [vmem:[%s6400_s18 + $0x28] sm:$0xff]  ;;  %v6432_v42 = vmul.f32 0.5, %v320_v40  ;;  %v322_v44 = vld [vmem:[%s6400_s18 + $0x30] sm:$0xff] }
  0x8e   : > { %4606 = vmatprep.subr.bf16.mxu1 %v5035_v16  ;;  %5087 = vtanh.f32 %v6416_v32  ;;  %v6426_v39 = vmul.f32 0.5, %v319_v37  ;;  %v6434_v43 = vmul.f32 0.5, %v321_v41  ;;  %v6442_v48 = vld [vmem:[%s6400_s18 + $0x38] sm:$0xff]  ;;  %v6447_v52 = vmul.f32 0.5, %v322_v44 }
  0x8f   : > { %4495 = vmatpush3.bf16.msra.mxu0 %v5030_v11  ;;  %5089 = vtanh.f32 %v6418_v33  ;;  %v6453_v56 = vmul.f32 0.5, %v6442_v48 }
  0x90   : > { %4496 = vmatprep.subr.bf16.mxu0 %v5033_v14  ;;  %5091 = vtanh.f32 %v318_v36 }
  0x91   : > { %4607 = vmatpush3.bf16.msra.mxu1 %v5036_v17  ;;  %5093 = vtanh.f32 %v319_v37 }
  0x92   : > { %4608 = vmatprep.subr.bf16.mxu1 %v5039_v20  ;;  %5095 = vtanh.f32 %v6424_v38 }
  0x93   : > { %4497 = vmatpush3.bf16.msra.mxu0 %v5034_v15  ;;  %5097 = vtanh.f32 %v6426_v39 }
  0x94   : > { %4498 = vmatprep.subr.bf16.mxu0 %v5037_v18  ;;  %5099 = vtanh.f32 %v320_v40 }
  0x95   : > { %4609 = vmatpush3.bf16.msra.mxu1 %v5040_v21  ;;  %5101 = vtanh.f32 %v321_v41 }
  0x96   : > { %4610 = vmatprep.subr.bf16.mxu1 %v5043_v24  ;;  %v5084_v45 = vpop.eup %5083  ;;  %5103 = vtanh.f32 %v6432_v42 }
  0x97   : > { %4499 = vmatpush3.bf16.msra.mxu0 %v5038_v19  ;;  %v5086_v49 = vpop.eup %5085  ;;  %v6444_v50 = vmul.f32 0.5, %v5084_v45  ;;  %v669_v51 = vmul.f32 %v5084_v45, %v5084_v45  ;;  %5105 = vtanh.f32 %v6434_v43  ;;  %v912_v59 = vmul.f32 %v5084_v45, %v6439_v47 }
  0x98   : > { %4500 = vmatprep.subr.bf16.mxu0 %v5041_v22  ;;  %v5088_v53 = vpop.eup %5087  ;;  %v6449_v54 = vmul.f32 0.5, %v5086_v49  ;;  %v670_v55 = vmul.f32 %v5086_v49, %v5086_v49  ;;  %v913_v60 = vmul.f32 %v5086_v49, %v6439_v47 }
  0x99   : > { %4611 = vmatpush3.bf16.msra.mxu1 %v5044_v25  ;;  %v5090_v57 = vpop.eup %5089  ;;  %5107 = vtanh.f32 %v6444_v50  ;;  %v702_v58 = vsub.f32 %v669_v51, %v6437_v46  ;;  %v412_v62 = vadd.f32 1.0, %v5088_v53 }
  0x9a   : > { %4612 = vmatprep.subr.bf16.mxu1 %v5047_v28  ;;  %v5092_v61 = vpop.eup %5091  ;;  %5109 = vtanh.f32 %v6449_v54  ;;  %v413_v63 = vadd.f32 1.0, %v5090_v57  ;;  %v703_v0 = vsub.f32 %v670_v55, %v6437_v46 }
  0x9b   : > { %4501 = vmatpush3.bf16.msra.mxu0 %v5042_v23  ;;  %v5094_v1 = vpop.eup %5093  ;;  %v879_v2 = vmul.f32 %v5084_v45, %v702_v58  ;;  %v6461_v3 = vmul.f32 0.5, %v702_v58  ;;  %v6463_v4 = vmul.f32 0.5, %v5092_v61  ;;  %5111 = vtanh.f32 %v322_v44 }
  0x9c   : > { %4502 = vmatprep.subr.bf16.mxu0 %v5045_v26  ;;  %v5096_v5 = vpop.eup %5095  ;;  %v880_v6 = vmul.f32 %v5086_v49, %v703_v0  ;;  %v6465_v7 = vmul.f32 0.5, %v703_v0  ;;  %v6467_v8 = vmul.f32 0.5, %v5094_v1  ;;  %v671_v12 = vmul.f32 %v5092_v61, %v5092_v61 }
  0x9d   : > { %4613 = vmatpush3.bf16.msra.mxu1 %v5048_v29  ;;  %v5098_v9 = vpop.eup %5097  ;;  %v944_v10 = vsub.f32 %v879_v2, %v912_v59  ;;  %5113 = vtanh.f32 %v6461_v3  ;;  %v414_v11 = vadd.f32 1.0, %v5096_v5  ;;  %v6471_v13 = vmul.f32 %v412_v62, %v6416_v32 }
  0x9e   : > { %4614 = vmatprep.subr.bf16.mxu1 %v5049_v34  ;;  %v945_v14 = vsub.f32 %v880_v6, %v913_v60  ;;  %5115 = vtanh.f32 %v6465_v7  ;;  %v415_v15 = vadd.f32 1.0, %v5098_v9  ;;  %v6474_v16 = vpop.eup %5099  ;;  %v6477_v17 = vmul.f32 %v413_v63, %v6418_v33 }
  0x9f   : > { %4503 = vmatpush3.bf16.msra.mxu0 %v5046_v27  ;;  %v6479_v18 = vmul.f32 0.5, %v944_v10  ;;  %5117 = vtanh.f32 %v6463_v4  ;;  %v672_v19 = vmul.f32 %v5094_v1, %v5094_v1  ;;  %v6482_v20 = vpop.eup %5101  ;;  %v6488_v22 = vmul.f32 %v414_v11, %v6424_v38 }
  0xa0   : > { %v6484_v21 = vmul.f32 0.5, %v945_v14  ;;  %5119 = vtanh.f32 %v6467_v8  ;;  %v704_v23 = vsub.f32 %v671_v12, %v6437_v46  ;;  %v5104_v24 = vpop.eup %5103  ;;  %v914_v26 = vmul.f32 %v5092_v61, %v6439_v47 }
  0xa1   : > { %4615 = vmatpush3.bf16.msra.mxu1 %v5050_v35  ;;  %5121 = vtanh.f32 %v6479_v18  ;;  %v705_v25 = vsub.f32 %v672_v19, %v6437_v46  ;;  %v915_v27 = vmul.f32 %v5094_v1, %v6439_v47  ;;  %v5106_v28 = vpop.eup %5105  ;;  %v6497_v29 = vmul.f32 %v415_v15, %v6426_v39 }
  0xa2   : > { %5123 = vtanh.f32 %v6484_v21  ;;  %v881_v30 = vmul.f32 %v5092_v61, %v704_v23  ;;  %v6499_v31 = vmul.f32 0.5, %v704_v23  ;;  %v6504_v35 = vmul.f32 0.5, %v6474_v16 }
  0xa3   : > { %v5108_v32 = vpop.eup %5107  ;;  %v882_v33 = vmul.f32 %v5094_v1, %v705_v25  ;;  %v6501_v34 = vmul.f32 0.5, %v705_v25  ;;  %v6507_v36 = vmul.f32 0.5, %v6482_v20  ;;  %v476_v40 = vpack.c.bf16 %v6477_v17, %v6471_v13 }
  0xa4   : > { %v5110_v37 = vpop.eup %5109  ;;  %v588_v38 = vadd.f32 1.0, %v5108_v32  ;;  %v946_v39 = vsub.f32 %v881_v30, %v914_v26  ;;  %5125 = vtanh.f32 %v6499_v31  ;;  %v416_v45 = vadd.f32 1.0, %v5104_v24 }
  0xa5   : > { %v589_v41 = vadd.f32 1.0, %v5110_v37  ;;  %v947_v44 = vsub.f32 %v882_v33, %v915_v27  ;;  %5127 = vtanh.f32 %v6501_v34  ;;  %v6513_v49 = vpop.eup %5111  ;;  %v477_v53 = vpack.c.bf16 %v6497_v29, %v6488_v22 }
  0xa6   : > { %v620_v51 = vmul.f32 %v588_v38, %v6444_v50  ;;  %v6518_v55 = vmul.f32 0.5, %v946_v39  ;;  %5129 = vtanh.f32 %v6504_v35  ;;  %v417_v60 = vadd.f32 1.0, %v5106_v28 }
  0xa7   : > { %v5114_v57 = vpop.eup %5113  ;;  %v621_v58 = vmul.f32 %v589_v41, %v6449_v54  ;;  %v6522_v59 = vmul.f32 0.5, %v947_v44  ;;  %5131 = vtanh.f32 %v6507_v36  ;;  %v673_v50 = vmul.f32 %v6474_v16, %v6474_v16 }
  0xa8   : > { %v5116_v61 = vpop.eup %5115  ;;  %v798_v62 = vadd.f32 1.0, %v5114_v57  ;;  %5133 = vtanh.f32 %v6518_v55  ;;  %v674_v63 = vmul.f32 %v6482_v20, %v6482_v20  ;;  %v6532_v54 = vmul.f32 %v416_v45, %v6432_v42 }
  0xa9   : > { %v5118_v0 = vpop.eup %5117  ;;  %v652_v1 = vpack.c.bf16 %v621_v58, %v620_v51  ;;  %v799_v2 = vadd.f32 1.0, %v5116_v61  ;;  %5135 = vtanh.f32 %v6522_v59  ;;  %v706_v10 = vsub.f32 %v673_v50, %v6437_v46 }
  0xaa   : > { %v5120_v5 = vpop.eup %5119  ;;  %v830_v6 = vmul.f32 %v798_v62, %v6461_v3  ;;  %v590_v9 = vadd.f32 1.0, %v5118_v0  ;;  %v707_v11 = vsub.f32 %v674_v63, %v6437_v46  ;;  %v916_v15 = vmul.f32 %v6474_v16, %v6439_v47 }
  0xab   : > { %v5122_v12 = vpop.eup %5121  ;;  %1413 = vmatprep.mubr.bf16.mxu0 %v652_v1  ;;  %v831_v13 = vmul.f32 %v799_v2, %v6465_v7  ;;  %v591_v14 = vadd.f32 1.0, %v5120_v5  ;;  %v917_v42 = vmul.f32 %v6482_v20, %v6439_v47  ;;  %v883_v23 = vmul.f32 %v6474_v16, %v706_v10  ;;  %v325_v1 = vld [vmem:[%s6400_s18 + $0x48] sm:$0xff] }
  0xac   : > { %v5124_v17 = vpop.eup %5123  ;;  %1414 = vmatmul.mubr.bf16.vlgmr.msra.gmra.mrb[0].mxu0 %v476_v40  ;;  %v1040_v19 = vadd.f32 1.0, %v5122_v12  ;;  %v622_v3 = vmul.f32 %v590_v9, %v6463_v4  ;;  %v884_v24 = vmul.f32 %v6482_v20, %v707_v11  ;;  %v6546_v27 = vmul.f32 0.5, %v706_v10 }
  0xad   : > { %v1041_v25 = vadd.f32 1.0, %v5124_v17  ;;  %v862_v26 = vpack.c.bf16 %v831_v13, %v830_v6  ;;  %v623_v7 = vmul.f32 %v591_v14, %v6467_v8  ;;  %v948_v32 = vsub.f32 %v883_v23, %v916_v15 }
  0xae   : > { %v5126_v28 = vpop.eup %5125  ;;  %v1072_v30 = vmul.f32 %v1040_v19, %v6479_v18  ;;  %v949_v33 = vsub.f32 %v884_v24, %v917_v42  ;;  %v6549_v37 = vmul.f32 0.5, %v707_v11  ;;  %5137 = vtanh.f32 %v6546_v27  ;;  %v326_v42 = vld [vmem:[%s6400_s18 + $0x50] sm:$0xff] }
  0xaf   : > { %v5128_v38 = vpop.eup %5127  ;;  %v1073_v4 = vmul.f32 %v1041_v25, %v6484_v21  ;;  %v653_v40 = vpack.c.bf16 %v623_v7, %v622_v3  ;;  %v800_v16 = vadd.f32 1.0, %v5126_v28  ;;  %v6553_v41 = vmul.f32 0.5, %v948_v32 }
  0xb0   : > { %v5130_v20 = vpop.eup %5129  ;;  %v801_v39 = vadd.f32 1.0, %v5128_v38  ;;  %v6555_v8 = vmul.f32 0.5, %v949_v33  ;;  %5139 = vtanh.f32 %v6549_v37  ;;  %v449_v51 = vmul.f32 %v417_v60, %v6434_v43  ;;  %v327_v33 = vld [vmem:[%s6400_s18 + $0x58] sm:$0xff]  ;;  %v6610_v38 = vld [vmem:[%s6400_s18 + $0x60] sm:$0xff] }
  0xb1   : > { %v5132_v18 = vpop.eup %5131  ;;  %v1104_v44 = vpack.c.bf16 %v1073_v4, %v1072_v30  ;;  %1421 = vmatprep.mubr.bf16.mxu0 %v653_v40  ;;  %v592_v45 = vadd.f32 1.0, %v5130_v20  ;;  %5141 = vtanh.f32 %v6442_v48  ;;  %v832_v57 = vmul.f32 %v800_v16, %v6499_v31  ;;  %v324_v48 = vld [vmem:[%s6400_s18 + $0x40] sm:$0xff] }
  0xb2   : > { %v5134_v21 = vpop.eup %5133  ;;  %v593_v58 = vadd.f32 1.0, %v5132_v18  ;;  %5143 = vtanh.f32 %v6553_v41  ;;  %v6563_v61 = vmul.f32 0.5, %v6513_v49  ;;  %v675_v43 = vmul.f32 %v6513_v49, %v6513_v49 }
  0xb3   : > { %v5136_v62 = vpop.eup %5135  ;;  %1574 = vmatprep.mubr.bf16.mxu1 %v1104_v44  ;;  %v1042_v50 = vadd.f32 1.0, %v5134_v21  ;;  %v624_v63 = vmul.f32 %v592_v45, %v6504_v35  ;;  %5145 = vtanh.f32 %v6555_v8  ;;  %v833_v60 = vmul.f32 %v801_v39, %v6501_v34 }
  0xb4   : > { %1575 = vmatmul.mubr.bf16.vlgmr.msra.gmra.mrb[0].mxu1 %v862_v26  ;;  %1422 = vmatmul.mubr.bf16.gmra.mrb[4].mxu0 %v477_v53  ;;  %v1043_v31 = vadd.f32 1.0, %v5136_v62  ;;  %v625_v0 = vmul.f32 %v593_v58, %v6507_v36  ;;  %5147 = vtanh.f32 %v6563_v61  ;;  %v708_v2 = vsub.f32 %v675_v43, %v6437_v46 }
  0xb5   : > { %v1074_v35 = vmul.f32 %v1042_v50, %v6518_v55  ;;  %5149 = vtanh.f32 %v6447_v52  ;;  %v918_v5 = vmul.f32 %v6513_v49, %v6439_v47  ;;  %v6584_v34 = vmul.f32 0.5, %v324_v48 }
  0xb6   : > { %v1075_v22 = vmul.f32 %v1043_v31, %v6522_v59  ;;  %v654_v29 = vpack.c.bf16 %v625_v0, %v624_v63  ;;  %5151 = vtanh.f32 %v6453_v56  ;;  %v885_v36 = vmul.f32 %v6513_v49, %v708_v2 }
  0xb7   : > { %v6587_v53 = vmul.f32 0.5, %v708_v2  ;;  %5153 = vtanh.f32 %v324_v48  ;;  %v6589_v55 = vmul.f32 0.5, %v325_v1  ;;  %v863_v9 = vpack.c.bf16 %v833_v60, %v832_v57  ;;  %v6633_v60 = vld [vmem:[%s6400_s18 + $0x68] sm:$0xff] }
  0xb8   : > { %v1105_v6 = vpack.c.bf16 %v1075_v22, %v1074_v35  ;;  %1429 = vmatprep.mubr.bf16.mxu0 %v654_v29  ;;  %v478_v10 = vpack.c.bf16 %v449_v51, %v6532_v54  ;;  %5155 = vtanh.f32 %v325_v1  ;;  %v5138_v59 = vpop.eup %5137  ;;  %v950_v11 = vsub.f32 %v885_v36, %v918_v5 }
  0xb9   : > { %5157 = vtanh.f32 %v6587_v53  ;;  %v802_v13 = vadd.f32 1.0, %v5138_v59  ;;  %v6600_v3 = vmul.f32 0.5, %v326_v42  ;;  %v6638_v2 = vmul.f32 0.5, %v6633_v60 }
  0xba   : > { %v5140_v12 = vpop.eup %5139  ;;  %1582 = vmatprep.mubr.bf16.mxu1 %v1105_v6  ;;  %5159 = vtanh.f32 %v6584_v34  ;;  %v6594_v15 = vmul.f32 0.5, %v950_v11 }
  0xbb   : > { %v5142_v49 = vpop.eup %5141  ;;  %v803_v14 = vadd.f32 1.0, %v5140_v12  ;;  %5161 = vtanh.f32 %v6589_v55  ;;  %v834_v25 = vmul.f32 %v802_v13, %v6546_v27  ;;  %v6613_v27 = vmul.f32 0.5, %v327_v33 }
  0xbc   : > { %v5144_v17 = vpop.eup %5143  ;;  %1583 = vmatmul.mubr.bf16.gmra.mrb[4].mxu1 %v863_v9  ;;  %1430 = vmatmul.mubr.bf16.gmra.mrb[8].mxu0 %v478_v10  ;;  %v6598_v54 = vmul.f32 0.5, %v5142_v49  ;;  %v676_v19 = vmul.f32 %v5142_v49, %v5142_v49  ;;  %5163 = vtanh.f32 %v6594_v15  ;;  %v919_v32 = vmul.f32 %v5142_v49, %v6439_v47 }
  0xbd   : > { %v5146_v23 = vpop.eup %5145  ;;  %v1044_v24 = vadd.f32 1.0, %v5144_v17  ;;  %v835_v26 = vmul.f32 %v803_v14, %v6549_v37  ;;  %v6616_v37 = vmul.f32 0.5, %v6610_v38 }
  0xbe   : > { %v5148_v7 = vpop.eup %5147  ;;  %v1045_v28 = vadd.f32 1.0, %v5146_v23  ;;  %5165 = vtanh.f32 %v6598_v54  ;;  %v709_v30 = vsub.f32 %v676_v19, %v6437_v46 }
  0xbf   : > { %v5150_v4 = vpop.eup %5149  ;;  %v1076_v40 = vmul.f32 %v1044_v24, %v6553_v41  ;;  %5167 = vtanh.f32 %v326_v42  ;;  %v864_v51 = vpack.c.bf16 %v835_v26, %v834_v25  ;;  %v594_v21 = vadd.f32 1.0, %v5148_v7 }
  0xc0   : > { %v5152_v16 = vpop.eup %5151  ;;  %v1077_v20 = vmul.f32 %v1045_v28, %v6555_v8  ;;  %v418_v39 = vadd.f32 1.0, %v5150_v4  ;;  %v886_v18 = vmul.f32 %v5142_v49, %v709_v30  ;;  %v6619_v44 = vmul.f32 0.5, %v709_v30 }
  0xc1   : > { %v5154_v45 = vpop.eup %5153  ;;  %v419_v57 = vadd.f32 1.0, %v5152_v16  ;;  %5169 = vtanh.f32 %v327_v33  ;;  %v626_v36 = vmul.f32 %v594_v21, %v6563_v61 }
  0xc2   : > { %v5156_v41 = vpop.eup %5155  ;;  %v1106_v58 = vpack.c.bf16 %v1077_v20, %v1076_v40  ;;  %v6622_v62 = vmul.f32 %v418_v39, %v6447_v52  ;;  %v951_v50 = vsub.f32 %v886_v18, %v919_v32  ;;  %5171 = vtanh.f32 %v6619_v44 }
  0xc3   : > { %v5158_v63 = vpop.eup %5157  ;;  %v6626_v8 = vmul.f32 %v419_v57, %v6453_v56  ;;  %v6628_v43 = vmul.f32 0.5, %v5154_v45  ;;  %v6630_v48 = vmul.f32 0.5, %v5156_v41  ;;  %v677_v31 = vmul.f32 %v5154_v45, %v5154_v45 }
  0xc4   : > { %v5160_v0 = vpop.eup %5159  ;;  %1590 = vmatprep.mubr.bf16.mxu1 %v1106_v58  ;;  %v6635_v1 = vmul.f32 0.5, %v951_v50  ;;  %v804_v52 = vadd.f32 1.0, %v5158_v63  ;;  %v678_v35 = vmul.f32 %v5156_v41, %v5156_v41  ;;  %v920_v29 = vmul.f32 %v5154_v45, %v6439_v47 }
  0xc5   : > { %v5162_v5 = vpop.eup %5161  ;;  %1591 = vmatmul.mubr.bf16.gmra.mrb[8].mxu1 %v864_v51  ;;  %5173 = vtanh.f32 %v6628_v43  ;;  %v420_v56 = vadd.f32 1.0, %v5160_v0  ;;  %v710_v22 = vsub.f32 %v677_v31, %v6437_v46  ;;  %v479_v59 = vpack.c.bf16 %v6626_v8, %v6622_v62 }
  0xc6   : > { %5175 = vtanh.f32 %v6635_v1  ;;  %v421_v6 = vadd.f32 1.0, %v5162_v5  ;;  %v711_v9 = vsub.f32 %v678_v35, %v6437_v46  ;;  %v5164_v10 = vpop.eup %5163  ;;  %v921_v12 = vmul.f32 %v5156_v41, %v6439_v47 }
  0xc7   : > { %5177 = vtanh.f32 %v6630_v48  ;;  %v887_v11 = vmul.f32 %v5154_v45, %v710_v22  ;;  %v6651_v49 = vmul.f32 %v804_v52, %v6587_v53  ;;  %v6654_v61 = vmul.f32 %v420_v56, %v6584_v34 }
  0xc8   : > { %v5166_v13 = vpop.eup %5165  ;;  %v888_v14 = vmul.f32 %v5156_v41, %v711_v9  ;;  %v6656_v42 = vmul.f32 0.5, %v710_v22  ;;  %v6658_v24 = vmul.f32 0.5, %v711_v9  ;;  %5179 = vtanh.f32 %v6600_v3 }
  0xc9   : > { %v5168_v17 = vpop.eup %5167  ;;  %v595_v19 = vadd.f32 1.0, %v5166_v13  ;;  %v952_v23 = vsub.f32 %v887_v11, %v920_v29  ;;  %v1046_v25 = vadd.f32 1.0, %v5164_v10  ;;  %v6662_v26 = vmul.f32 %v421_v6, %v6589_v55 }
  0xca   : > { %v953_v7 = vsub.f32 %v888_v14, %v921_v12  ;;  %5181 = vtanh.f32 %v6656_v42  ;;  %v6669_v30 = vmul.f32 0.5, %v5168_v17  ;;  %v679_v55 = vmul.f32 %v5168_v17, %v5168_v17 }
  0xcb   : > { %v5170_v53 = vpop.eup %5169  ;;  %v627_v34 = vmul.f32 %v595_v19, %v6598_v54  ;;  %v6666_v28 = vmul.f32 0.5, %v952_v23  ;;  %5183 = vtanh.f32 %v6658_v24  ;;  %v1078_v54 = vmul.f32 %v1046_v25, %v6594_v15  ;;  %v331_v25 = vld [vmem:[%s6400_s18 + $0x78] sm:$0xff] }
  0xcc   : > { %v5172_v32 = vpop.eup %5171  ;;  %v6671_v33 = vmul.f32 0.5, %v953_v7  ;;  %v6673_v4 = vmul.f32 0.5, %v5170_v53  ;;  %5185 = vtanh.f32 %v6613_v27  ;;  %v680_v20 = vmul.f32 %v5170_v53, %v5170_v53 }
  0xcd   : > { %v655_v40 = vpack.c.bf16 %v627_v34, %v626_v36  ;;  %v805_v16 = vadd.f32 1.0, %v5172_v32  ;;  %5187 = vtanh.f32 %v6666_v28  ;;  %v712_v39 = vsub.f32 %v679_v55, %v6437_v46 }
  0xce   : > { %5189 = vtanh.f32 %v6671_v33  ;;  %v922_v18 = vmul.f32 %v5168_v17, %v6439_v47  ;;  %v713_v21 = vsub.f32 %v680_v20, %v6437_v46  ;;  %v923_v57 = vmul.f32 %v5170_v53, %v6439_v47  ;;  %v6721_v20 = vld [vmem:[%s6400_s18 + $0x80] sm:$0xff] }
  0xcf   : > { %v5174_v45 = vpop.eup %5173  ;;  %1437 = vmatprep.mubr.bf16.mxu0 %v655_v40  ;;  %v837_v51 = vmul.f32 %v805_v16, %v6619_v44  ;;  %5191 = vtanh.f32 %v6669_v30  ;;  %v889_v15 = vmul.f32 %v5168_v17, %v712_v39  ;;  %v6686_v62 = vmul.f32 0.5, %v712_v39 }
  0xd0   : > { %v5176_v41 = vpop.eup %5175  ;;  %1438 = vmatmul.mubr.bf16.gmra.mrb[12].mxu0 %v479_v59  ;;  %v596_v58 = vadd.f32 1.0, %v5174_v45  ;;  %5193 = vtanh.f32 %v6673_v4  ;;  %v480_v8 = vpack.c.bf16 %v6662_v26, %v6654_v61  ;;  %v890_v44 = vmul.f32 %v5170_v53, %v713_v21  ;;  %v330_v61 = vld [vmem:[%s6400_s18 + $0x70] sm:$0xff] }
  0xd1   : > { %v5178_v50 = vpop.eup %5177  ;;  %v1047_v63 = vadd.f32 1.0, %v5176_v41  ;;  %v6690_v31 = vmul.f32 0.5, %v713_v21  ;;  %v954_v35 = vsub.f32 %v889_v15, %v922_v18  ;;  %5195 = vtanh.f32 %v6686_v62 }
  0xd2   : > { %v597_v0 = vadd.f32 1.0, %v5178_v50  ;;  %v628_v52 = vmul.f32 %v596_v58, %v6628_v43  ;;  %v5180_v5 = vpop.eup %5179  ;;  %v865_v22 = vpack.c.bf16 %v837_v51, %v6651_v49  ;;  %v955_v29 = vsub.f32 %v890_v44, %v923_v57 }
  0xd3   : > { %v1079_v56 = vmul.f32 %v1047_v63, %v6635_v1  ;;  %5197 = vtanh.f32 %v6690_v31  ;;  %v422_v9 = vadd.f32 1.0, %v5180_v5  ;;  %v6698_v10 = vmul.f32 0.5, %v954_v35 }
  0xd4   : > { %v5182_v36 = vpop.eup %5181  ;;  %v629_v6 = vmul.f32 %v597_v0, %v6630_v48  ;;  %5199 = vtanh.f32 %v6610_v38  ;;  %v6701_v12 = vmul.f32 0.5, %v955_v29  ;;  %v6707_v38 = vmul.f32 0.5, %v330_v61 }
  0xd5   : > { %v5184_v43 = vpop.eup %5183  ;;  %v1107_v59 = vpack.c.bf16 %v1079_v56, %v1078_v54  ;;  %v806_v11 = vadd.f32 1.0, %v5182_v36  ;;  %5201 = vtanh.f32 %v6633_v60  ;;  %v454_v53 = vmul.f32 %v422_v9, %v6600_v3 }
  0xd6   : > { %v5186_v1 = vpop.eup %5185  ;;  %v656_v13 = vpack.c.bf16 %v629_v6, %v628_v52  ;;  %v807_v49 = vadd.f32 1.0, %v5184_v43  ;;  %5203 = vtanh.f32 %v6698_v10  ;;  %v6715_v34 = vmul.f32 0.5, %v331_v25 }
  0xd7   : > { %v5188_v48 = vpop.eup %5187  ;;  %1598 = vmatprep.mubr.bf16.mxu1 %v1107_v59  ;;  %v423_v14 = vadd.f32 1.0, %v5186_v1  ;;  %5205 = vtanh.f32 %v6701_v12  ;;  %v838_v60 = vmul.f32 %v806_v11, %v6656_v42 }
  0xd8   : > { %v5190_v17 = vpop.eup %5189  ;;  %1599 = vmatmul.mubr.bf16.gmra.mrb[12].mxu1 %v865_v22  ;;  %1445 = vmatprep.mubr.bf16.mxu0 %v656_v13  ;;  %v1048_v19 = vadd.f32 1.0, %v5188_v48  ;;  %v839_v23 = vmul.f32 %v807_v49, %v6658_v24  ;;  %5207 = vtanh.f32 %v6616_v37 }
  0xd9   : > { %v5192_v26 = vpop.eup %5191  ;;  %1446 = vmatmul.mubr.bf16.gmra.mrb[16].mxu0 %v480_v8  ;;  %v1049_v7 = vadd.f32 1.0, %v5190_v17  ;;  %5209 = vtanh.f32 %v6638_v2  ;;  %v455_v42 = vmul.f32 %v423_v14, %v6613_v27 }
  0xda   : > { %v5194_v32 = vpop.eup %5193  ;;  %v1080_v55 = vmul.f32 %v1048_v19, %v6666_v28  ;;  %v598_v40 = vadd.f32 1.0, %v5192_v26  ;;  %5211 = vtanh.f32 %v330_v61  ;;  %v866_v39 = vpack.c.bf16 %v839_v23, %v838_v60 }
  0xdb   : > { %v1081_v24 = vmul.f32 %v1049_v7, %v6671_v33  ;;  %v599_v16 = vadd.f32 1.0, %v5194_v32  ;;  %5213 = vtanh.f32 %v331_v25  ;;  %v5196_v54 = vpop.eup %5195  ;;  %v481_v21 = vpack.c.bf16 %v455_v42, %v454_v53  ;;  %v333_v7 = vld [vmem:[%s6400_s18 + $0x88] sm:$0xff] }
  0xdc   : > { %v630_v3 = vmul.f32 %v598_v40, %v6669_v30  ;;  %5215 = vtanh.f32 %v6707_v38  ;;  %v808_v51 = vadd.f32 1.0, %v5196_v54  ;;  %v6767_v40 = vmul.f32 0.5, %v333_v7 }
  0xdd   : > { %v5198_v18 = vpop.eup %5197  ;;  %v1108_v45 = vpack.c.bf16 %v1081_v24, %v1080_v55  ;;  %v631_v28 = vmul.f32 %v599_v16, %v6673_v4  ;;  %5217 = vtanh.f32 %v6715_v34 }
  0xde   : > { %v5200_v27 = vpop.eup %5199  ;;  %v809_v33 = vadd.f32 1.0, %v5198_v18  ;;  %5219 = vtanh.f32 %v6721_v20  ;;  %v840_v58 = vmul.f32 %v808_v51, %v6686_v62 }
  0xdf   : > { %v5202_v57 = vpop.eup %5201  ;;  %1606 = vmatprep.mubr.bf16.mxu1 %v1108_v45  ;;  %v657_v41 = vpack.c.bf16 %v631_v28, %v630_v3  ;;  %v6729_v30 = vmul.f32 0.5, %v5200_v27  ;;  %v681_v15 = vmul.f32 %v5200_v27, %v5200_v27  ;;  %v924_v44 = vmul.f32 %v5200_v27, %v6439_v47 }
  0xe0   : > { %v5204_v50 = vpop.eup %5203  ;;  %1607 = vmatmul.mubr.bf16.gmra.mrb[16].mxu1 %v866_v39  ;;  %v841_v4 = vmul.f32 %v809_v33, %v6690_v31  ;;  %v6732_v63 = vmul.f32 0.5, %v5202_v57  ;;  %v682_v8 = vmul.f32 %v5202_v57, %v5202_v57  ;;  %v925_v62 = vmul.f32 %v5202_v57, %v6439_v47 }
  0xe1   : > { %v5206_v0 = vpop.eup %5205  ;;  %1453 = vmatprep.mubr.bf16.mxu0 %v657_v41  ;;  %v1050_v52 = vadd.f32 1.0, %v5204_v50  ;;  %5221 = vtanh.f32 %v6729_v30  ;;  %v714_v35 = vsub.f32 %v681_v15, %v6437_v46 }
  0xe2   : > { %v5208_v5 = vpop.eup %5207  ;;  %1454 = vmatmul.mubr.bf16.gmra.mrb[20].mxu0 %v481_v21  ;;  %v1051_v56 = vadd.f32 1.0, %v5206_v0  ;;  %v867_v22 = vpack.c.bf16 %v841_v4, %v840_v58  ;;  %5223 = vtanh.f32 %v6732_v63  ;;  %v715_v31 = vsub.f32 %v682_v8, %v6437_v46 }
  0xe3   : > { %v5210_v29 = vpop.eup %5209  ;;  %v1082_v36 = vmul.f32 %v1050_v52, %v6698_v10  ;;  %v424_v6 = vadd.f32 1.0, %v5208_v5  ;;  %v891_v9 = vmul.f32 %v5200_v27, %v714_v35  ;;  %v6741_v43 = vmul.f32 0.5, %v714_v35 }
  0xe4   : > { %v5212_v59 = vpop.eup %5211  ;;  %v1083_v11 = vmul.f32 %v1051_v56, %v6701_v12  ;;  %v425_v1 = vadd.f32 1.0, %v5210_v29  ;;  %v892_v13 = vmul.f32 %v5202_v57, %v715_v31  ;;  %v6744_v49 = vmul.f32 0.5, %v715_v31 }
  0xe5   : > { %v5214_v61 = vpop.eup %5213  ;;  %v6747_v48 = vmul.f32 %v424_v6, %v6616_v37  ;;  %v956_v14 = vsub.f32 %v891_v9, %v924_v44  ;;  %5225 = vtanh.f32 %v6741_v43  ;;  %v6750_v10 = vmul.f32 0.5, %v5212_v59 }
  0xe6   : > { %v5216_v17 = vpop.eup %5215  ;;  %v1109_v19 = vpack.c.bf16 %v1083_v11, %v1082_v36  ;;  %v6753_v60 = vmul.f32 %v425_v1, %v6638_v2  ;;  %v957_v12 = vsub.f32 %v892_v13, %v925_v62  ;;  %5227 = vtanh.f32 %v6744_v49 }
  0xe7   : > { %v5218_v23 = vpop.eup %5217  ;;  %v6756_v25 = vmul.f32 0.5, %v956_v14  ;;  %v6758_v26 = vmul.f32 0.5, %v5214_v61  ;;  %5229 = vtanh.f32 %v6750_v10  ;;  %v426_v37 = vadd.f32 1.0, %v5216_v17  ;;  %v335_v14 = vld [vmem:[%s6400_s18 + $0x98] sm:$0xff] }
  0xe8   : > { %v5220_v53 = vpop.eup %5219  ;;  %1614 = vmatprep.mubr.bf16.mxu1 %v1109_v19  ;;  %v6762_v32 = vmul.f32 0.5, %v957_v12  ;;  %v683_v55 = vmul.f32 %v5212_v59, %v5212_v59  ;;  %v6765_v2 = vmul.f32 0.5, %v6721_v20  ;;  %v482_v42 = vpack.c.bf16 %v6753_v60, %v6747_v48 }
  0xe9   : > { %1615 = vmatmul.mubr.bf16.gmra.mrb[20].mxu1 %v867_v22  ;;  %5231 = vtanh.f32 %v6756_v25  ;;  %v427_v24 = vadd.f32 1.0, %v5218_v23  ;;  %v684_v16 = vmul.f32 %v5214_v61, %v5214_v61  ;;  %v6774_v54 = vmul.f32 %v426_v37, %v6707_v38 }
  0xea   : > { %5233 = vtanh.f32 %v6762_v32  ;;  %v716_v39 = vsub.f32 %v683_v55, %v6437_v46  ;;  %v926_v20 = vmul.f32 %v5212_v59, %v6439_v47  ;;  %v927_v45 = vmul.f32 %v5214_v61, %v6439_v47 }
  0xeb   : > { %v5222_v3 = vpop.eup %5221  ;;  %5235 = vtanh.f32 %v6758_v26  ;;  %v717_v18 = vsub.f32 %v684_v16, %v6437_v46  ;;  %v685_v28 = vmul.f32 %v5220_v53, %v5220_v53  ;;  %v6783_v57 = vmul.f32 0.5, %v5220_v53 }
  0xec   : > { %v5224_v51 = vpop.eup %5223  ;;  %v600_v27 = vadd.f32 1.0, %v5222_v3  ;;  %v893_v21 = vmul.f32 %v5212_v59, %v716_v39  ;;  %v6781_v33 = vmul.f32 0.5, %v716_v39  ;;  %5237 = vtanh.f32 %v333_v7 }
  0xed   : > { %v601_v38 = vadd.f32 1.0, %v5224_v51  ;;  %v894_v41 = vmul.f32 %v5214_v61, %v717_v18  ;;  %v6785_v58 = vmul.f32 0.5, %v717_v18  ;;  %v718_v4 = vsub.f32 %v685_v28, %v6437_v46 }
  0xee   : > { %v632_v15 = vmul.f32 %v600_v27, %v6729_v30  ;;  %v958_v50 = vsub.f32 %v893_v21, %v926_v20  ;;  %5239 = vtanh.f32 %v6781_v33  ;;  %v928_v52 = vmul.f32 %v5220_v53, %v6439_v47 }
  0xef   : > { %v5226_v8 = vpop.eup %5225  ;;  %v633_v44 = vmul.f32 %v601_v38, %v6732_v63  ;;  %v959_v0 = vsub.f32 %v894_v41, %v927_v45  ;;  %5241 = vtanh.f32 %v6785_v58  ;;  %v895_v30 = vmul.f32 %v5220_v53, %v718_v4 }
  0xf0   : > { %v5228_v35 = vpop.eup %5227  ;;  %v810_v62 = vadd.f32 1.0, %v5226_v8  ;;  %v6793_v5 = vmul.f32 0.5, %v958_v50  ;;  %5243 = vtanh.f32 %v6783_v57  ;;  %v459_v36 = vmul.f32 %v427_v24, %v6715_v34  ;;  %v334_v34 = vld [vmem:[%s6400_s18 + $0x90] sm:$0xff] }
  0xf1   : > { %v5230_v56 = vpop.eup %5229  ;;  %v658_v22 = vpack.c.bf16 %v633_v44, %v632_v15  ;;  %v811_v31 = vadd.f32 1.0, %v5228_v35  ;;  %v6796_v29 = vmul.f32 0.5, %v959_v0  ;;  %5245 = vtanh.f32 %v6765_v2 }
  0xf2   : > { %v602_v63 = vadd.f32 1.0, %v5230_v56  ;;  %5247 = vtanh.f32 %v6793_v5  ;;  %v960_v6 = vsub.f32 %v895_v30, %v928_v52  ;;  %v842_v59 = vmul.f32 %v810_v62, %v6741_v43  ;;  %v337_v52 = vld [vmem:[%s6400_s18 + $0xa8] sm:$0xff] }
  0xf3   : > { %v5232_v9 = vpop.eup %5231  ;;  %1461 = vmatprep.mubr.bf16.mxu0 %v658_v22  ;;  %v843_v11 = vmul.f32 %v811_v31, %v6744_v49  ;;  %5249 = vtanh.f32 %v6796_v29  ;;  %v6804_v1 = vmul.f32 0.5, %v718_v4  ;;  %v6811_v60 = vmul.f32 0.5, %v334_v34  ;;  %v336_v4 = vld [vmem:[%s6400_s18 + $0xa0] sm:$0xff] }
  0xf4   : > { %v5234_v13 = vpop.eup %5233  ;;  %1462 = vmatmul.mubr.bf16.gmra.mrb[24].mxu0 %v482_v42  ;;  %v1052_v61 = vadd.f32 1.0, %v5232_v9  ;;  %5251 = vtanh.f32 %v6767_v40  ;;  %v6807_v48 = vmul.f32 0.5, %v960_v6  ;;  %v6813_v43 = vmul.f32 0.5, %v335_v14 }
  0xf5   : > { %v5236_v17 = vpop.eup %5235  ;;  %v1053_v19 = vadd.f32 1.0, %v5234_v13  ;;  %v634_v23 = vmul.f32 %v602_v63, %v6750_v10  ;;  %5253 = vtanh.f32 %v6804_v1  ;;  %v868_v53 = vpack.c.bf16 %v843_v11, %v842_v59 }
  0xf6   : > { %v1084_v49 = vmul.f32 %v1052_v61, %v6756_v25  ;;  %v603_v12 = vadd.f32 1.0, %v5236_v17  ;;  %v5238_v37 = vpop.eup %5237  ;;  %v483_v55 = vpack.c.bf16 %v459_v36, %v6774_v54  ;;  %5255 = vtanh.f32 %v334_v34 }
  0xf7   : > { %v1085_v7 = vmul.f32 %v1053_v19, %v6762_v32  ;;  %v6821_v16 = vmul.f32 0.5, %v5238_v37  ;;  %v686_v39 = vmul.f32 %v5238_v37, %v5238_v37  ;;  %5257 = vtanh.f32 %v6807_v48 }
  0xf8   : > { %v5240_v42 = vpop.eup %5239  ;;  %v635_v24 = vmul.f32 %v603_v12, %v6758_v26  ;;  %v929_v3 = vmul.f32 %v5238_v37, %v6439_v47  ;;  %5259 = vtanh.f32 %v335_v14  ;;  %v6846_v13 = vmul.f32 0.5, %v336_v4 }
  0xf9   : > { %v5242_v25 = vpop.eup %5241  ;;  %v1110_v20 = vpack.c.bf16 %v1085_v7, %v1084_v49  ;;  %v812_v10 = vadd.f32 1.0, %v5240_v42  ;;  %5261 = vtanh.f32 %v6821_v16  ;;  %v719_v54 = vsub.f32 %v686_v39, %v6437_v46 }
  0xfa   : > { %v5244_v18 = vpop.eup %5243  ;;  %v659_v32 = vpack.c.bf16 %v635_v24, %v634_v23  ;;  %v813_v45 = vadd.f32 1.0, %v5242_v25  ;;  %5263 = vtanh.f32 %v6811_v60  ;;  %v6848_v61 = vmul.f32 0.5, %v337_v52 }
  0xfb   : > { %v5246_v26 = vpop.eup %5245  ;;  %1622 = vmatprep.mubr.bf16.mxu1 %v1110_v20  ;;  %v844_v51 = vmul.f32 %v812_v10, %v6781_v33  ;;  %v896_v27 = vmul.f32 %v5238_v37, %v719_v54  ;;  %v6829_v21 = vmul.f32 0.5, %v719_v54  ;;  %5265 = vtanh.f32 %v6813_v43 }
  0xfc   : > { %v5248_v28 = vpop.eup %5247  ;;  %1623 = vmatmul.mubr.bf16.gmra.mrb[24].mxu1 %v868_v53  ;;  %1469 = vmatprep.mubr.bf16.mxu0 %v659_v32  ;;  %v845_v15 = vmul.f32 %v813_v45, %v6785_v58  ;;  %v428_v50 = vadd.f32 1.0, %v5246_v26  ;;  %v604_v62 = vadd.f32 1.0, %v5244_v18 }
  0xfd   : > { %v5250_v38 = vpop.eup %5249  ;;  %1470 = vmatmul.mubr.bf16.gmra.mrb[28].mxu0 %v483_v55  ;;  %v1054_v41 = vadd.f32 1.0, %v5248_v28  ;;  %v961_v0 = vsub.f32 %v896_v27, %v929_v3  ;;  %5267 = vtanh.f32 %v6829_v21 }
  0xfe   : > { %v5252_v8 = vpop.eup %5251  ;;  %v1055_v44 = vadd.f32 1.0, %v5250_v38  ;;  %5269 = vtanh.f32 %v336_v4  ;;  %v869_v31 = vpack.c.bf16 %v845_v15, %v844_v51  ;;  %v460_v63 = vmul.f32 %v428_v50, %v6765_v2 }
  0xff   : > { %v1086_v35 = vmul.f32 %v1054_v41, %v6793_v5  ;;  %v429_v33 = vadd.f32 1.0, %v5252_v8  ;;  %v5254_v30 = vpop.eup %5253  ;;  %v6838_v22 = vmul.f32 0.5, %v961_v0  ;;  %5271 = vtanh.f32 %v337_v52 }
 0x100   : > { %v1087_v56 = vmul.f32 %v1055_v44, %v6796_v29  ;;  %v5256_v58 = vpop.eup %5255  ;;  %v636_v11 = vmul.f32 %v604_v62, %v6783_v57  ;;  %v814_v2 = vadd.f32 1.0, %v5254_v30 }
 0x101   : > { %v5258_v36 = vpop.eup %5257  ;;  %v461_v9 = vmul.f32 %v429_v33, %v6767_v40  ;;  %5273 = vtanh.f32 %v6838_v22  ;;  %v6843_v5 = vmul.f32 0.5, %v5256_v58  ;;  %v687_v29 = vmul.f32 %v5256_v58, %v5256_v58 }
 0x102   : > { %v1111_v6 = vpack.c.bf16 %v1087_v56, %v1086_v35  ;;  %v5260_v59 = vpop.eup %5259  ;;  %v1056_v49 = vadd.f32 1.0, %v5258_v36  ;;  %v930_v57 = vmul.f32 %v5256_v58, %v6439_v47  ;;  %v846_v18 = vmul.f32 %v814_v2, %v6804_v1 }
 0x103   : > { %v5262_v34 = vpop.eup %5261  ;;  %v6850_v14 = vmul.f32 0.5, %v5260_v59  ;;  %5275 = vtanh.f32 %v6843_v5  ;;  %v688_v40 = vmul.f32 %v5260_v59, %v5260_v59  ;;  %v720_v12 = vsub.f32 %v687_v29, %v6437_v46 }
 0x104   : > { %1630 = vmatprep.mubr.bf16.mxu1 %v1111_v6  ;;  %v5264_v17 = vpop.eup %5263  ;;  %v605_v19 = vadd.f32 1.0, %v5262_v34  ;;  %v484_v23 = vpack.c.bf16 %v461_v9, %v460_v63  ;;  %v931_v7 = vmul.f32 %v5260_v59, %v6439_v47  ;;  %v1088_v51 = vmul.f32 %v1056_v49, %v6807_v48 }
 0x105   : > { %1631 = vmatmul.mubr.bf16.gmra.mrb[28].mxu1 %v869_v31  ;;  %5277 = vtanh.f32 %v6850_v14  ;;  %v721_v37 = vsub.f32 %v688_v40, %v6437_v46  ;;  %v5266_v53 = vpop.eup %5265  ;;  %v897_v42 = vmul.f32 %v5256_v58, %v720_v12  ;;  %v6859_v24 = vmul.f32 0.5, %v720_v12 }
 0x106   : > { %v637_v55 = vmul.f32 %v605_v19, %v6821_v16  ;;  %5279 = vtanh.f32 %v6846_v13  ;;  %v430_v39 = vadd.f32 1.0, %v5264_v17  ;;  %v431_v54 = vadd.f32 1.0, %v5266_v53 }
 0x107   : > { %v898_v25 = vmul.f32 %v5260_v59, %v721_v37  ;;  %v6862_v20 = vmul.f32 0.5, %v721_v37  ;;  %5281 = vtanh.f32 %v6848_v61  ;;  %v5268_v10 = vpop.eup %5267  ;;  %v962_v32 = vsub.f32 %v897_v42, %v930_v57 }
 0x108   : > { %v660_v3 = vpack.c.bf16 %v637_v55, %v636_v11  ;;  %5283 = vtanh.f32 %v6859_v24  ;;  %v5270_v45 = vpop.eup %5269  ;;  %v815_v16 = vadd.f32 1.0, %v5268_v10  ;;  %v462_v50 = vmul.f32 %v430_v39, %v6811_v60  ;;  %v338_v11 = vld [vmem:[%s6400_s18 + $0xb0] sm:$0xff]  ;;  %v339_v55 = vld [vmem:[%s6400_s18 + $0xb8] sm:$0xff]  ;;  %v340_v39 = vld [vmem:[%s6400_s18 + $0xc0] sm:$0xff] }
 0x109   : > { %v963_v26 = vsub.f32 %v898_v25, %v931_v7  ;;  %5285 = vtanh.f32 %v6862_v20  ;;  %v5272_v28 = vpop.eup %5271  ;;  %v6869_v27 = vmul.f32 0.5, %v962_v32  ;;  %v6871_v38 = vmul.f32 0.5, %v5270_v45 }
 0x10a   : > { %1477 = vmatprep.mubr.bf16.mxu0 %v660_v3  ;;  %v689_v41 = vmul.f32 %v5270_v45, %v5270_v45  ;;  %v847_v1 = vmul.f32 %v815_v16, %v6829_v21  ;;  %v6877_v8 = vmul.f32 0.5, %v5272_v28  ;;  %v690_v0 = vmul.f32 %v5272_v28, %v5272_v28  ;;  %v341_v16 = vld [vmem:[%s6400_s18 + $0xc8] sm:$0xff] }
 0x10b   : > { %v5274_v15 = vpop.eup %5273  ;;  %1478 = vmatmul.mubr.bf16.gmra.mrb[32].mxu0 %v484_v23  ;;  %v6875_v4 = vmul.f32 0.5, %v963_v26  ;;  %5287 = vtanh.f32 %v6869_v27  ;;  %v463_v35 = vmul.f32 %v431_v54, %v6813_v43  ;;  %v932_v62 = vmul.f32 %v5270_v45, %v6439_v47 }
 0x10c   : > { %v1057_v44 = vadd.f32 1.0, %v5274_v15  ;;  %v722_v48 = vsub.f32 %v689_v41, %v6437_v46  ;;  %v933_v60 = vmul.f32 %v5272_v28, %v6439_v47  ;;  %v723_v30 = vsub.f32 %v690_v0, %v6437_v46 }
 0x10d   : > { %v5276_v52 = vpop.eup %5275  ;;  %5289 = vtanh.f32 %v6875_v4  ;;  %v870_v58 = vpack.c.bf16 %v847_v1, %v846_v18  ;;  %v6895_v2 = vmul.f32 0.5, %v338_v11  ;;  %v485_v19 = vpack.c.bf16 %v463_v35, %v462_v50 }
 0x10e   : > { %v1089_v21 = vmul.f32 %v1057_v44, %v6838_v22  ;;  %v606_v33 = vadd.f32 1.0, %v5276_v52  ;;  %5291 = vtanh.f32 %v6871_v38  ;;  %v899_v31 = vmul.f32 %v5270_v45, %v722_v48 }
 0x10f   : > { %v5278_v56 = vpop.eup %5277  ;;  %5293 = vtanh.f32 %v6877_v8  ;;  %v6889_v43 = vmul.f32 0.5, %v722_v48  ;;  %v900_v59 = vmul.f32 %v5272_v28, %v723_v30  ;;  %v6893_v34 = vmul.f32 0.5, %v723_v30 }
 0x110   : > { %v5280_v63 = vpop.eup %5279  ;;  %v1112_v36 = vpack.c.bf16 %v1089_v21, %v1088_v51  ;;  %v607_v6 = vadd.f32 1.0, %v5278_v56  ;;  %v638_v9 = vmul.f32 %v606_v33, %v6843_v5  ;;  %v964_v29 = vsub.f32 %v899_v31, %v932_v62 }
 0x111   : > { %v5282_v22 = vpop.eup %5281  ;;  %v965_v49 = vsub.f32 %v900_v59, %v933_v60  ;;  %5295 = vtanh.f32 %v6889_v43  ;;  %v432_v57 = vadd.f32 1.0, %v5280_v63  ;;  %v6906_v42 = vmul.f32 0.5, %v339_v55  ;;  %v343_v60 = vld [vmem:[%s6400_s18 + $0xd8] sm:$0xff] }
 0x112   : > { %v5284_v40 = vpop.eup %5283  ;;  %1638 = vmatprep.mubr.bf16.mxu1 %v1112_v36  ;;  %v639_v17 = vmul.f32 %v607_v6, %v6850_v14  ;;  %v6899_v23 = vmul.f32 0.5, %v964_v29  ;;  %5297 = vtanh.f32 %v6893_v34  ;;  %v433_v14 = vadd.f32 1.0, %v5282_v22 }
 0x113   : > { %v5286_v12 = vpop.eup %5285  ;;  %1639 = vmatmul.mubr.bf16.gmra.mrb[32].mxu1 %v870_v58  ;;  %v816_v5 = vadd.f32 1.0, %v5284_v40  ;;  %v6902_v53 = vmul.f32 0.5, %v965_v49  ;;  %5299 = vtanh.f32 %v338_v11  ;;  %v6910_v10 = vmul.f32 0.5, %v340_v39 }
 0x114   : > { %v661_v37 = vpack.c.bf16 %v639_v17, %v638_v9  ;;  %v817_v7 = vadd.f32 1.0, %v5286_v12  ;;  %5301 = vtanh.f32 %v6899_v23  ;;  %v464_v28 = vmul.f32 %v432_v57, %v6846_v13 }
 0x115   : > { %v5288_v25 = vpop.eup %5287  ;;  %5303 = vtanh.f32 %v6902_v53  ;;  %v848_v32 = vmul.f32 %v816_v5, %v6859_v24  ;;  %v6917_v51 = vmul.f32 0.5, %v341_v16  ;;  %v465_v50 = vmul.f32 %v433_v14, %v6848_v61 }
 0x116   : > { %1485 = vmatprep.mubr.bf16.mxu0 %v661_v37  ;;  %v1058_v18 = vadd.f32 1.0, %v5288_v25  ;;  %v849_v45 = vmul.f32 %v817_v7, %v6862_v20  ;;  %5305 = vtanh.f32 %v339_v55 }
 0x117   : > { %v5290_v3 = vpop.eup %5289  ;;  %1486 = vmatmul.mubr.bf16.gmra.mrb[36].mxu0 %v485_v19  ;;  %5307 = vtanh.f32 %v6895_v2  ;;  %v486_v61 = vpack.c.bf16 %v465_v50, %v464_v28  ;;  %v6964_v28 = vmul.f32 0.5, %v343_v60 }
 0x118   : > { %v5292_v54 = vpop.eup %5291  ;;  %v1059_v26 = vadd.f32 1.0, %v5290_v3  ;;  %v1090_v15 = vmul.f32 %v1058_v18, %v6869_v27  ;;  %5309 = vtanh.f32 %v6906_v42  ;;  %v871_v44 = vpack.c.bf16 %v849_v45, %v848_v32  ;;  %v342_v27 = vld [vmem:[%s6400_s18 + $0xd0] sm:$0xff] }
 0x119   : > { %v5294_v41 = vpop.eup %5293  ;;  %v608_v1 = vadd.f32 1.0, %v5292_v54  ;;  %5311 = vtanh.f32 %v340_v39 }
 0x11a   : > { %v1091_v24 = vmul.f32 %v1059_v26, %v6875_v4  ;;  %v609_v20 = vadd.f32 1.0, %v5294_v41  ;;  %5313 = vtanh.f32 %v341_v16 }
 0x11b   : > { %v640_v13 = vmul.f32 %v608_v1, %v6871_v38  ;;  %v5296_v0 = vpop.eup %5295  ;;  %5315 = vtanh.f32 %v6910_v10 }
 0x11c   : > { %v1113_v48 = vpack.c.bf16 %v1091_v24, %v1090_v15  ;;  %v641_v52 = vmul.f32 %v609_v20, %v6877_v8  ;;  %v5298_v35 = vpop.eup %5297  ;;  %v818_v62 = vadd.f32 1.0, %v5296_v0  ;;  %5317 = vtanh.f32 %v6917_v51 }
 0x11d   : > { %v5300_v4 = vpop.eup %5299  ;;  %v819_v33 = vadd.f32 1.0, %v5298_v35  ;;  %5319 = vtanh.f32 %v342_v27 }
 0x11e   : > { %1646 = vmatprep.mubr.bf16.mxu1 %v1113_v48  ;;  %v662_v21 = vpack.c.bf16 %v641_v52, %v640_v13  ;;  %v5302_v30 = vpop.eup %5301  ;;  %v850_v38 = vmul.f32 %v818_v62, %v6889_v43  ;;  %v6930_v56 = vmul.f32 0.5, %v5300_v4  ;;  %v691_v8 = vmul.f32 %v5300_v4, %v5300_v4 }
 0x11f   : > { %1647 = vmatmul.mubr.bf16.gmra.mrb[36].mxu1 %v871_v44  ;;  %v5304_v58 = vpop.eup %5303  ;;  %v1060_v31 = vadd.f32 1.0, %v5302_v30  ;;  %v851_v63 = vmul.f32 %v819_v33, %v6893_v34  ;;  %5321 = vtanh.f32 %v343_v60  ;;  %v934_v59 = vmul.f32 %v5300_v4, %v6439_v47 }
 0x120   : > { %1493 = vmatprep.mubr.bf16.mxu0 %v662_v21  ;;  %v5306_v36 = vpop.eup %5305  ;;  %v1061_v6 = vadd.f32 1.0, %v5304_v58  ;;  %5323 = vtanh.f32 %v6930_v56  ;;  %v724_v9 = vsub.f32 %v691_v8, %v6437_v46 }
 0x121   : > { %1494 = vmatmul.mubr.bf16.gmra.mrb[40].mxu0 %v486_v61  ;;  %v5308_v43 = vpop.eup %5307  ;;  %v1092_v11 = vmul.f32 %v1060_v31, %v6899_v23  ;;  %v872_v22 = vpack.c.bf16 %v851_v63, %v850_v38  ;;  %v6937_v29 = vmul.f32 0.5, %v5306_v36  ;;  %v692_v40 = vmul.f32 %v5306_v36, %v5306_v36 }
 0x122   : > { %v5310_v17 = vpop.eup %5309  ;;  %v1093_v34 = vmul.f32 %v1061_v6, %v6902_v53  ;;  %v434_v19 = vadd.f32 1.0, %v5308_v43  ;;  %v901_v49 = vmul.f32 %v5300_v4, %v724_v9  ;;  %v935_v12 = vmul.f32 %v5306_v36, %v6439_v47 }
 0x123   : > { %v5312_v5 = vpop.eup %5311  ;;  %5325 = vtanh.f32 %v6937_v29  ;;  %v435_v57 = vadd.f32 1.0, %v5310_v17  ;;  %v725_v37 = vsub.f32 %v692_v40, %v6437_v46  ;;  %v6943_v7 = vmul.f32 0.5, %v724_v9 }
 0x124   : > { %v5314_v23 = vpop.eup %5313  ;;  %v1114_v55 = vpack.c.bf16 %v1093_v34, %v1092_v11  ;;  %v6946_v14 = vmul.f32 %v434_v19, %v6895_v2  ;;  %v966_v39 = vsub.f32 %v901_v49, %v934_v59  ;;  %v6948_v25 = vmul.f32 0.5, %v5312_v5 }
 0x125   : > { %v5316_v53 = vpop.eup %5315  ;;  %v6951_v3 = vmul.f32 %v435_v57, %v6906_v42  ;;  %v902_v18 = vmul.f32 %v5306_v36, %v725_v37  ;;  %v6953_v32 = vmul.f32 0.5, %v725_v37  ;;  %5327 = vtanh.f32 %v6943_v7 }
 0x126   : > { %v5318_v45 = vpop.eup %5317  ;;  %1654 = vmatprep.mubr.bf16.mxu1 %v1114_v55  ;;  %v6956_v16 = vmul.f32 0.5, %v966_v39  ;;  %v6958_v54 = vmul.f32 0.5, %v5314_v23  ;;  %5329 = vtanh.f32 %v6948_v25  ;;  %v6961_v2 = vmul.f32 0.5, %v342_v27 }
 0x127   : > { %1655 = vmatmul.mubr.bf16.gmra.mrb[40].mxu1 %v872_v22  ;;  %v967_v26 = vsub.f32 %v902_v18, %v935_v12  ;;  %5331 = vtanh.f32 %v6953_v32  ;;  %v436_v42 = vadd.f32 1.0, %v5316_v53  ;;  %v5320_v41 = vpop.eup %5319  ;;  %v487_v15 = vpack.c.bf16 %v6951_v3, %v6946_v14 }
 0x128   : > { %5333 = vtanh.f32 %v6956_v16  ;;  %v693_v1 = vmul.f32 %v5312_v5, %v5312_v5  ;;  %v694_v50 = vmul.f32 %v5314_v23, %v5314_v23  ;;  %v437_v44 = vadd.f32 1.0, %v5318_v45 }
 0x129   : > { %v5322_v24 = vpop.eup %5321  ;;  %v6969_v20 = vmul.f32 0.5, %v967_v26  ;;  %5335 = vtanh.f32 %v6958_v54  ;;  %v936_v13 = vmul.f32 %v5312_v5, %v6439_v47  ;;  %v937_v27 = vmul.f32 %v5314_v23, %v6439_v47 }
 0x12a   : > { %v5324_v0 = vpop.eup %5323  ;;  %v726_v48 = vsub.f32 %v693_v1, %v6437_v46  ;;  %v727_v52 = vsub.f32 %v694_v50, %v6437_v46  ;;  %v6976_v35 = vmul.f32 0.5, %v5320_v41  ;;  %v6980_v62 = vmul.f32 %v436_v42, %v6910_v10 }
 0x12b   : > { %v610_v61 = vadd.f32 1.0, %v5324_v0  ;;  %5337 = vtanh.f32 %v6969_v20  ;;  %v6982_v60 = vmul.f32 0.5, %v5322_v24  ;;  %v695_v58 = vmul.f32 %v5320_v41, %v5320_v41 }
 0x12c   : > { %v903_v4 = vmul.f32 %v5312_v5, %v726_v48  ;;  %v904_v21 = vmul.f32 %v5314_v23, %v727_v52  ;;  %v6984_v33 = vmul.f32 0.5, %v726_v48  ;;  %v6986_v30 = vmul.f32 0.5, %v727_v52 }
 0x12d   : > { %v5326_v38 = vpop.eup %5325  ;;  %v642_v8 = vmul.f32 %v610_v61, %v6930_v56  ;;  %5339 = vtanh.f32 %v6976_v35  ;;  %v696_v31 = vmul.f32 %v5322_v24, %v5322_v24  ;;  %v728_v9 = vsub.f32 %v695_v58, %v6437_v46  ;;  %v345_v61 = vld [vmem:[%s6400_s18 + $0xe8] sm:$0xff] }
 0x12e   : > { %v611_v63 = vadd.f32 1.0, %v5326_v38  ;;  %v968_v36 = vsub.f32 %v903_v4, %v936_v13  ;;  %v969_v6 = vsub.f32 %v904_v21, %v937_v27  ;;  %5341 = vtanh.f32 %v6984_v33 }
 0x12f   : > { %v5328_v10 = vpop.eup %5327  ;;  %5343 = vtanh.f32 %v6986_v30  ;;  %v729_v59 = vsub.f32 %v696_v31, %v6437_v46  ;;  %v938_v43 = vmul.f32 %v5320_v41, %v6439_v47  ;;  %v905_v49 = vmul.f32 %v5320_v41, %v728_v9  ;;  %v346_v31 = vld [vmem:[%s6400_s18 + $0xf0] sm:$0xff] }
 0x130   : > { %v5330_v11 = vpop.eup %5329  ;;  %v643_v56 = vmul.f32 %v611_v63, %v6937_v29  ;;  %v820_v22 = vadd.f32 1.0, %v5328_v10  ;;  %v6996_v40 = vmul.f32 0.5, %v968_v36  ;;  %v6998_v17 = vmul.f32 0.5, %v969_v6 }
 0x131   : > { %v5332_v34 = vpop.eup %5331  ;;  %v612_v19 = vadd.f32 1.0, %v5330_v11  ;;  %5345 = vtanh.f32 %v6982_v60  ;;  %v906_v12 = vmul.f32 %v5322_v24, %v729_v59  ;;  %v469_v23 = vmul.f32 %v437_v44, %v6917_v51 }
 0x132   : > { %v5334_v5 = vpop.eup %5333  ;;  %v663_v57 = vpack.c.bf16 %v643_v56, %v642_v8  ;;  %v821_v37 = vadd.f32 1.0, %v5332_v34  ;;  %5347 = vtanh.f32 %v6996_v40  ;;  %v852_v14 = vmul.f32 %v820_v22, %v6943_v7 }
 0x133   : > { %v5336_v55 = vpop.eup %5335  ;;  %v1062_v29 = vadd.f32 1.0, %v5334_v5  ;;  %5349 = vtanh.f32 %v6998_v17  ;;  %v939_v39 = vmul.f32 %v5322_v24, %v6439_v47  ;;  %v644_v3 = vmul.f32 %v612_v19, %v6948_v25 }
 0x134   : > { %1501 = vmatprep.mubr.bf16.mxu0 %v663_v57  ;;  %v613_v53 = vadd.f32 1.0, %v5336_v55  ;;  %5351 = vtanh.f32 %v6961_v2  ;;  %v970_v18 = vsub.f32 %v905_v49, %v938_v43  ;;  %v853_v51 = vmul.f32 %v821_v37, %v6953_v32 }
 0x135   : > { %v5338_v45 = vpop.eup %5337  ;;  %1502 = vmatmul.mubr.bf16.gmra.mrb[44].mxu0 %v487_v15  ;;  %5353 = vtanh.f32 %v6964_v28  ;;  %v971_v26 = vsub.f32 %v906_v12, %v939_v39  ;;  %v7010_v7 = vmul.f32 0.5, %v728_v9  ;;  %v1094_v41 = vmul.f32 %v1062_v29, %v6956_v16  ;;  %v344_v16 = vld [vmem:[%s6400_s18 + $0xe0] sm:$0xff]  ;;  %v347_v9 = vld [vmem:[%s6400_s18 + $0xf8] sm:$0xff] }
 0x136   : > { %v1063_v42 = vadd.f32 1.0, %v5338_v45  ;;  %v645_v1 = vmul.f32 %v613_v53, %v6958_v54  ;;  %v7014_v50 = vmul.f32 0.5, %v970_v18  ;;  %v7018_v15 = vmul.f32 0.5, %v729_v59 }
 0x137   : > { %v5340_v25 = vpop.eup %5339  ;;  %v7016_v24 = vmul.f32 0.5, %v971_v26  ;;  %5355 = vtanh.f32 %v7010_v7  ;;  %v873_v54 = vpack.c.bf16 %v853_v51, %v852_v14  ;;  %v488_v52 = vpack.c.bf16 %v469_v23, %v6980_v62 }
 0x138   : > { %v5342_v32 = vpop.eup %5341  ;;  %v1095_v44 = vmul.f32 %v1063_v42, %v6969_v20  ;;  %v664_v13 = vpack.c.bf16 %v645_v1, %v644_v3  ;;  %v614_v0 = vadd.f32 1.0, %v5340_v25  ;;  %5357 = vtanh.f32 %v7014_v50 }
 0x139   : > { %v5344_v48 = vpop.eup %5343  ;;  %v822_v27 = vadd.f32 1.0, %v5342_v32  ;;  %5359 = vtanh.f32 %v7016_v24  ;;  %v7032_v10 = vmul.f32 0.5, %v344_v16  ;;  %v7036_v56 = vmul.f32 0.5, %v345_v61 }
 0x13a   : > { %v1115_v4 = vpack.c.bf16 %v1095_v44, %v1094_v41  ;;  %1509 = vmatprep.mubr.bf16.mxu0 %v664_v13  ;;  %v823_v21 = vadd.f32 1.0, %v5344_v48  ;;  %5361 = vtanh.f32 %v7018_v15  ;;  %v646_v58 = vmul.f32 %v614_v0, %v6976_v35 }
 0x13b   : > { %v5346_v20 = vpop.eup %5345  ;;  %5363 = vtanh.f32 %v344_v16  ;;  %v854_v36 = vmul.f32 %v822_v27, %v6984_v33  ;;  %v7042_v57 = vmul.f32 0.5, %v346_v31  ;;  %v7046_v29 = vmul.f32 0.5, %v347_v9 }
 0x13c   : > { %v5348_v38 = vpop.eup %5347  ;;  %1662 = vmatprep.mubr.bf16.mxu1 %v1115_v4  ;;  %v615_v8 = vadd.f32 1.0, %v5346_v20  ;;  %5365 = vtanh.f32 %v345_v61  ;;  %v855_v6 = vmul.f32 %v823_v21, %v6986_v30 }
 0x13d   : > { %v5350_v62 = vpop.eup %5349  ;;  %1663 = vmatmul.mubr.bf16.gmra.mrb[44].mxu1 %v873_v54  ;;  %1510 = vmatmul.mubr.bf16.gmra.mrb[48].mxu0 %v488_v52  ;;  %v1064_v63 = vadd.f32 1.0, %v5348_v38  ;;  %5367 = vtanh.f32 %v346_v31 }
 0x13e   : > { %v5352_v59 = vpop.eup %5351  ;;  %v1065_v43 = vadd.f32 1.0, %v5350_v62  ;;  %v647_v11 = vmul.f32 %v615_v8, %v6982_v60  ;;  %5369 = vtanh.f32 %v347_v9  ;;  %v874_v12 = vpack.c.bf16 %v855_v6, %v854_v36 }
 0x13f   : > { %v5354_v35 = vpop.eup %5353  ;;  %v1096_v22 = vmul.f32 %v1064_v63, %v6996_v40  ;;  %v438_v34 = vadd.f32 1.0, %v5352_v59  ;;  %5371 = vtanh.f32 %v7032_v10 }
 0x140   : > { %v1097_v19 = vmul.f32 %v1065_v43, %v6998_v17  ;;  %v665_v49 = vpack.c.bf16 %v647_v11, %v646_v58  ;;  %v439_v33 = vadd.f32 1.0, %v5354_v35  ;;  %5373 = vtanh.f32 %v7036_v56 }
 0x141   : > { %v5356_v30 = vpop.eup %5355  ;;  %v470_v5 = vmul.f32 %v438_v34, %v6961_v2  ;;  %5375 = vtanh.f32 %v7042_v57 }
 0x142   : > { %v5358_v60 = vpop.eup %5357  ;;  %v1116_v37 = vpack.c.bf16 %v1097_v19, %v1096_v22  ;;  %1517 = vmatprep.mubr.bf16.mxu0 %v665_v49  ;;  %v471_v40 = vmul.f32 %v439_v33, %v6964_v28  ;;  %v824_v23 = vadd.f32 1.0, %v5356_v30  ;;  %5377 = vtanh.f32 %v7046_v29 }
 0x143   : > { %v5360_v17 = vpop.eup %5359  ;;  %v1066_v55 = vadd.f32 1.0, %v5358_v60 }
 0x144   : > { %v5362_v14 = vpop.eup %5361  ;;  %1670 = vmatprep.mubr.bf16.mxu1 %v1116_v37  ;;  %v489_v39 = vpack.c.bf16 %v471_v40, %v470_v5  ;;  %v1067_v2 = vadd.f32 1.0, %v5360_v17  ;;  %v856_v45 = vmul.f32 %v824_v23, %v7010_v7 }
 0x145   : > { %v5364_v53 = vpop.eup %5363  ;;  %1671 = vmatmul.mubr.bf16.gmra.mrb[48].mxu1 %v874_v12  ;;  %v1098_v3 = vmul.f32 %v1066_v55, %v7014_v50  ;;  %v825_v18 = vadd.f32 1.0, %v5362_v14 }
 0x146   : > { %v5366_v51 = vpop.eup %5365  ;;  %1518 = vmatmul.mubr.bf16.gmra.mrb[52].mxu0 %v489_v39  ;;  %v1099_v28 = vmul.f32 %v1067_v2, %v7016_v24  ;;  %v552_v26 = vmul.f32 0.5, %v5364_v53  ;;  %v697_v42 = vmul.f32 %v5364_v53, %v5364_v53  ;;  %v940_v7 = vmul.f32 %v5364_v53, %v6439_v47 }
 0x147   : > { %v857_v41 = vmul.f32 %v825_v18, %v7018_v15  ;;  %v553_v1 = vmul.f32 0.5, %v5366_v51  ;;  %v698_v25 = vmul.f32 %v5366_v51, %v5366_v51  ;;  %v5368_v44 = vpop.eup %5367  ;;  %v941_v0 = vmul.f32 %v5366_v51, %v6439_v47 }
 0x148   : > { %v1117_v32 = vpack.c.bf16 %v1099_v28, %v1098_v3  ;;  %5379 = vtanh.f32 %v552_v26  ;;  %v730_v50 = vsub.f32 %v697_v42, %v6437_v46  ;;  %v5370_v16 = vpop.eup %5369  ;;  %v7060_v54 = vmul.f32 0.5, %v5368_v44 }
 0x149   : > { %v875_v13 = vpack.c.bf16 %v857_v41, %v856_v45  ;;  %5381 = vtanh.f32 %v553_v1  ;;  %v731_v24 = vsub.f32 %v698_v25, %v6437_v46  ;;  %v5372_v52 = vpop.eup %5371  ;;  %v7064_v4 = vmul.f32 0.5, %v5370_v16 }
 0x14a   : > { %1678 = vmatprep.mubr.bf16.mxu1 %v1117_v32  ;;  %v907_v15 = vmul.f32 %v5364_v53, %v730_v50  ;;  %v7058_v48 = vmul.f32 0.5, %v730_v50  ;;  %v5374_v21 = vpop.eup %5373  ;;  %v699_v38 = vmul.f32 %v5368_v44, %v5368_v44  ;;  %v440_v58 = vadd.f32 1.0, %v5372_v52 }
 0x14b   : > { %v908_v27 = vmul.f32 %v5366_v51, %v731_v24  ;;  %v7062_v61 = vmul.f32 0.5, %v731_v24  ;;  %v700_v62 = vmul.f32 %v5370_v16, %v5370_v16  ;;  %v441_v63 = vadd.f32 1.0, %v5374_v21  ;;  %v5376_v9 = vpop.eup %5375 }
 0x14c   : > { %v972_v20 = vsub.f32 %v907_v15, %v940_v7  ;;  %5383 = vtanh.f32 %v7058_v48  ;;  %v732_v6 = vsub.f32 %v699_v38, %v6437_v46  ;;  %v942_v43 = vmul.f32 %v5368_v44, %v6439_v47  ;;  %v5378_v35 = vpop.eup %5377 }
 0x14d   : > { %1679 = vmatmul.mubr.bf16.gmra.mrb[52].mxu1 %v875_v13  ;;  %v973_v8 = vsub.f32 %v908_v27, %v941_v0  ;;  %5385 = vtanh.f32 %v7062_v61  ;;  %v733_v59 = vsub.f32 %v700_v62, %v6437_v46  ;;  %v943_v11 = vmul.f32 %v5370_v16, %v6439_v47 }
 0x14e   : > { %v1004_v31 = vmul.f32 0.5, %v972_v20  ;;  %5387 = vtanh.f32 %v7060_v54  ;;  %v909_v22 = vmul.f32 %v5368_v44, %v732_v6  ;;  %v764_v34 = vmul.f32 0.5, %v732_v6 }
 0x14f   : > { %v1005_v36 = vmul.f32 0.5, %v973_v8  ;;  %5389 = vtanh.f32 %v7064_v4  ;;  %v472_v49 = vmul.f32 %v440_v58, %v7032_v10  ;;  %v910_v33 = vmul.f32 %v5370_v16, %v733_v59 }
 0x150   : > { %5391 = vtanh.f32 %v1004_v31  ;;  %v765_v30 = vmul.f32 0.5, %v733_v59  ;;  %v473_v60 = vmul.f32 %v441_v63, %v7036_v56  ;;  %v974_v37 = vsub.f32 %v909_v22, %v942_v43  ;;  %v7085_v22 = vld [vmem:[%s9061_s3] ss:$0 sm:$0xff] }
 0x151   : > { %5393 = vtanh.f32 %v1005_v36  ;;  %v975_v40 = vsub.f32 %v910_v33, %v943_v11  ;;  %v442_v14 = vadd.f32 1.0, %v5376_v9  ;;  %v443_v39 = vadd.f32 1.0, %v5378_v35 }
 0x152   : > { %v5380_v19 = vpop.eup %5379  ;;  %5395 = vtanh.f32 %v764_v34  ;;  %v1006_v47 = vmul.f32 0.5, %v974_v37  ;;  %v490_v10 = vpack.c.bf16 %v473_v60, %v472_v49 }
 0x153   : > { %v5382_v12 = vpop.eup %5381  ;;  %v616_v5 = vadd.f32 1.0, %v5380_v19  ;;  %5397 = vtanh.f32 %v765_v30  ;;  %v1007_v2 = vmul.f32 0.5, %v975_v40 }
 0x154   : > { %v617_v46 = vadd.f32 1.0, %v5382_v12  ;;  %5399 = vtanh.f32 %v1006_v47 }
 0x155   : > { %v648_v23 = vmul.f32 %v616_v5, %v552_v26  ;;  %5401 = vtanh.f32 %v1007_v2  ;;  %v474_v26 = vmul.f32 %v442_v14, %v7042_v57 }
 0x156   : > { %v5384_v17 = vpop.eup %5383  ;;  %v649_v55 = vmul.f32 %v617_v46, %v553_v1  ;;  %v475_v1 = vmul.f32 %v443_v39, %v7046_v29 }
 0x157   : > { %v5386_v53 = vpop.eup %5385  ;;  %v826_v3 = vadd.f32 1.0, %v5384_v17 }
 0x158   : > { %v5388_v18 = vpop.eup %5387  ;;  %v666_v45 = vpack.c.bf16 %v649_v55, %v648_v23  ;;  %v827_v51 = vadd.f32 1.0, %v5386_v53  ;;  %v491_v21 = vpack.c.bf16 %v475_v1, %v474_v26 }
 0x159   : > { %v5390_v56 = vpop.eup %5389  ;;  %v618_v28 = vadd.f32 1.0, %v5388_v18  ;;  %v858_v50 = vmul.f32 %v826_v3, %v7058_v48 }
 0x15a   : > { %v5392_v42 = vpop.eup %5391  ;;  %1525 = vmatprep.mubr.bf16.mxu0 %v666_v45  ;;  %v619_v41 = vadd.f32 1.0, %v5390_v56  ;;  %v859_v7 = vmul.f32 %v827_v51, %v7062_v61 }
 0x15b   : > { %v5394_v25 = vpop.eup %5393  ;;  %1526 = vmatmul.mubr.bf16.gmra.mrb[56].mxu0 %v490_v10  ;;  %v1068_v32 = vadd.f32 1.0, %v5392_v42  ;;  %v650_v44 = vmul.f32 %v618_v28, %v7060_v54 }
 0x15c   : > { %v1069_v13 = vadd.f32 1.0, %v5394_v25  ;;  %v651_v24 = vmul.f32 %v619_v41, %v7064_v4  ;;  %v5396_v0 = vpop.eup %5395  ;;  %v876_v57 = vpack.c.bf16 %v859_v7, %v858_v50 }
 0x15d   : > { %v1100_v16 = vmul.f32 %v1068_v32, %v1004_v31  ;;  %v5398_v15 = vpop.eup %5397  ;;  %v828_v29 = vadd.f32 1.0, %v5396_v0 }
 0x15e   : > { %v1101_v52 = vmul.f32 %v1069_v13, %v1005_v36  ;;  %v667_v27 = vpack.c.bf16 %v651_v24, %v650_v44  ;;  %v829_v20 = vadd.f32 1.0, %v5398_v15  ;;  %v5400_v8 = vpop.eup %5399 }
 0x15f   : > { %v5402_v48 = vpop.eup %5401  ;;  %v1070_v61 = vadd.f32 1.0, %v5400_v8  ;;  %v860_v58 = vmul.f32 %v828_v29, %v764_v34 }
 0x160   : > { %v1118_v38 = vpack.c.bf16 %v1101_v52, %v1100_v16  ;;  %1533 = vmatprep.mubr.bf16.mxu0 %v667_v27  ;;  %v1071_v54 = vadd.f32 1.0, %v5402_v48  ;;  %v861_v4 = vmul.f32 %v829_v20, %v765_v30 }
 0x161   : > { %v1102_v62 = vmul.f32 %v1070_v61, %v1006_v47 }
 0x162   : > { %1686 = vmatprep.mubr.bf16.mxu1 %v1118_v38  ;;  %v1103_v31 = vmul.f32 %v1071_v54, %v1007_v2  ;;  %v877_v36 = vpack.c.bf16 %v861_v4, %v860_v58 }
 0x163   : > { %1687 = vmatmul.mubr.bf16.gmra.mrb[56].mxu1 %v876_v57  ;;  %1534 = vmatmul.mubr.bf16.gmra.mrb[60].mxu0 %v491_v21 }
 0x164   : > { %v1119_v63 = vpack.c.bf16 %v1103_v31, %v1102_v62 }
 0x166   : > { %1694 = vmatprep.mubr.bf16.mxu1 %v1119_v63 }
 0x16b   : > { %1695 = vmatmul.mubr.bf16.gmra.mrb[60].mxu1 %v877_v36 }
 0x17f   : > { %v4504_v6 = vpop.f32.mrb[0].mxu0 }
 0x180   : > { %v4505_v9 = vpop.f32.mrb[1].mxu0 }
 0x181   : > { %v4506_v59 = vadd.f32 %v4505_v9, %v4504_v6  ;;  %v4507_v43 = vpop.f32.mrb[2].mxu0 }
 0x182   : > { %v4508_v11 = vpop.f32.mrb[3].mxu0 }
 0x183   : > { %v4509_v35 = vadd.f32 %v4508_v11, %v4507_v43  ;;  %v1416_v34 = vadd.f32 %v4506_v59, %v7085_v22 }
 0x185   : > { %v1419_v23 = vadd.f32 %v4509_v35, %v7085_v22 }
 0x187   : > { %v4616_v19 = vpop.f32.mrb[0].mxu1  ;;  %v4510_v49 = vpop.f32.mrb[4].mxu0 }
 0x188   : > { %v4617_v33 = vpop.f32.mrb[1].mxu1  ;;  %v4511_v30 = vpop.f32.mrb[5].mxu0 }
 0x189   : > { %v4618_v12 = vadd.f32 %v4617_v33, %v4616_v19  ;;  %v4619_v5 = vpop.f32.mrb[2].mxu1  ;;  %v4512_v60 = vadd.f32 %v4511_v30, %v4510_v49  ;;  %v4513_v37 = vpop.f32.mrb[6].mxu0 }
 0x18a   : > { %v4620_v46 = vpop.f32.mrb[3].mxu1  ;;  %v4514_v40 = vpop.f32.mrb[7].mxu0 }
 0x18b   : > { %v4621_v47 = vadd.f32 %v4620_v46, %v4619_v5  ;;  %v4515_v17 = vadd.f32 %v4514_v40, %v4513_v37  ;;  %v7089_v55 = vadd.f32 %v4618_v12, %v1416_v34  ;;  %v1424_v39 = vadd.f32 %v4512_v60, %v7085_v22 }
 0x18d   : > { %1706 = vadd.xlane.f32.xlu0 %v7089_v55  ;;  %v7092_v14 = vadd.f32 %v4621_v47, %v1419_v23  ;;  %v1427_v41 = vadd.f32 %v4515_v17, %v7085_v22 }
 0x18f   : > { %v4622_v2 = vpop.f32.mrb[4].mxu1  ;;  %v4516_v53 = vpop.f32.mrb[8].mxu0 }
 0x190   : > { %v4623_v10 = vpop.f32.mrb[5].mxu1  ;;  %v4517_v3 = vpop.f32.mrb[9].mxu0 }
 0x191   : > { %v4624_v18 = vadd.f32 %v4623_v10, %v4622_v2  ;;  %v4625_v45 = vpop.f32.mrb[6].mxu1  ;;  %1708 = vadd.xlane.f32.xlu0 %v7092_v14  ;;  %v4518_v51 = vadd.f32 %v4517_v3, %v4516_v53  ;;  %v4519_v56 = vpop.f32.mrb[10].mxu0 }
 0x192   : > { %v4626_v28 = vpop.f32.mrb[7].mxu1  ;;  %v4520_v42 = vpop.f32.mrb[11].mxu0 }
 0x193   : > { %v4627_v26 = vadd.f32 %v4626_v28, %v4625_v45  ;;  %v7097_v1 = vadd.f32 %v4624_v18, %v1424_v39  ;;  %v4521_v25 = vadd.f32 %v4520_v42, %v4519_v56  ;;  %v1432_v50 = vadd.f32 %v4518_v51, %v7085_v22 }
 0x195   : > { %1710 = vadd.xlane.f32.xlu1 %v7097_v1  ;;  %v7100_v32 = vadd.f32 %v4627_v26, %v1427_v41  ;;  %v1435_v13 = vadd.f32 %v4521_v25, %v7085_v22 }
 0x198   : > { %v4628_v7 = vpop.f32.mrb[8].mxu1 }
 0x199   : > { %v4629_v44 = vpop.f32.mrb[9].mxu1  ;;  %1712 = vadd.xlane.f32.xlu1 %v7100_v32 }
 0x19a   : > { %v4630_v24 = vadd.f32 %v4629_v44, %v4628_v7  ;;  %v4631_v0 = vpop.f32.mrb[10].mxu1 }
 0x19b   : > { %v4632_v16 = vpop.f32.mrb[11].mxu1 }
 0x19c   : > { %v4633_v15 = vadd.f32 %v4632_v16, %v4631_v0  ;;  %v7105_v52 = vadd.f32 %v4630_v24, %v1432_v50 }
 0x19e   : > { %1714 = vadd.xlane.f32.xlu0 %v7105_v52  ;;  %v7108_v27 = vadd.f32 %v4633_v15, %v1435_v13 }
 0x1a0   : > { %1716 = vadd.xlane.f32.xlu1 %v7108_v27 }
 0x1a3   : > { %v4522_v57 = vpop.f32.mrb[12].mxu0 }
 0x1a4   : > { %v4523_v21 = vpop.f32.mrb[13].mxu0 }
 0x1a5   : > { %v4524_v29 = vadd.f32 %v4523_v21, %v4522_v57  ;;  %v4525_v20 = vpop.f32.mrb[14].mxu0 }
 0x1a6   : > { %v4526_v38 = vpop.f32.mrb[15].mxu0 }
 0x1a7   : > { %v4527_v8 = vadd.f32 %v4526_v38, %v4525_v20  ;;  %v1440_v48 = vadd.f32 %v4524_v29, %v7085_v22 }
 0x1a9   : > { %v1443_v4 = vadd.f32 %v4527_v8, %v7085_v22 }
 0x1ab   : > { %v4634_v61 = vpop.f32.mrb[12].mxu1 }
 0x1ac   : > { %v4635_v54 = vpop.f32.mrb[13].mxu1  ;;  %v4528_v58 = vpop.f32.mrb[16].mxu0 }
 0x1ad   : > { %v4636_v62 = vadd.f32 %v4635_v54, %v4634_v61  ;;  %v4637_v31 = vpop.f32.mrb[14].mxu1  ;;  %v4529_v63 = vpop.f32.mrb[17].mxu0 }
 0x1ae   : > { %v4638_v36 = vpop.f32.mrb[15].mxu1  ;;  %v4530_v6 = vadd.f32 %v4529_v63, %v4528_v58  ;;  %v4531_v9 = vpop.f32.mrb[18].mxu0 }
 0x1af   : > { %v4639_v59 = vadd.f32 %v4638_v36, %v4637_v31  ;;  %v7113_v43 = vadd.f32 %v4636_v62, %v1440_v48  ;;  %v4532_v11 = vpop.f32.mrb[19].mxu0 }
 0x1b0   : > { %v4533_v35 = vadd.f32 %v4532_v11, %v4531_v9  ;;  %v1448_v19 = vadd.f32 %v4530_v6, %v7085_v22 }
 0x1b1   : > { %1718 = vadd.xlane.f32.xlu0 %v7113_v43  ;;  %v7116_v34 = vadd.f32 %v4639_v59, %v1443_v4 }
 0x1b2   : > { %v1451_v30 = vadd.f32 %v4533_v35, %v7085_v22 }
 0x1b3   : > { %v4640_v49 = vpop.f32.mrb[16].mxu1  ;;  %1720 = vadd.xlane.f32.xlu1 %v7116_v34 }
 0x1b4   : > { %v4641_v33 = vpop.f32.mrb[17].mxu1 }
 0x1b5   : > { %v4642_v12 = vadd.f32 %v4641_v33, %v4640_v49  ;;  %v4643_v5 = vpop.f32.mrb[18].mxu1  ;;  %v4534_v60 = vpop.f32.mrb[20].mxu0 }
 0x1b6   : > { %v4644_v37 = vpop.f32.mrb[19].mxu1  ;;  %v4535_v46 = vpop.f32.mrb[21].mxu0 }
 0x1b7   : > { %v4645_v40 = vadd.f32 %v4644_v37, %v4643_v5  ;;  %v7121_v23 = vadd.f32 %v4642_v12, %v1448_v19  ;;  %v4536_v47 = vadd.f32 %v4535_v46, %v4534_v60  ;;  %v4537_v17 = vpop.f32.mrb[22].mxu0 }
 0x1b8   : > { %v4538_v39 = vpop.f32.mrb[23].mxu0 }
 0x1b9   : > { %1722 = vadd.xlane.f32.xlu0 %v7121_v23  ;;  %v7124_v2 = vadd.f32 %v4645_v40, %v1451_v30  ;;  %v4539_v53 = vadd.f32 %v4538_v39, %v4537_v17  ;;  %v1456_v10 = vadd.f32 %v4536_v47, %v7085_v22 }
 0x1bb   : > { %1724 = vadd.xlane.f32.xlu1 %v7124_v2  ;;  %v1459_v45 = vadd.f32 %v4539_v53, %v7085_v22 }
 0x1bc   : > { %v4646_v3 = vpop.f32.mrb[20].mxu1 }
 0x1bd   : > { %v4647_v18 = vpop.f32.mrb[21].mxu1 }
 0x1be   : > { %v4648_v51 = vadd.f32 %v4647_v18, %v4646_v3  ;;  %v4649_v56 = vpop.f32.mrb[22].mxu1 }
 0x1bf   : > { %v4650_v28 = vpop.f32.mrb[23].mxu1 }
 0x1c0   : > { %v4651_v42 = vadd.f32 %v4650_v28, %v4649_v56  ;;  %v7129_v41 = vadd.f32 %v4648_v51, %v1456_v10 }
 0x1c2   : > { %1726 = vadd.xlane.f32.xlu0 %v7129_v41  ;;  %v7132_v26 = vadd.f32 %v4651_v42, %v1459_v45 }
 0x1c4   : > { %1728 = vadd.xlane.f32.xlu1 %v7132_v26 }
 0x1c7   : > { %v4540_v25 = vpop.f32.mrb[24].mxu0 }
 0x1c8   : > { %v4541_v50 = vpop.f32.mrb[25].mxu0 }
 0x1c9   : > { %v4542_v7 = vadd.f32 %v4541_v50, %v4540_v25  ;;  %v4543_v44 = vpop.f32.mrb[26].mxu0 }
 0x1ca   : > { %v4544_v13 = vpop.f32.mrb[27].mxu0 }
 0x1cb   : > { %v4545_v24 = vadd.f32 %v4544_v13, %v4543_v44  ;;  %v1464_v0 = vadd.f32 %v4542_v7, %v7085_v22 }
 0x1cd   : > { %v1467_v21 = vadd.f32 %v4545_v24, %v7085_v22 }
 0x1cf   : > { %v4652_v16 = vpop.f32.mrb[24].mxu1 }
 0x1d0   : > { %v4653_v15 = vpop.f32.mrb[25].mxu1  ;;  %v4546_v57 = vpop.f32.mrb[28].mxu0 }
 0x1d1   : > { %v4654_v29 = vadd.f32 %v4653_v15, %v4652_v16  ;;  %v4655_v20 = vpop.f32.mrb[26].mxu1  ;;  %v4547_v38 = vpop.f32.mrb[29].mxu0 }
 0x1d2   : > { %v4656_v8 = vpop.f32.mrb[27].mxu1  ;;  %v4548_v48 = vadd.f32 %v4547_v38, %v4546_v57  ;;  %v4549_v61 = vpop.f32.mrb[30].mxu0 }
 0x1d3   : > { %v4657_v54 = vadd.f32 %v4656_v8, %v4655_v20  ;;  %v7137_v58 = vadd.f32 %v4654_v29, %v1464_v0  ;;  %v4550_v4 = vpop.f32.mrb[31].mxu0 }
 0x1d4   : > { %v4551_v62 = vadd.f32 %v4550_v4, %v4549_v61  ;;  %v1472_v63 = vadd.f32 %v4548_v48, %v7085_v22 }
 0x1d5   : > { %1730 = vadd.xlane.f32.xlu0 %v7137_v58  ;;  %v7140_v31 = vadd.f32 %v4657_v54, %v1467_v21 }
 0x1d6   : > { %v1475_v9 = vadd.f32 %v4551_v62, %v7085_v22 }
 0x1d7   : > { %1732 = vadd.xlane.f32.xlu1 %v7140_v31 }
 0x1d8   : > { %v4658_v36 = vpop.f32.mrb[28].mxu1 }
 0x1d9   : > { %v4659_v6 = vpop.f32.mrb[29].mxu1 }
 0x1da   : > { %v4660_v59 = vadd.f32 %v4659_v6, %v4658_v36  ;;  %v4661_v11 = vpop.f32.mrb[30].mxu1 }
 0x1db   : > { %v4662_v35 = vpop.f32.mrb[31].mxu1 }
 0x1dc   : > { %v4663_v19 = vadd.f32 %v4662_v35, %v4661_v11  ;;  %v7145_v49 = vadd.f32 %v4660_v59, %v1472_v63 }
 0x1de   : > { %1734 = vadd.xlane.f32.xlu0 %v7145_v49  ;;  %v7148_v33 = vadd.f32 %v4663_v19, %v1475_v9  ;;  %v4552_v30 = vpop.f32.mrb[32].mxu0 }
 0x1df   : > { %v4553_v12 = vpop.f32.mrb[33].mxu0 }
 0x1e0   : > { %1736 = vadd.xlane.f32.xlu1 %v7148_v33  ;;  %v4554_v5 = vadd.f32 %v4553_v12, %v4552_v30  ;;  %v4555_v60 = vpop.f32.mrb[34].mxu0 }
 0x1e1   : > { %v4556_v37 = vpop.f32.mrb[35].mxu0 }
 0x1e2   : > { %v4557_v46 = vadd.f32 %v4556_v37, %v4555_v60  ;;  %v1480_v40 = vadd.f32 %v4554_v5, %v7085_v22 }
 0x1e4   : > { %v1483_v39 = vadd.f32 %v4557_v46, %v7085_v22 }
 0x1e6   : > { %v4664_v47 = vpop.f32.mrb[32].mxu1 }
 0x1e7   : > { %v4665_v17 = vpop.f32.mrb[33].mxu1 }
 0x1e8   : > { %v4666_v53 = vadd.f32 %v4665_v17, %v4664_v47  ;;  %v4667_v10 = vpop.f32.mrb[34].mxu1 }
 0x1e9   : > { %v4668_v3 = vpop.f32.mrb[35].mxu1 }
 0x1ea   : > { %v4669_v18 = vadd.f32 %v4668_v3, %v4667_v10  ;;  %v4558_v45 = vpop.f32.mrb[36].mxu0  ;;  %v7153_v51 = vadd.f32 %v4666_v53, %v1480_v40 }
 0x1eb   : > { %v4559_v56 = vpop.f32.mrb[37].mxu0 }
 0x1ec   : > { %1738 = vadd.xlane.f32.xlu0 %v7153_v51  ;;  %v4560_v28 = vadd.f32 %v4559_v56, %v4558_v45  ;;  %v4561_v42 = vpop.f32.mrb[38].mxu0  ;;  %v7156_v25 = vadd.f32 %v4669_v18, %v1483_v39 }
 0x1ed   : > { %v4562_v50 = vpop.f32.mrb[39].mxu0 }
 0x1ee   : > { %1740 = vadd.xlane.f32.xlu1 %v7156_v25  ;;  %v4563_v7 = vadd.f32 %v4562_v50, %v4561_v42  ;;  %v1488_v44 = vadd.f32 %v4560_v28, %v7085_v22 }
 0x1f0   : > { %v1491_v0 = vadd.f32 %v4563_v7, %v7085_v22 }
 0x1f2   : > { %v4670_v13 = vpop.f32.mrb[36].mxu1 }
 0x1f3   : > { %v4671_v24 = vpop.f32.mrb[37].mxu1 }
 0x1f4   : > { %v4672_v16 = vadd.f32 %v4671_v24, %v4670_v13  ;;  %v4673_v15 = vpop.f32.mrb[38].mxu1  ;;  %v4564_v57 = vpop.f32.mrb[40].mxu0 }
 0x1f5   : > { %v4674_v21 = vpop.f32.mrb[39].mxu1  ;;  %v4565_v29 = vpop.f32.mrb[41].mxu0 }
 0x1f6   : > { %v4675_v20 = vadd.f32 %v4674_v21, %v4673_v15  ;;  %v7161_v38 = vadd.f32 %v4672_v16, %v1488_v44  ;;  %v4566_v8 = vadd.f32 %v4565_v29, %v4564_v57  ;;  %v4567_v48 = vpop.f32.mrb[42].mxu0 }
 0x1f7   : > { %v4568_v61 = vpop.f32.mrb[43].mxu0 }
 0x1f8   : > { %1742 = vadd.xlane.f32.xlu0 %v7161_v38  ;;  %v7164_v54 = vadd.f32 %v4675_v20, %v1491_v0  ;;  %v4569_v4 = vadd.f32 %v4568_v61, %v4567_v48  ;;  %v1496_v62 = vadd.f32 %v4566_v8, %v7085_v22  ;;  %v7185_v20 = vld [vmem:[%s9061_s3 + $0x3] ss:$0 sm:$0xff] }
 0x1fa   : > { %1744 = vadd.xlane.f32.xlu1 %v7164_v54  ;;  %v4676_v63 = vpop.f32.mrb[40].mxu1  ;;  %v1499_v6 = vadd.f32 %v4569_v4, %v7085_v22 }
 0x1fb   : > { %v4677_v36 = vpop.f32.mrb[41].mxu1 }
 0x1fc   : > { %v4678_v9 = vadd.f32 %v4677_v36, %v4676_v63  ;;  %v4679_v59 = vpop.f32.mrb[42].mxu1 }
 0x1fd   : > { %v4680_v11 = vpop.f32.mrb[43].mxu1 }
 0x1fe   : > { %v4681_v35 = vadd.f32 %v4680_v11, %v4679_v59  ;;  %v7169_v19 = vadd.f32 %v4678_v9, %v1496_v62 }
 0x200   : > { %1746 = vadd.xlane.f32.xlu0 %v7169_v19  ;;  %v7172_v30 = vadd.f32 %v4681_v35, %v1499_v6 }
 0x202   : > { %1748 = vadd.xlane.f32.xlu1 %v7172_v30 }
 0x208   : > { %v4570_v12 = vpop.f32.mrb[44].mxu0 }
 0x209   : > { %v4571_v5 = vpop.f32.mrb[45].mxu0 }
 0x20a   : > { %v4572_v60 = vadd.f32 %v4571_v5, %v4570_v12  ;;  %v4573_v37 = vpop.f32.mrb[46].mxu0 }
 0x20b   : > { %v4574_v46 = vpop.f32.mrb[47].mxu0 }
 0x20c   : > { %v4575_v40 = vadd.f32 %v4574_v46, %v4573_v37  ;;  %v1504_v47 = vadd.f32 %v4572_v60, %v7085_v22 }
 0x20e   : > { %v1507_v3 = vadd.f32 %v4575_v40, %v7085_v22 }
 0x210   : > { %v4682_v17 = vpop.f32.mrb[44].mxu1  ;;  %v4576_v39 = vpop.f32.mrb[48].mxu0 }
 0x211   : > { %v4683_v53 = vpop.f32.mrb[45].mxu1  ;;  %v4577_v10 = vpop.f32.mrb[49].mxu0 }
 0x212   : > { %v4684_v18 = vadd.f32 %v4683_v53, %v4682_v17  ;;  %v4685_v45 = vpop.f32.mrb[46].mxu1  ;;  %v4578_v56 = vadd.f32 %v4577_v10, %v4576_v39  ;;  %v4579_v28 = vpop.f32.mrb[50].mxu0 }
 0x213   : > { %v4686_v42 = vpop.f32.mrb[47].mxu1  ;;  %v4580_v50 = vpop.f32.mrb[51].mxu0 }
 0x214   : > { %v4687_v7 = vadd.f32 %v4686_v42, %v4685_v45  ;;  %v7177_v44 = vadd.f32 %v4684_v18, %v1504_v47  ;;  %v4581_v13 = vadd.f32 %v4580_v50, %v4579_v28  ;;  %v1512_v16 = vadd.f32 %v4578_v56, %v7085_v22 }
 0x216   : > { %v7179_v24 = vadd.f32 %v4687_v7, %v1507_v3  ;;  %v1515_v8 = vadd.f32 %v4581_v13, %v7085_v22 }
 0x218   : > { %v4688_v15 = vpop.f32.mrb[48].mxu1 }
 0x219   : > { %v4689_v21 = vpop.f32.mrb[49].mxu1  ;;  %v4582_v29 = vpop.f32.mrb[52].mxu0 }
 0x21a   : > { %v1707_v0 = vpop.xlane.xlu0 %1706  ;;  %v4690_v48 = vadd.f32 %v4689_v21, %v4688_v15  ;;  %v4691_v61 = vpop.f32.mrb[50].mxu1 }
 0x21b   : > { %v1770_v57 = vmul.f32 0.015625, %v1707_v0  ;;  %v4583_v4 = vpop.f32.mrb[53].mxu0  ;;  %v4692_v63 = vpop.f32.mrb[51].mxu1 }
 0x21c   : > { %v4584_v36 = vadd.f32 %v4583_v4, %v4582_v29  ;;  %v4585_v6 = vpop.f32.mrb[54].mxu0  ;;  %v4693_v59 = vadd.f32 %v4692_v63, %v4691_v61  ;;  %v7189_v11 = vadd.f32 %v4690_v48, %v1512_v16 }
 0x21d   : > { %v1802_v62 = vsub.f32 %v7089_v55, %v1770_v57  ;;  %v4586_v35 = vpop.f32.mrb[55].mxu0 }
 0x21e   : > { %v1709_v9 = vpop.xlane.xlu0 %1708  ;;  %v4587_v60 = vadd.f32 %v4586_v35, %v4585_v6  ;;  %v7194_v37 = vadd.f32 %v4693_v59, %v1515_v8  ;;  %v1520_v47 = vadd.f32 %v4584_v36, %v7085_v22 }
 0x21f   : > { %v1771_v12 = vmul.f32 0.015625, %v1709_v9  ;;  %v7192_v5 = vmul.f32 %v7185_v20, %v1802_v62 }
 0x220   : > { %v4694_v17 = vpop.f32.mrb[52].mxu1  ;;  %v1523_v3 = vadd.f32 %v4587_v60, %v7085_v22 }
 0x221   : > { %v1803_v46 = vsub.f32 %v7092_v14, %v1771_v12  ;;  %v1870_v55 = vmul.f32 %v7192_v5, %v7192_v5  ;;  %v4695_v10 = vpop.f32.mrb[53].mxu1 }
 0x222   : > { %v1711_v40 = vpop.xlane.xlu1 %1710  ;;  %v4696_v18 = vadd.f32 %v4695_v10, %v4694_v17  ;;  %v4697_v45 = vpop.f32.mrb[54].mxu1 }
 0x223   : > { %v1772_v39 = vmul.f32 0.015625, %v1711_v40  ;;  %1902 = vadd.xlane.f32.xlu0 %v1870_v55  ;;  %v7201_v53 = vmul.f32 %v7185_v20, %v1803_v46  ;;  %v4698_v28 = vpop.f32.mrb[55].mxu1 }
 0x224   : > { %v4699_v50 = vadd.f32 %v4698_v28, %v4697_v45  ;;  %v7207_v7 = vadd.f32 %v4696_v18, %v1520_v47 }
 0x225   : > { %v1804_v56 = vsub.f32 %v7097_v1, %v1772_v39  ;;  %v1871_v14 = vmul.f32 %v7201_v53, %v7201_v53 }
 0x226   : > { %v1713_v42 = vpop.xlane.xlu1 %1712  ;;  %v7213_v16 = vadd.f32 %v4699_v50, %v1523_v3 }
 0x227   : > { %v1773_v13 = vmul.f32 0.015625, %v1713_v42  ;;  %1750 = vadd.xlane.f32.xlu0 %v7177_v44  ;;  %1904 = vadd.xlane.f32.xlu1 %v1871_v14  ;;  %v7211_v0 = vmul.f32 %v7185_v20, %v1804_v56 }
 0x229   : > { %v1805_v15 = vsub.f32 %v7100_v32, %v1773_v13  ;;  %v1872_v1 = vmul.f32 %v7211_v0, %v7211_v0 }
 0x22b   : > { %v1715_v57 = vpop.xlane.xlu0 %1714  ;;  %1906 = vadd.xlane.f32.xlu0 %v1872_v1  ;;  %1752 = vadd.xlane.f32.xlu1 %v7179_v24  ;;  %v7220_v21 = vmul.f32 %v7185_v20, %v1805_v15 }
 0x22c   : > { %v1774_v29 = vmul.f32 0.015625, %v1715_v57 }
 0x22d   : > { %v1717_v8 = vpop.xlane.xlu1 %1716  ;;  %v1873_v48 = vmul.f32 %v7220_v21, %v7220_v21 }
 0x22e   : > { %v1806_v61 = vsub.f32 %v7105_v52, %v1774_v29  ;;  %v1775_v4 = vmul.f32 0.015625, %v1717_v8  ;;  %v4588_v63 = vpop.f32.mrb[56].mxu0 }
 0x22f   : > { %1754 = vadd.xlane.f32.xlu0 %v7189_v11  ;;  %1908 = vadd.xlane.f32.xlu1 %v1873_v48  ;;  %v4589_v36 = vpop.f32.mrb[57].mxu0 }
 0x230   : > { %v1807_v32 = vsub.f32 %v7108_v27, %v1775_v4  ;;  %v7228_v62 = vmul.f32 %v7185_v20, %v1806_v61  ;;  %v4590_v9 = vadd.f32 %v4589_v36, %v4588_v63  ;;  %v4591_v35 = vpop.f32.mrb[58].mxu0 }
 0x231   : > { %v4592_v52 = vpop.f32.mrb[59].mxu0 }
 0x232   : > { %v1874_v6 = vmul.f32 %v7228_v62, %v7228_v62  ;;  %v7233_v59 = vmul.f32 %v7185_v20, %v1807_v32  ;;  %v4593_v12 = vadd.f32 %v4592_v52, %v4591_v35  ;;  %v1528_v60 = vadd.f32 %v4590_v9, %v7085_v22 }
 0x233   : > { %1756 = vadd.xlane.f32.xlu1 %v7194_v37 }
 0x234   : > { %1910 = vadd.xlane.f32.xlu0 %v1874_v6  ;;  %v1875_v27 = vmul.f32 %v7233_v59, %v7233_v59  ;;  %v1531_v17 = vadd.f32 %v4593_v12, %v7085_v22 }
 0x236   : > { %v4700_v46 = vpop.f32.mrb[56].mxu1  ;;  %v4594_v55 = vpop.f32.mrb[60].mxu0 }
 0x237   : > { %1912 = vadd.xlane.f32.xlu1 %v1875_v27  ;;  %v4701_v40 = vpop.f32.mrb[57].mxu1  ;;  %v4595_v47 = vpop.f32.mrb[61].mxu0 }
 0x238   : > { %1758 = vadd.xlane.f32.xlu0 %v7207_v7  ;;  %v4702_v39 = vadd.f32 %v4701_v40, %v4700_v46  ;;  %v4703_v10 = vpop.f32.mrb[58].mxu1  ;;  %v4596_v3 = vadd.f32 %v4595_v47, %v4594_v55  ;;  %v4597_v18 = vpop.f32.mrb[62].mxu0 }
 0x239   : > { %v4704_v45 = vpop.f32.mrb[59].mxu1  ;;  %v4598_v56 = vpop.f32.mrb[63].mxu0 }
 0x23a   : > { %v4705_v14 = vadd.f32 %v4704_v45, %v4703_v10  ;;  %v7242_v28 = vadd.f32 %v4702_v39, %v1528_v60  ;;  %v4599_v42 = vadd.f32 %v4598_v56, %v4597_v18  ;;  %v1536_v57 = vadd.f32 %v4596_v3, %v7085_v22 }
 0x23b   : > { %1760 = vadd.xlane.f32.xlu1 %v7213_v16 }
 0x23c   : > { %v7244_v13 = vadd.f32 %v4705_v14, %v1531_v17  ;;  %v1539_v4 = vadd.f32 %v4599_v42, %v7085_v22 }
 0x23e   : > { %v1719_v50 = vpop.xlane.xlu0 %1718  ;;  %v4706_v29 = vpop.f32.mrb[60].mxu1 }
 0x23f   : > { %v1776_v15 = vmul.f32 0.015625, %v1719_v50  ;;  %v4707_v61 = vpop.f32.mrb[61].mxu1 }
 0x240   : > { %v1721_v1 = vpop.xlane.xlu1 %1720  ;;  %v4708_v32 = vadd.f32 %v4707_v61, %v4706_v29  ;;  %v4709_v63 = vpop.f32.mrb[62].mxu1 }
 0x241   : > { %v1808_v8 = vsub.f32 %v7113_v43, %v1776_v15  ;;  %v1777_v48 = vmul.f32 0.015625, %v1721_v1  ;;  %v4710_v9 = vpop.f32.mrb[63].mxu1 }
 0x242   : > { %v4711_v35 = vadd.f32 %v4710_v9, %v4709_v63  ;;  %v7253_v52 = vadd.f32 %v4708_v32, %v1536_v57  ;;  %v5052_v32 = vld [vmem:[#allocation9] sm:$0xff]  }
 0x243   : > { %v1809_v36 = vsub.f32 %v7116_v34, %v1777_v48  ;;  %v7251_v6 = vmul.f32 %v7185_v20, %v1808_v8  ;;  %v5053_v63 = vld [vmem:[#allocation9 + $0xc0] sm:$0xff]  }
 0x244   : > { %v7260_v60 = vadd.f32 %v4711_v35, %v1539_v4  ;;  %v5051_v4 = vld [vmem:[#allocation9 + $0x40] sm:$0xff]   ;;  %4824 = vmatprep.subr.bf16.mxu1 %v5053_v63  ;;  %v5063_v63 = vld [vmem:[#allocation9 + $0x58] sm:$0xff]  }
 0x245   : > { %v1876_v12 = vmul.f32 %v7251_v6, %v7251_v6  ;;  %v7258_v43 = vmul.f32 %v7185_v20, %v1809_v36  ;;  %v5054_v35 = vld [vmem:[#allocation9 + $0x80] sm:$0xff]   ;;  %4712 = vmatprep.subr.bf16.mxu0 %v5051_v4 }
 0x246   : > { %v1723_v27 = vpop.xlane.xlu0 %1722  ;;  %4713 = vmatpush3.bf16.msra.mxu0 %v5052_v32  ;;  %4825 = vmatpush3.bf16.msra.mxu1 %v5054_v35 }
 0x247   : > { %v1778_v22 = vmul.f32 0.015625, %v1723_v27  ;;  %1914 = vadd.xlane.f32.xlu0 %v1876_v12  ;;  %v1877_v34 = vmul.f32 %v7258_v43, %v7258_v43 }
 0x248   : > { %v1725_v46 = vpop.xlane.xlu1 %1724 }
 0x249   : > { %v1810_v55 = vsub.f32 %v7121_v23, %v1778_v22  ;;  %v1779_v40 = vmul.f32 0.015625, %v1725_v46  ;;  %1916 = vadd.xlane.f32.xlu1 %v1877_v34 }
 0x24b   : > { %v1811_v47 = vsub.f32 %v7124_v2, %v1779_v40  ;;  %1762 = vadd.xlane.f32.xlu0 %v7242_v28  ;;  %v7268_v17 = vmul.f32 %v7185_v20, %v1810_v55 }
 0x24d   : > { %1764 = vadd.xlane.f32.xlu1 %v7244_v13  ;;  %v1878_v39 = vmul.f32 %v7268_v17, %v7268_v17  ;;  %v7274_v10 = vmul.f32 %v7185_v20, %v1811_v47 }
 0x24f   : > { %v1727_v3 = vpop.xlane.xlu0 %1726  ;;  %1918 = vadd.xlane.f32.xlu0 %v1878_v39  ;;  %v1879_v23 = vmul.f32 %v7274_v10, %v7274_v10 }
 0x250   : > { %v1780_v18 = vmul.f32 0.015625, %v1727_v3 }
 0x251   : > { %v1729_v2 = vpop.xlane.xlu1 %1728  ;;  %1920 = vadd.xlane.f32.xlu1 %v1879_v23 }
 0x252   : > { %v1812_v45 = vsub.f32 %v7129_v41, %v1780_v18  ;;  %v1781_v56 = vmul.f32 0.015625, %v1729_v2 }
 0x253   : > { %1766 = vadd.xlane.f32.xlu0 %v7253_v52 }
 0x254   : > { %v1813_v14 = vsub.f32 %v7132_v26, %v1781_v56  ;;  %v7282_v42 = vmul.f32 %v7185_v20, %v1812_v45 }
 0x255   : > { %1768 = vadd.xlane.f32.xlu1 %v7260_v60 }
 0x256   : > { %v1880_v50 = vmul.f32 %v7282_v42, %v7282_v42  ;;  %v7288_v15 = vmul.f32 %v7185_v20, %v1813_v14 }
 0x258   : > { %1922 = vadd.xlane.f32.xlu0 %v1880_v50  ;;  %v1881_v41 = vmul.f32 %v7288_v15, %v7288_v15  ;;  %v5055_v50 = vld [vmem:[#allocation9 + $0x48] sm:$0xff]  }
 0x259   : > { %4714 = vmatprep.subr.bf16.mxu0 %v5055_v50 }
 0x25a   : > { %1924 = vadd.xlane.f32.xlu1 %v1881_v41  ;;  %v5056_v41 = vld [vmem:[#allocation9 + $0x8] sm:$0xff]  }
 0x25b   : > { %4715 = vmatpush3.bf16.msra.mxu0 %v5056_v41  ;;  %v5071_v41 = vld [vmem:[#allocation9 + $0x70] sm:$0xff]  }
 0x262   : > { %v1731_v1 = vpop.xlane.xlu0 %1730 }
 0x263   : > { %v1782_v57 = vmul.f32 0.015625, %v1731_v1 }
 0x264   : > { %v1733_v29 = vpop.xlane.xlu1 %1732 }
 0x265   : > { %v1814_v26 = vsub.f32 %v7137_v58, %v1782_v57  ;;  %v1783_v8 = vmul.f32 0.015625, %v1733_v29  ;;  %v5058_v57 = vld [vmem:[#allocation9 + $0x88] sm:$0xff]  }
 0x267   : > { %v1815_v48 = vsub.f32 %v7140_v31, %v1783_v8  ;;  %v7295_v61 = vmul.f32 %v7185_v20, %v1814_v26  ;;  %v5060_v26 = vld [vmem:[#allocation9 + $0x10] sm:$0xff]  }
 0x269   : > { %v1882_v36 = vmul.f32 %v7295_v61, %v7295_v61  ;;  %v7300_v9 = vmul.f32 %v7185_v20, %v1815_v48 }
 0x26b   : > { %v1735_v12 = vpop.xlane.xlu0 %1734  ;;  %1926 = vadd.xlane.f32.xlu0 %v1882_v36  ;;  %v1883_v58 = vmul.f32 %v7300_v9, %v7300_v9  ;;  %v5064_v36 = vld [vmem:[#allocation9 + $0x18] sm:$0xff]  }
 0x26c   : > { %v1784_v31 = vmul.f32 0.015625, %v1735_v12 }
 0x26d   : > { %v1737_v27 = vpop.xlane.xlu1 %1736  ;;  %1928 = vadd.xlane.f32.xlu1 %v1883_v58 }
 0x26e   : > { %v1816_v22 = vsub.f32 %v7145_v49, %v1784_v31  ;;  %v1785_v34 = vmul.f32 0.015625, %v1737_v27  ;;  %v5061_v27 = vld [vmem:[#allocation9 + $0xd0] sm:$0xff]  }
 0x270   : > { %v1817_v46 = vsub.f32 %v7148_v33, %v1785_v34  ;;  %v7307_v55 = vmul.f32 %v7185_v20, %v1816_v22  ;;  %v5065_v22 = vld [vmem:[#allocation9 + $0x60] sm:$0xff]   ;;  %v5062_v34 = vld [vmem:[#allocation9 + $0x90] sm:$0xff]  }
 0x272   : > { %v1884_v40 = vmul.f32 %v7307_v55, %v7307_v55  ;;  %v7312_v47 = vmul.f32 %v7185_v20, %v1817_v46 }
 0x274   : > { %1930 = vadd.xlane.f32.xlu0 %v1884_v40  ;;  %v1885_v39 = vmul.f32 %v7312_v47, %v7312_v47 }
 0x276   : > { %1932 = vadd.xlane.f32.xlu1 %v1885_v39 }
 0x279   : > { %v1739_v3 = vpop.xlane.xlu0 %1738 }
 0x27a   : > { %v1786_v23 = vmul.f32 0.015625, %v1739_v3  ;;  %v5067_v3 = vld [vmem:[#allocation9 + $0x68] sm:$0xff]  }
 0x27b   : > { %v1741_v49 = vpop.xlane.xlu1 %1740 }
 0x27c   : > { %v1818_v18 = vsub.f32 %v7153_v51, %v1786_v23  ;;  %v1787_v33 = vmul.f32 0.015625, %v1741_v49  ;;  %v5057_v51 = vld [vmem:[#allocation9 + $0xc8] sm:$0xff]   ;;  %v5068_v23 = vld [vmem:[#allocation9 + $0xd8] sm:$0xff]  }
 0x27d   : > { %4826 = vmatprep.subr.bf16.mxu1 %v5057_v51 }
 0x27e   : > { %v1819_v2 = vsub.f32 %v7156_v25, %v1787_v33  ;;  %v7319_v45 = vmul.f32 %v7185_v20, %v1818_v18  ;;  %v5059_v25 = vld [vmem:[#allocation9 + $0x50] sm:$0xff]   ;;  %4827 = vmatpush3.bf16.msra.mxu1 %v5058_v57  ;;  %v5069_v33 = vld [vmem:[#allocation9 + $0x28] sm:$0xff]  }
 0x27f   : > { %4716 = vmatprep.subr.bf16.mxu0 %v5059_v25  ;;  %4828 = vmatprep.subr.bf16.mxu1 %v5061_v27  ;;  %v5074_v25 = vld [vmem:[#allocation9 + $0xa0] sm:$0xff]  }
 0x280   : > { %v1886_v56 = vmul.f32 %v7319_v45, %v7319_v45  ;;  %v7324_v14 = vmul.f32 %v7185_v20, %v1819_v2  ;;  %4717 = vmatpush3.bf16.msra.mxu0 %v5060_v26  ;;  %v5070_v2 = vld [vmem:[#allocation9 + $0x98] sm:$0xff]   ;;  %v5076_v26 = vld [vmem:[#allocation9 + $0xe8] sm:$0xff]  }
 0x281   : > { %4718 = vmatprep.subr.bf16.mxu0 %v5063_v63  ;;  %v5081_v63 = vld [vmem:[#allocation9 + $0xf8] sm:$0xff]  }
 0x282   : > { %1934 = vadd.xlane.f32.xlu0 %v1886_v56  ;;  %v1887_v1 = vmul.f32 %v7324_v14, %v7324_v14  ;;  %4829 = vmatpush3.bf16.msra.mxu1 %v5062_v34 }
 0x283   : > { %4830 = vmatprep.subr.bf16.mxu1 %v5068_v23 }
 0x284   : > { %1936 = vadd.xlane.f32.xlu1 %v1887_v1  ;;  %4719 = vmatpush3.bf16.msra.mxu0 %v5064_v36  ;;  %v5072_v1 = vld [vmem:[#allocation9 + $0xe0] sm:$0xff]   ;;  %v5082_v36 = vld [vmem:[#allocation9 + $0xb8] sm:$0xff]  }
 0x285   : > { %v1743_v29 = vpop.xlane.xlu0 %1742  ;;  %4720 = vmatprep.subr.bf16.mxu0 %v5065_v22 }
 0x286   : > { %v1788_v8 = vmul.f32 0.015625, %v1743_v29  ;;  %4831 = vmatpush3.bf16.msra.mxu1 %v5070_v2  ;;  %v5075_v29 = vld [vmem:[#allocation9 + $0x78] sm:$0xff]  }
 0x287   : > { %v1745_v48 = vpop.xlane.xlu1 %1744  ;;  %4832 = vmatprep.subr.bf16.mxu1 %v5072_v1 }
 0x288   : > { %v1820_v4 = vsub.f32 %v7161_v38, %v1788_v8  ;;  %v1789_v32 = vmul.f32 0.015625, %v1745_v48  ;;  %v5066_v38 = vld [vmem:[#allocation9 + $0x20] sm:$0xff]   ;;  %v5077_v8 = vld [vmem:[#allocation9 + $0x38] sm:$0xff]   ;;  %v5078_v48 = vld [vmem:[#allocation9 + $0xa8] sm:$0xff]  }
 0x289   : > { %4721 = vmatpush3.bf16.msra.mxu0 %v5066_v38 }
 0x28a   : > { %v1821_v35 = vsub.f32 %v7164_v54, %v1789_v32  ;;  %v7331_v12 = vmul.f32 %v7185_v20, %v1820_v4  ;;  %4722 = vmatprep.subr.bf16.mxu0 %v5067_v3  ;;  %4833 = vmatpush3.bf16.msra.mxu1 %v5074_v25  ;;  %v5079_v4 = vld [vmem:[#allocation9 + $0xf0] sm:$0xff]  }
 0x28b   : > { %4834 = vmatprep.subr.bf16.mxu1 %v5076_v26  ;;  %v5080_v32 = vld [vmem:[#allocation9 + $0xb0] sm:$0xff]  }
 0x28c   : > { %v1888_v58 = vmul.f32 %v7331_v12, %v7331_v12  ;;  %v7336_v31 = vmul.f32 %v7185_v20, %v1821_v35 }
 0x28d   : > { %v1747_v46 = vpop.xlane.xlu0 %1746  ;;  %4723 = vmatpush3.bf16.msra.mxu0 %v5069_v33 }
 0x28e   : > { %1938 = vadd.xlane.f32.xlu0 %v1888_v58  ;;  %v1889_v54 = vmul.f32 %v7336_v31, %v7336_v31  ;;  %v1790_v40 = vmul.f32 0.015625, %v1747_v46  ;;  %4724 = vmatprep.subr.bf16.mxu0 %v5071_v41 }
 0x28f   : > { %v1749_v39 = vpop.xlane.xlu1 %1748  ;;  %4835 = vmatpush3.bf16.msra.mxu1 %v5078_v48 }
 0x290   : > { %1940 = vadd.xlane.f32.xlu1 %v1889_v54  ;;  %v1822_v49 = vsub.f32 %v7169_v19, %v1790_v40  ;;  %v1791_v18 = vmul.f32 0.015625, %v1749_v39  ;;  %v5073_v19 = vld [vmem:[#allocation9 + $0x30] sm:$0xff]   ;;  %4836 = vmatprep.subr.bf16.mxu1 %v5079_v4  ;;  %v7374_v4 = vld [vmem:[%s9061_s3 + $0x2] ss:$0 sm:$0xff] }
 0x291   : > { %4725 = vmatpush3.bf16.msra.mxu0 %v5073_v19 }
 0x292   : > { %v1823_v56 = vsub.f32 %v7172_v30, %v1791_v18  ;;  %v7343_v50 = vmul.f32 %v7185_v20, %v1822_v49  ;;  %4726 = vmatprep.subr.bf16.mxu0 %v5075_v29 }
 0x293   : > { %4837 = vmatpush3.bf16.msra.mxu1 %v5080_v32 }
 0x294   : > { %v1890_v51 = vmul.f32 %v7343_v50, %v7343_v50  ;;  %v7348_v57 = vmul.f32 %v7185_v20, %v1823_v56  ;;  %4838 = vmatprep.subr.bf16.mxu1 %v5081_v63 }
 0x295   : > { %4727 = vmatpush3.bf16.msra.mxu0 %v5077_v8 }
 0x296   : > { %1942 = vadd.xlane.f32.xlu0 %v1890_v51  ;;  %v1891_v30 = vmul.f32 %v7348_v57, %v7348_v57 }
 0x297   : > { %4839 = vmatpush3.bf16.msra.mxu1 %v5082_v36 }
 0x298   : > { %1944 = vadd.xlane.f32.xlu1 %v1891_v30  ;;  %v7365_v30 = vld [vmem:[%s9061_s3 + $0x1] ss:$0 sm:$0xff] }
 0x2b0   : > { %v1903_v35 = vpop.xlane.xlu0 %1902 }
 0x2b1   : > { %v1966_v58 = vmul.f32 0.015625, %v1903_v35 }
 0x2b3   : > { %v1998_v27 = vadd.f32 1e-05, %v1966_v58 }
 0x2b4   : > { %v1905_v22 = vpop.xlane.xlu1 %1904  ;;  %v1751_v34 = vpop.xlane.xlu0 %1750 }
 0x2b5   : > { %5403 = vrsqrt.f32 %v1998_v27  ;;  %v1967_v38 = vmul.f32 0.015625, %v1905_v22  ;;  %v1792_v46 = vmul.f32 0.015625, %v1751_v34 }
 0x2b7   : > { %v1999_v54 = vadd.f32 1e-05, %v1967_v38  ;;  %v1824_v40 = vsub.f32 %v7177_v44, %v1792_v46 }
 0x2b8   : > { %v1753_v39 = vpop.xlane.xlu1 %1752  ;;  %v1907_v3 = vpop.xlane.xlu0 %1906 }
 0x2b9   : > { %5405 = vrsqrt.f32 %v1999_v54  ;;  %v1793_v23 = vmul.f32 0.015625, %v1753_v39  ;;  %v1968_v49 = vmul.f32 0.015625, %v1907_v3  ;;  %v7354_v18 = vmul.f32 %v7185_v20, %v1824_v40 }
 0x2bb   : > { %v1825_v33 = vsub.f32 %v7179_v24, %v1793_v23  ;;  %v2000_v2 = vadd.f32 1e-05, %v1968_v49  ;;  %v1892_v56 = vmul.f32 %v7354_v18, %v7354_v18 }
 0x2bc   : > { %v1909_v41 = vpop.xlane.xlu1 %1908  ;;  %v1755_v1 = vpop.xlane.xlu0 %1754 }
 0x2bd   : > { %5407 = vrsqrt.f32 %v2000_v2  ;;  %v1969_v51 = vmul.f32 0.015625, %v1909_v41  ;;  %v1794_v19 = vmul.f32 0.015625, %v1755_v1  ;;  %1946 = vadd.xlane.f32.xlu0 %v1892_v56  ;;  %v7360_v44 = vmul.f32 %v7185_v20, %v1825_v33 }
 0x2bf   : > { %v5404_v25 = vpop.eup %5403  ;;  %v2001_v24 = vadd.f32 1e-05, %v1969_v51  ;;  %v1826_v29 = vsub.f32 %v7189_v11, %v1794_v19  ;;  %v1893_v26 = vmul.f32 %v7360_v44, %v7360_v44 }
 0x2c0   : > { %v2062_v8 = vmul.f32 %v5404_v25, %v7192_v5  ;;  %v1757_v48 = vpop.xlane.xlu1 %1756 }
 0x2c1   : > { %5409 = vrsqrt.f32 %v2001_v24  ;;  %v1795_v32 = vmul.f32 0.015625, %v1757_v48  ;;  %v1911_v63 = vpop.xlane.xlu0 %1910  ;;  %1948 = vadd.xlane.f32.xlu1 %v1893_v26  ;;  %v7377_v36 = vmul.f32 %v7185_v20, %v1826_v29 }
 0x2c2   : > { %v2098_v11 = vmul.f32 %v7365_v30, %v2062_v8  ;;  %v1970_v35 = vmul.f32 0.015625, %v1911_v63 }
 0x2c3   : > { %v5406_v58 = vpop.eup %5405  ;;  %v1827_v27 = vsub.f32 %v7194_v37, %v1795_v32  ;;  %v1894_v5 = vmul.f32 %v7377_v36, %v7377_v36 }
 0x2c4   : > { %v2134_v22 = vadd.f32 %v7374_v4, %v2098_v11  ;;  %v2063_v34 = vmul.f32 %v5406_v58, %v7201_v53  ;;  %v2002_v38 = vadd.f32 1e-05, %v1970_v35  ;;  %v1913_v46 = vpop.xlane.xlu1 %1912 }
 0x2c5   : > { %v1971_v54 = vmul.f32 0.015625, %v1913_v46  ;;  %v1759_v40 = vpop.xlane.xlu0 %1758  ;;  %1950 = vadd.xlane.f32.xlu0 %v1894_v5  ;;  %v7386_v39 = vmul.f32 %v7185_v20, %v1827_v27 }
 0x2c6   : > { %v2166_v3 = vmul.f32 0.5, %v2134_v22  ;;  %v2099_v23 = vmul.f32 %v7365_v30, %v2063_v34  ;;  %5411 = vrsqrt.f32 %v2002_v38  ;;  %v1796_v37 = vmul.f32 0.015625, %v1759_v40 }
 0x2c7   : > { %v5408_v49 = vpop.eup %5407  ;;  %v2003_v33 = vadd.f32 1e-05, %v1971_v54  ;;  %v1895_v2 = vmul.f32 %v7386_v39, %v7386_v39 }
 0x2c8   : > { %5413 = vtanh.f32 %v2166_v3  ;;  %v2135_v53 = vadd.f32 %v7374_v4, %v2099_v23  ;;  %v2064_v56 = vmul.f32 %v5408_v49, %v7211_v0  ;;  %v1828_v41 = vsub.f32 %v7207_v7, %v1796_v37  ;;  %v1761_v1 = vpop.xlane.xlu1 %1760 }
 0x2c9   : > { %5415 = vrsqrt.f32 %v2003_v33  ;;  %v1797_v51 = vmul.f32 0.015625, %v1761_v1  ;;  %1952 = vadd.xlane.f32.xlu1 %v1895_v2 }
 0x2ca   : > { %v2167_v19 = vmul.f32 0.5, %v2135_v53  ;;  %v2100_v25 = vmul.f32 %v7365_v30, %v2064_v56  ;;  %v7396_v24 = vmul.f32 %v7185_v20, %v1828_v41 }
 0x2cb   : > { %v5410_v29 = vpop.eup %5409  ;;  %v1829_v26 = vsub.f32 %v7213_v16, %v1797_v51 }
 0x2cc   : > { %5417 = vtanh.f32 %v2167_v19  ;;  %v2136_v8 = vadd.f32 %v7374_v4, %v2100_v25  ;;  %v2065_v0 = vmul.f32 %v5410_v29, %v7220_v21  ;;  %v1896_v7 = vmul.f32 %v7396_v24, %v7396_v24 }
 0x2cd   : > { %v7404_v48 = vmul.f32 %v7185_v20, %v1829_v26 }
 0x2ce   : > { %v2168_v32 = vmul.f32 0.5, %v2136_v8  ;;  %v2101_v63 = vmul.f32 %v7365_v30, %v2065_v0  ;;  %1954 = vadd.xlane.f32.xlu0 %v1896_v7 }
 0x2cf   : > { %v1897_v11 = vmul.f32 %v7404_v48, %v7404_v48 }
 0x2d0   : > { %v5412_v35 = vpop.eup %5411  ;;  %5419 = vtanh.f32 %v2168_v32  ;;  %v2137_v16 = vadd.f32 %v7374_v4, %v2101_v63 }
 0x2d1   : > { %v2066_v58 = vmul.f32 %v5412_v35, %v7228_v62  ;;  %1956 = vadd.xlane.f32.xlu1 %v1897_v11 }
 0x2d2   : > { %v5414_v21 = vpop.eup %5413  ;;  %v2169_v27 = vmul.f32 0.5, %v2137_v16 }
 0x2d3   : > { %v5416_v5 = vpop.eup %5415  ;;  %v2230_v22 = vadd.f32 1.0, %v5414_v21  ;;  %v2102_v34 = vmul.f32 %v7365_v30, %v2066_v58 }
 0x2d4   : > { %5421 = vtanh.f32 %v2169_v27  ;;  %v2067_v38 = vmul.f32 %v5416_v5, %v7233_v59  ;;  %v1915_v46 = vpop.xlane.xlu0 %1914 }
 0x2d5   : > { %v2262_v54 = vmul.f32 %v2230_v22, %v2166_v3  ;;  %v2138_v40 = vadd.f32 %v7374_v4, %v2102_v34  ;;  %v1972_v23 = vmul.f32 0.015625, %v1915_v46 }
 0x2d6   : > { %v5418_v37 = vpop.eup %5417  ;;  %v2103_v49 = vmul.f32 %v7365_v30, %v2067_v38  ;;  %v1917_v33 = vpop.xlane.xlu1 %1916 }
 0x2d7   : > { %5423 = vtanh.f32 %v2262_v54  ;;  %v2231_v62 = vadd.f32 1.0, %v5418_v37  ;;  %v7417_v2 = vmul.f32 0.5, %v2138_v40  ;;  %v2004_v53 = vadd.f32 1e-05, %v1972_v23 }
 0x2d8   : > { %v2139_v56 = vadd.f32 %v7374_v4, %v2103_v49  ;;  %v1973_v41 = vmul.f32 0.015625, %v1917_v33  ;;  %v1763_v59 = vpop.xlane.xlu0 %1762  ;;  %v7425_v8 = vmul.f32 0.5, %v2262_v54  ;;  %v7446_v40 = vstv %s7420_s8 }
 0x2d9   : > { %v2263_v3 = vmul.f32 %v2231_v62, %v2167_v19  ;;  %5425 = vtanh.f32 %v7417_v2  ;;  %v1798_v1 = vmul.f32 0.015625, %v1763_v59 }
 0x2da   : > { %v5420_v51 = vpop.eup %5419  ;;  %v7423_v25 = vmul.f32 0.5, %v2139_v56  ;;  %5427 = vrsqrt.f32 %v2004_v53  ;;  %v2005_v29 = vadd.f32 1e-05, %v1973_v41  ;;  %v1765_v26 = vpop.xlane.xlu1 %1764 }
 0x2db   : > { %5429 = vtanh.f32 %v2263_v3  ;;  %v2232_v0 = vadd.f32 1.0, %v5420_v51  ;;  %v1830_v7 = vsub.f32 %v7242_v28, %v1798_v1  ;;  %v1799_v63 = vmul.f32 0.015625, %v1765_v26 }
 0x2dc   : > { %5431 = vtanh.f32 %v7423_v25  ;;  %v1919_v19 = vpop.xlane.xlu0 %1918  ;;  %v7429_v11 = vmul.f32 0.5, %v2263_v3  ;;  %v7437_v28 = vstv %s7415_s16  ;;  %s6090_s16 = scalar_lea.vmem %s6089_s15, 8192 }
 0x2dd   : > { %v2264_v35 = vmul.f32 %v2232_v0, %v2168_v32  ;;  %5433 = vrsqrt.f32 %v2005_v29  ;;  %v1831_v16 = vsub.f32 %v7244_v13, %v1799_v63  ;;  %v1974_v58 = vmul.f32 0.015625, %v1919_v19  ;;  %p6092_p5 = scmp.lt.s32.totalorder %s6090_s16, %s6084_s11 }
 0x2de   : > { %v5422_v21 = vpop.eup %5421  ;;  %v1921_v5 = vpop.xlane.xlu1 %1920  ;;  %v7433_v22 = vmul.f32 %v7185_v20, %v1830_v7  ;;  %5435 = vtanh.f32 %v7425_v8 }
 0x2df   : > { %5437 = vtanh.f32 %v2264_v35  ;;  %v2233_v34 = vadd.f32 1.0, %v5422_v21  ;;  %v2006_v38 = vadd.f32 1e-05, %v1974_v58  ;;  %v1975_v46 = vmul.f32 0.015625, %v1921_v5  ;;  %p6093_p7 = por %p6092_p5, %p6091_p10 }
 0x2e0   : > { %9086 = vst [vmem:[#allocation15_spill] sm:$0xff] %v7433_v22  ;;  %v1767_v54 = vpop.xlane.xlu0 %1766  ;;  %v1898_v32 = vmul.f32 %v7433_v22, %v7433_v22  ;;  %v7442_v13 = vmul.f32 %v7185_v20, %v1831_v16  ;;  %5439 = vtanh.f32 %v7429_v11  ;;  %v7457_v59 = vmul.f32 0.5, %v2264_v35 }
 0x2e1   : > { %v7448_v23 = vpop.eup %5423  ;;  %v2265_v37 = vmul.f32 %v2233_v34, %v2169_v27  ;;  %5441 = vrsqrt.f32 %v2006_v38  ;;  %v2007_v49 = vadd.f32 1e-05, %v1975_v46  ;;  %v1800_v33 = vmul.f32 0.015625, %v1767_v54  ;;  %p6094_p4 = pnand %p6093_p7, %p6087_p1 }
 0x2e2   : > { %9087 = vst [vmem:[#allocation16_spill] sm:$0xff] %v7442_v13  ;;  %1958 = vadd.xlane.f32.xlu0 %v1898_v32  ;;  %v1769_v62 = vpop.xlane.xlu1 %1768  ;;  %v1899_v53 = vmul.f32 %v7442_v13, %v7442_v13  ;;  %v7453_v56 = vmul.f32 0.5, %v7448_v23  ;;  %v2615_v41 = vmul.f32 %v7448_v23, %v7448_v23  ;;  %v7462_v51 = vmul.f32 %v7448_v23, %v7437_v28 }
 0x2e3   : > { %v5426_v3 = vpop.eup %5425  ;;  %5443 = vtanh.f32 %v2265_v37  ;;  %v1832_v27 = vsub.f32 %v7253_v52, %v1800_v33  ;;  %v1801_v1 = vmul.f32 0.015625, %v1769_v62  ;;  %v7467_v7 = vmul.f32 0.5, %v2265_v37 }
 0x2e4   : > { %v5428_v29 = vpop.eup %5427  ;;  %v2234_v26 = vadd.f32 1.0, %v5426_v3  ;;  %5445 = vrsqrt.f32 %v2007_v49  ;;  %1960 = vadd.xlane.f32.xlu1 %v1899_v53  ;;  %v7465_v0 = vsub.f32 %v2615_v41, %v7446_v40 }
 0x2e5   : > { %v7469_v63 = vpop.eup %5429  ;;  %v2068_v19 = vmul.f32 %v5428_v29, %v7251_v6  ;;  %v1833_v52 = vsub.f32 %v7260_v60, %v1801_v1  ;;  %v1923_v35 = vpop.xlane.xlu0 %1922  ;;  %v7474_v16 = vmul.f32 %v7185_v20, %v1832_v27  ;;  %5447 = vtanh.f32 %v7453_v56 }
 0x2e6   : > { %v5432_v58 = vpop.eup %5431  ;;  %v7478_v21 = vmul.f32 %v2234_v26, %v7417_v2  ;;  %v1976_v5 = vmul.f32 0.015625, %v1923_v35  ;;  %v7481_v34 = vmul.f32 0.5, %v7469_v63  ;;  %v2616_v38 = vmul.f32 %v7469_v63, %v7469_v63 }
 0x2e7   : > { %9088 = vst [vmem:[#allocation17_spill] sm:$0xff] %v7474_v16  ;;  %v5434_v6 = vpop.eup %5433  ;;  %v2235_v46 = vadd.f32 1.0, %v5432_v58  ;;  %v2104_v60 = vmul.f32 %v7365_v30, %v2068_v19  ;;  %v1925_v54 = vpop.xlane.xlu1 %1924  ;;  %v1900_v32 = vmul.f32 %v7474_v16, %v7474_v16  ;;  %v7489_v37 = vmul.f32 %v7185_v20, %v1833_v52 }
 0x2e8   : > { %v5436_v2 = vpop.eup %5435  ;;  %5449 = vtanh.f32 %v7478_v21  ;;  %v2069_v49 = vmul.f32 %v5434_v6, %v7258_v43  ;;  %v2008_v33 = vadd.f32 1e-05, %v1976_v5  ;;  %v1977_v62 = vmul.f32 0.015625, %v1925_v54 }
 0x2e9   : > { %9089 = vst [vmem:[#allocation18_spill] sm:$0xff] %v7489_v37  ;;  %v7493_v53 = vpop.eup %5437  ;;  %v7496_v41 = vmul.f32 %v2235_v46, %v7423_v25  ;;  %v2140_v3 = vadd.f32 %v7374_v4, %v2104_v60  ;;  %1962 = vadd.xlane.f32.xlu0 %v1900_v32  ;;  %v1901_v27 = vmul.f32 %v7489_v37, %v7489_v37  ;;  %5451 = vtanh.f32 %v7481_v34 }
 0x2ea   : > { %v5440_v20 = vpop.eup %5439  ;;  %v2105_v1 = vmul.f32 %v7365_v30, %v2069_v49  ;;  %5453 = vrsqrt.f32 %v2008_v33  ;;  %v2009_v43 = vadd.f32 1e-05, %v1977_v62  ;;  %v2358_v29 = vadd.f32 1.0, %v5436_v2 }
 0x2eb   : > { %v5442_v26 = vpop.eup %5441  ;;  %5455 = vtanh.f32 %v7496_v41  ;;  %v7504_v19 = vmul.f32 0.5, %v2140_v3  ;;  %1964 = vadd.xlane.f32.xlu1 %v1901_v27  ;;  %v2359_v25 = vadd.f32 1.0, %v5440_v20  ;;  %v7507_v52 = vmul.f32 0.5, %v7493_v53 }
 0x2ec   : > { %v2141_v35 = vadd.f32 %v7374_v4, %v2105_v1  ;;  %v2070_v58 = vmul.f32 %v5442_v26, %v7268_v17  ;;  %5457 = vrsqrt.f32 %v2009_v43  ;;  %v7512_v5 = vmul.f32 %v2358_v29, %v7425_v8 }
 0x2ed   : > { %v7514_v6 = vpop.eup %5443  ;;  %5459 = vtanh.f32 %v7504_v19  ;;  %v7518_v46 = vmul.f32 %v2359_v25, %v7429_v11  ;;  %v2649_v60 = vsub.f32 %v2616_v38, %v7446_v40  ;;  %v7522_v54 = vmul.f32 0.5, %v7465_v0 }
 0x2ee   : > { %v5446_v32 = vpop.eup %5445  ;;  %v7524_v2 = vmul.f32 0.5, %v2141_v35  ;;  %v2106_v17 = vmul.f32 %v7365_v30, %v2070_v58  ;;  %v7528_v8 = vmul.f32 0.5, %v7514_v6  ;;  %5461 = vtanh.f32 %v7507_v52 }
 0x2ef   : > { %v5448_v49 = vpop.eup %5447  ;;  %v2071_v33 = vmul.f32 %v5446_v32, %v7274_v10  ;;  %v7534_v38 = vmul.f32 0.5, %v2649_v60  ;;  %5463 = vtanh.f32 %v7522_v54  ;;  %v2825_v27 = vmul.f32 %v7448_v23, %v7465_v0 }
 0x2f0   : > { %5465 = vtanh.f32 %v7524_v2  ;;  %v2142_v62 = vadd.f32 %v7374_v4, %v2106_v17  ;;  %v2534_v3 = vadd.f32 1.0, %v5448_v49  ;;  %v2826_v10 = vmul.f32 %v7469_v63, %v2649_v60 }
 0x2f1   : > { %v2107_v20 = vmul.f32 %v7365_v30, %v2071_v33  ;;  %5467 = vtanh.f32 %v7528_v8  ;;  %v2859_v1 = vmul.f32 %v7469_v63, %v7437_v28  ;;  %v2890_v25 = vsub.f32 %v2825_v27, %v7462_v51 }
 0x2f2   : > { %v7546_v43 = vpop.eup %5449  ;;  %v7548_v29 = vmul.f32 0.5, %v2142_v62  ;;  %v2566_v26 = vmul.f32 %v2534_v3, %v7453_v56  ;;  %5469 = vtanh.f32 %v7534_v38  ;;  %v2617_v56 = vmul.f32 %v7493_v53, %v7493_v53 }
 0x2f3   : > { %v5452_v23 = vpop.eup %5451  ;;  %v2143_v0 = vadd.f32 %v7374_v4, %v2107_v20  ;;  %v2891_v35 = vsub.f32 %v2826_v10, %v2859_v1  ;;  %5471 = vtanh.f32 %v7457_v59  ;;  %v7556_v58 = vmul.f32 0.5, %v7546_v43 }
 0x2f4   : > { %v5454_v63 = vpop.eup %5453  ;;  %5473 = vtanh.f32 %v7548_v29  ;;  %v2535_v60 = vadd.f32 1.0, %v5452_v23  ;;  %v7559_v32 = vmul.f32 0.5, %v2890_v25  ;;  %v2618_v20 = vmul.f32 %v7514_v6, %v7514_v6 }
 0x2f5   : > { %v7563_v17 = vpop.eup %5455  ;;  %v7565_v51 = vmul.f32 0.5, %v2143_v0  ;;  %v2072_v49 = vmul.f32 %v5454_v63, %v7282_v42  ;;  %v7568_v33 = vmul.f32 0.5, %v2891_v35  ;;  %5475 = vtanh.f32 %v7467_v7 }
 0x2f6   : > { %v5458_v62 = vpop.eup %5457  ;;  %v2567_v3 = vmul.f32 %v2535_v60, %v7481_v34  ;;  %5477 = vtanh.f32 %v7559_v32  ;;  %v7574_v27 = vmul.f32 0.5, %v7563_v17  ;;  %v7582_v25 = vsub.f32 %v2617_v56, %v7446_v40 }
 0x2f7   : > { %v5460_v10 = vpop.eup %5459  ;;  %5479 = vtanh.f32 %v7565_v51  ;;  %v2108_v42 = vmul.f32 %v7365_v30, %v2072_v49  ;;  %v2073_v1 = vmul.f32 %v5458_v62, %v7288_v15  ;;  %v7586_v63 = vsub.f32 %v2618_v20, %v7446_v40 }
 0x2f8   : > { %v5462_v23 = vpop.eup %5461  ;;  %v2236_v34 = vadd.f32 1.0, %v5460_v10  ;;  %v1927_v0 = vpop.xlane.xlu0 %1926  ;;  %v2598_v35 = vpack.c.bf16 %v2567_v3, %v2566_v26  ;;  %5481 = vtanh.f32 %v7568_v33  ;;  %v7596_v26 = vmul.f32 %v7493_v53, %v7582_v25 }
 0x2f9   : > { %v5464_v60 = vpop.eup %5463  ;;  %v2144_v11 = vadd.f32 %v7374_v4, %v2108_v42  ;;  %v2109_v37 = vmul.f32 %v7365_v30, %v2073_v1  ;;  %v1978_v49 = vmul.f32 0.015625, %v1927_v0  ;;  %v2536_v16 = vadd.f32 1.0, %v5462_v23 }
 0x2fa   : > { %v5466_v15 = vpop.eup %5465  ;;  %v7591_v56 = vmul.f32 %v2236_v34, %v7504_v19  ;;  %v1929_v62 = vpop.xlane.xlu1 %1928  ;;  %3359 = vmatprep.mubr.bf16.mxu0 %v2598_v35  ;;  %v2744_v10 = vadd.f32 1.0, %v5464_v60  ;;  %5483 = vtanh.f32 %v7556_v58  ;;  %v9090_v19 = vpack.c.bf16 %v7518_v46, %v7512_v5 }
 0x2fb   : > { %v5468_v3 = vpop.eup %5467  ;;  %v2237_v20 = vadd.f32 1.0, %v5466_v15  ;;  %v7598_v42 = vmul.f32 0.5, %v2144_v11  ;;  %v2145_v1 = vadd.f32 %v7374_v4, %v2109_v37  ;;  %v2010_v23 = vadd.f32 1e-05, %v1978_v49 }
 0x2fc   : > { %3360 = vmatmul.mubr.bf16.vlgmr.msra.gmra.mrb[64].mxu0 %v9090_v19  ;;  %v5470_v34 = vpop.eup %5469  ;;  %5485 = vtanh.f32 %v7591_v56  ;;  %v1979_v0 = vmul.f32 0.015625, %v1929_v62  ;;  %v2537_v35 = vadd.f32 1.0, %v5468_v3  ;;  %v2568_v60 = vmul.f32 %v2536_v16, %v7507_v52 }
 0x2fd   : > { %v5472_v13 = vpop.eup %5471  ;;  %v7607_v22 = vmul.f32 %v2237_v20, %v7524_v2  ;;  %5487 = vtanh.f32 %v7598_v42  ;;  %v7610_v11 = vmul.f32 0.5, %v2145_v1  ;;  %v2745_v37 = vadd.f32 1.0, %v5470_v34 }
 0x2fe   : > { %v5474_v49 = vpop.eup %5473  ;;  %5489 = vrsqrt.f32 %v2010_v23  ;;  %v2011_v5 = vadd.f32 1e-05, %v1979_v0  ;;  %v2569_v46 = vmul.f32 %v2537_v35, %v7528_v8  ;;  %v2360_v15 = vadd.f32 1.0, %v5472_v13 }
 0x2ff   : > { %v5476_v19 = vpop.eup %5475  ;;  %5491 = vtanh.f32 %v7607_v22  ;;  %v2238_v62 = vadd.f32 1.0, %v5474_v49  ;;  %v2776_v16 = vmul.f32 %v2744_v10, %v7522_v54  ;;  %v2777_v52 = vmul.f32 %v2745_v37, %v7534_v38 }
 0x300   : > { %v5478_v2 = vpop.eup %5477  ;;  %5493 = vtanh.f32 %v7610_v11  ;;  %v2599_v3 = vpack.c.bf16 %v2569_v46, %v2568_v60  ;;  %v2361_v20 = vadd.f32 1.0, %v5476_v19  ;;  %v2392_v1 = vmul.f32 %v2360_v15, %v7457_v59 }
 0x301   : > { %v5480_v23 = vpop.eup %5479  ;;  %v7619_v34 = vmul.f32 %v2238_v62, %v7548_v29  ;;  %5495 = vrsqrt.f32 %v2011_v5  ;;  %v1931_v13 = vpop.xlane.xlu0 %1930  ;;  %v2986_v8 = vadd.f32 1.0, %v5478_v2  ;;  %v2808_v0 = vpack.c.bf16 %v2777_v52, %v2776_v16 }
 0x302   : > { %v5482_v35 = vpop.eup %5481  ;;  %v2239_v49 = vadd.f32 1.0, %v5480_v23  ;;  %v1980_v54 = vmul.f32 0.015625, %v1931_v13  ;;  %3367 = vmatprep.mubr.bf16.mxu0 %v2599_v3  ;;  %v2393_v38 = vmul.f32 %v2361_v20, %v7467_v7  ;;  %5497 = vtanh.f32 %v7574_v27 }
 0x303   : > { %5499 = vtanh.f32 %v7619_v34  ;;  %v1933_v10 = vpop.xlane.xlu1 %1932  ;;  %v2987_v59 = vadd.f32 1.0, %v5482_v35  ;;  %v3018_v60 = vmul.f32 %v2986_v8, %v7559_v32  ;;  %v2828_v29 = vmul.f32 %v7514_v6, %v7586_v63 }
 0x304   : > { %v5484_v37 = vpop.eup %5483  ;;  %v7628_v5 = vmul.f32 %v2239_v49, %v7565_v51  ;;  %v2012_v46 = vadd.f32 1e-05, %v1980_v54  ;;  %v1981_v15 = vmul.f32 0.015625, %v1933_v10  ;;  %v2423_v19 = vpack.c.bf16 %v2393_v38, %v2392_v1 }
 0x305   : > { %v3019_v7 = vmul.f32 %v2987_v59, %v7568_v33  ;;  %v2538_v62 = vadd.f32 1.0, %v5484_v37  ;;  %v2860_v16 = vmul.f32 %v7493_v53, %v7437_v28  ;;  %v2861_v52 = vmul.f32 %v7514_v6, %v7437_v28 }
 0x306   : > { %v7635_v32 = vpop.eup %5485  ;;  %5501 = vtanh.f32 %v7628_v5  ;;  %v2013_v2 = vadd.f32 1e-05, %v1981_v15  ;;  %3368 = vmatmul.mubr.bf16.gmra.mrb[68].mxu0 %v2423_v19  ;;  %v7639_v51 = vmul.f32 0.5, %v7478_v21  ;;  %v7642_v3 = vmul.f32 0.5, %v7496_v41 }
 0x307   : > { %v5488_v33 = vpop.eup %5487  ;;  %5503 = vrsqrt.f32 %v2012_v46  ;;  %v3050_v20 = vpack.c.bf16 %v3019_v7, %v3018_v60  ;;  %v7645_v53 = vmul.f32 %v2538_v62, %v7556_v58  ;;  %v2892_v6 = vsub.f32 %v7596_v26, %v2860_v16 }
 0x308   : > { %v5490_v1 = vpop.eup %5489  ;;  %v2240_v23 = vadd.f32 1.0, %v5488_v33  ;;  %5505 = vrsqrt.f32 %v2013_v2  ;;  %v2893_v13 = vsub.f32 %v2828_v29, %v2861_v52  ;;  %v7649_v8 = vmul.f32 0.5, %v7582_v25 }
 0x309   : > { %v7651_v21 = vpop.eup %5491  ;;  %v2074_v41 = vmul.f32 %v5490_v1, %v7295_v61  ;;  %3520 = vmatprep.mubr.bf16.mxu1 %v3050_v20  ;;  %v7654_v35 = vmul.f32 0.5, %v2892_v6  ;;  %5507 = vtanh.f32 %v7639_v51  ;;  %v7658_v58 = vmul.f32 0.5, %v7586_v63 }
 0x30a   : > { %v5494_v26 = vpop.eup %5493  ;;  %v7661_v49 = vmul.f32 %v2240_v23, %v7598_v42  ;;  %3521 = vmatmul.mubr.bf16.vlgmr.msra.gmra.mrb[64].mxu1 %v2808_v0  ;;  %v7663_v54 = vmul.f32 0.5, %v2893_v13  ;;  %5509 = vtanh.f32 %v7642_v3  ;;  %v7667_v25 = vmul.f32 0.5, %v7635_v32 }
 0x30b   : > { %v5496_v61 = vpop.eup %5495  ;;  %v2241_v38 = vadd.f32 1.0, %v5494_v26  ;;  %v2110_v10 = vmul.f32 %v7365_v30, %v2074_v41  ;;  %5511 = vtanh.f32 %v7654_v35  ;;  %v7672_v63 = vmul.f32 0.5, %v7651_v21 }
 0x30c   : > { %v5498_v59 = vpop.eup %5497  ;;  %5513 = vtanh.f32 %v7661_v49  ;;  %v2075_v42 = vmul.f32 %v5496_v61, %v7300_v9  ;;  %v2619_v0 = vmul.f32 %v7546_v43, %v7546_v43  ;;  %v2620_v60 = vmul.f32 %v7563_v17, %v7563_v17 }
 0x30d   : > { %v7680_v29 = vpop.eup %5499  ;;  %v7683_v37 = vmul.f32 %v2241_v38, %v7610_v11  ;;  %v2146_v46 = vadd.f32 %v7374_v4, %v2110_v10  ;;  %v2539_v15 = vadd.f32 1.0, %v5498_v59  ;;  %5515 = vtanh.f32 %v7663_v54 }
 0x30e   : > { %v2111_v19 = vmul.f32 %v7365_v30, %v2075_v42  ;;  %5517 = vtanh.f32 %v7649_v8  ;;  %v7690_v9 = vsub.f32 %v2619_v0, %v7446_v40  ;;  %v7693_v7 = vsub.f32 %v2620_v60, %v7446_v40 }
 0x30f   : > { %5519 = vtanh.f32 %v7683_v37  ;;  %v7696_v62 = vmul.f32 0.5, %v2146_v46  ;;  %v2571_v11 = vmul.f32 %v2539_v15, %v7574_v27  ;;  %v2862_v16 = vmul.f32 %v7546_v43, %v7437_v28  ;;  %v1935_v33 = vpop.xlane.xlu0 %1934 }
 0x310   : > { %v7701_v52 = vpop.eup %5501  ;;  %v2147_v2 = vadd.f32 %v7374_v4, %v2111_v19  ;;  %5521 = vtanh.f32 %v7658_v58  ;;  %v2829_v20 = vmul.f32 %v7546_v43, %v7690_v9  ;;  %v2830_v6 = vmul.f32 %v7563_v17, %v7693_v7 }
 0x311   : > { %v5504_v1 = vpop.eup %5503  ;;  %5523 = vtanh.f32 %v7696_v62  ;;  %v1982_v27 = vmul.f32 0.015625, %v1935_v33  ;;  %v2600_v23 = vpack.c.bf16 %v2571_v11, %v7645_v53  ;;  %v2863_v13 = vmul.f32 %v7563_v17, %v7437_v28  ;;  %v1937_v38 = vpop.xlane.xlu1 %1936 }
 0x312   : > { %v5506_v41 = vpop.eup %5505  ;;  %v7713_v26 = vmul.f32 0.5, %v2147_v2  ;;  %v2076_v61 = vmul.f32 %v5504_v1, %v7307_v55  ;;  %5525 = vtanh.f32 %v7667_v25  ;;  %v2894_v43 = vsub.f32 %v2829_v20, %v2862_v16 }
 0x313   : > { %v5508_v10 = vpop.eup %5507  ;;  %v2077_v59 = vmul.f32 %v5506_v41, %v7312_v47  ;;  %v2014_v42 = vadd.f32 1e-05, %v1982_v27  ;;  %v1983_v0 = vmul.f32 0.015625, %v1937_v38  ;;  %3375 = vmatprep.mubr.bf16.mxu0 %v2600_v23  ;;  %5527 = vtanh.f32 %v7672_v63 }
 0x314   : > { %v5510_v53 = vpop.eup %5509  ;;  %5529 = vtanh.f32 %v7713_v26  ;;  %v2112_v17 = vmul.f32 %v7365_v30, %v2076_v61  ;;  %v2362_v60 = vadd.f32 1.0, %v5508_v10  ;;  %v2895_v46 = vsub.f32 %v2830_v6, %v2863_v13 }
 0x315   : > { %v5512_v55 = vpop.eup %5511  ;;  %v2113_v15 = vmul.f32 %v7365_v30, %v2077_v59  ;;  %5531 = vrsqrt.f32 %v2014_v42  ;;  %v2015_v19 = vadd.f32 1e-05, %v1983_v0  ;;  %v2363_v11 = vadd.f32 1.0, %v5510_v53 }
 0x316   : > { %v7722_v16 = vpop.eup %5513  ;;  %v2148_v47 = vadd.f32 %v7374_v4, %v2112_v17  ;;  %v2988_v2 = vadd.f32 1.0, %v5512_v55  ;;  %v2394_v33 = vmul.f32 %v2362_v60, %v7639_v51  ;;  %v7726_v20 = vmul.f32 0.5, %v2894_v43 }
 0x317   : > { %v5516_v1 = vpop.eup %5515  ;;  %v2149_v27 = vadd.f32 %v7374_v4, %v2113_v15  ;;  %5533 = vrsqrt.f32 %v2015_v19  ;;  %v2395_v6 = vmul.f32 %v2363_v11, %v7642_v3  ;;  %v7730_v23 = vmul.f32 0.5, %v2895_v46 }
 0x318   : > { %v5518_v13 = vpop.eup %5517  ;;  %v7732_v41 = vmul.f32 0.5, %v2148_v47  ;;  %v2989_v61 = vadd.f32 1.0, %v5516_v1  ;;  %v3020_v38 = vmul.f32 %v2988_v2, %v7654_v35  ;;  %5535 = vtanh.f32 %v7726_v20 }
 0x319   : > { %v7736_v10 = vpop.eup %5519  ;;  %v7738_v51 = vmul.f32 0.5, %v2149_v27  ;;  %v2424_v43 = vpack.c.bf16 %v2395_v6, %v2394_v33  ;;  %v2746_v59 = vadd.f32 1.0, %v5518_v13  ;;  %5537 = vtanh.f32 %v7730_v23 }
 0x31a   : > { %v5522_v42 = vpop.eup %5521  ;;  %5539 = vtanh.f32 %v7732_v41  ;;  %v3021_v3 = vmul.f32 %v2989_v61, %v7663_v54  ;;  %v7744_v0 = vmul.f32 0.5, %v7591_v56  ;;  %v7747_v35 = vmul.f32 0.5, %v7607_v22 }
 0x31b   : > { %v5524_v53 = vpop.eup %5523  ;;  %5541 = vtanh.f32 %v7738_v51  ;;  %3376 = vmatmul.mubr.bf16.gmra.mrb[72].mxu0 %v2424_v43  ;;  %v2747_v17 = vadd.f32 1.0, %v5522_v42  ;;  %v2778_v60 = vmul.f32 %v2746_v59, %v7649_v8  ;;  %v7752_v46 = vmul.f32 0.5, %v7690_v9  ;;  %v1939_v19 = vpop.xlane.xlu0 %1938 }
 0x31c   : > { %v5526_v55 = vpop.eup %5525  ;;  %v2242_v15 = vadd.f32 1.0, %v5524_v53  ;;  %v3051_v54 = vpack.c.bf16 %v3021_v3, %v3020_v38  ;;  %5543 = vtanh.f32 %v7744_v0  ;;  %v7756_v56 = vmul.f32 0.5, %v7693_v7 }
 0x31d   : > { %v5528_v22 = vpop.eup %5527  ;;  %v1984_v11 = vmul.f32 0.015625, %v1939_v19  ;;  %v2779_v47 = vmul.f32 %v2747_v17, %v7658_v58  ;;  %v2540_v2 = vadd.f32 1.0, %v5526_v55  ;;  %5545 = vtanh.f32 %v7747_v35  ;;  %v1941_v33 = vpop.xlane.xlu1 %1940 }
 0x31e   : > { %v5530_v8 = vpop.eup %5529  ;;  %v7761_v9 = vmul.f32 %v2242_v15, %v7696_v62  ;;  %3528 = vmatprep.mubr.bf16.mxu1 %v3051_v54  ;;  %v2541_v1 = vadd.f32 1.0, %v5528_v22  ;;  %5547 = vtanh.f32 %v7752_v46  ;;  %v7765_v27 = vmul.f32 0.5, %v7680_v29 }
 0x31f   : > { %v5532_v7 = vpop.eup %5531  ;;  %v2243_v6 = vadd.f32 1.0, %v5530_v8  ;;  %v2016_v13 = vadd.f32 1e-05, %v1984_v11  ;;  %v1985_v61 = vmul.f32 0.015625, %v1941_v33  ;;  %v2809_v58 = vpack.c.bf16 %v2779_v47, %v2778_v60 }
 0x320   : > { %5549 = vtanh.f32 %v7761_v9  ;;  %v2078_v38 = vmul.f32 %v5532_v7, %v7319_v45  ;;  %v2572_v62 = vmul.f32 %v2540_v2, %v7667_v25  ;;  %v2573_v43 = vmul.f32 %v2541_v1, %v7672_v63 }
 0x321   : > { %v5534_v59 = vpop.eup %5533  ;;  %v7772_v42 = vmul.f32 %v2243_v6, %v7713_v26  ;;  %5551 = vrsqrt.f32 %v2016_v13  ;;  %v2017_v3 = vadd.f32 1e-05, %v1985_v61  ;;  %3529 = vmatmul.mubr.bf16.gmra.mrb[68].mxu1 %v2809_v58  ;;  %v7775_v53 = vmul.f32 0.5, %v7701_v52 }
 0x322   : > { %v5536_v17 = vpop.eup %5535  ;;  %v2114_v60 = vmul.f32 %v7365_v30, %v2078_v38  ;;  %v2079_v55 = vmul.f32 %v5534_v59, %v7324_v14  ;;  %v2601_v45 = vpack.c.bf16 %v2573_v43, %v2572_v62  ;;  %5553 = vtanh.f32 %v7756_v56 }
 0x323   : > { %v5538_v25 = vpop.eup %5537  ;;  %5555 = vtanh.f32 %v7772_v42  ;;  %v2990_v63 = vadd.f32 1.0, %v5536_v17  ;;  %v2621_v26 = vmul.f32 %v7635_v32, %v7635_v32  ;;  %v2622_v15 = vmul.f32 %v7651_v21, %v7651_v21  ;;  %v1943_v2 = vpop.xlane.xlu0 %1942 }
 0x324   : > { %v5540_v19 = vpop.eup %5539  ;;  %v2150_v54 = vadd.f32 %v7374_v4, %v2114_v60  ;;  %v2115_v22 = vmul.f32 %v7365_v30, %v2079_v55  ;;  %5557 = vrsqrt.f32 %v2017_v3  ;;  %3383 = vmatprep.mubr.bf16.mxu0 %v2601_v45  ;;  %v2991_v14 = vadd.f32 1.0, %v5538_v25 }
 0x325   : > { %v5542_v11 = vpop.eup %5541  ;;  %v2244_v47 = vadd.f32 1.0, %v5540_v19  ;;  %v3022_v8 = vmul.f32 %v2990_v63, %v7726_v20  ;;  %5559 = vtanh.f32 %v7765_v27  ;;  %v2654_v33 = vsub.f32 %v2621_v26, %v7446_v40  ;;  %v1945_v38 = vpop.xlane.xlu1 %1944 }
 0x326   : > { %v5544_v1 = vpop.eup %5543  ;;  %v2245_v7 = vadd.f32 1.0, %v5542_v11  ;;  %v7790_v6 = vmul.f32 0.5, %v2150_v54  ;;  %v2151_v13 = vadd.f32 %v7374_v4, %v2115_v22  ;;  %v1986_v61 = vmul.f32 0.015625, %v1943_v2 }
 0x327   : > { %v5546_v30 = vpop.eup %5545  ;;  %v7794_v58 = vmul.f32 %v2244_v47, %v7732_v41  ;;  %v3023_v62 = vmul.f32 %v2991_v14, %v7730_v23  ;;  %v2364_v43 = vadd.f32 1.0, %v5544_v1  ;;  %5561 = vtanh.f32 %v7775_v53 }
 0x328   : > { %v5548_v20 = vpop.eup %5547  ;;  %v7799_v59 = vmul.f32 %v2245_v7, %v7738_v51  ;;  %5563 = vtanh.f32 %v7790_v6  ;;  %v7802_v3 = vmul.f32 0.5, %v2151_v13  ;;  %v2018_v4 = vadd.f32 1e-05, %v1986_v61 }
 0x329   : > { %5565 = vtanh.f32 %v7794_v58  ;;  %v1987_v17 = vmul.f32 0.015625, %v1945_v38  ;;  %v3052_v41 = vpack.c.bf16 %v3023_v62, %v3022_v8  ;;  %v2365_v60 = vadd.f32 1.0, %v5546_v30  ;;  %v7841_v62 = vld [vmem:[%s9061_s3 + $0x2] ss:$0 sm:$0xff] }
 0x32a   : > { %v7805_v55 = vpop.eup %5549  ;;  %5567 = vtanh.f32 %v7799_v59  ;;  %v2396_v23 = vmul.f32 %v2364_v43, %v7744_v0  ;;  %v2748_v45 = vadd.f32 1.0, %v5548_v20  ;;  %v2655_v51 = vsub.f32 %v2622_v15, %v7446_v40 }
 0x32b   : > { %v5552_v25 = vpop.eup %5551  ;;  %5569 = vtanh.f32 %v7802_v3  ;;  %v2019_v63 = vadd.f32 1e-05, %v1987_v17  ;;  %3536 = vmatprep.mubr.bf16.mxu1 %v3052_v41  ;;  %v2397_v26 = vmul.f32 %v2365_v60, %v7747_v35  ;;  %v2831_v19 = vmul.f32 %v7635_v32, %v2654_v33  ;;  %v7823_v35 = vld [vmem:[%s9061_s3 + $0x1] ss:$0 sm:$0xff] }
 0x32c   : > { %v5554_v54 = vpop.eup %5553  ;;  %v2080_v22 = vmul.f32 %v5552_v25, %v7331_v12  ;;  %5571 = vrsqrt.f32 %v2018_v4  ;;  %v2780_v14 = vmul.f32 %v2748_v45, %v7752_v46  ;;  %v2832_v0 = vmul.f32 %v7651_v21, %v2655_v51 }
 0x32d   : > { %v7816_v11 = vpop.eup %5555  ;;  %5573 = vrsqrt.f32 %v2019_v63  ;;  %v2425_v15 = vpack.c.bf16 %v2397_v26, %v2396_v23  ;;  %v2749_v47 = vadd.f32 1.0, %v5554_v54  ;;  %v2864_v2 = vmul.f32 %v7635_v32, %v7437_v28 }
 0x32e   : > { %v5558_v8 = vpop.eup %5557  ;;  %v2116_v12 = vmul.f32 %v7823_v35, %v2080_v22  ;;  %v2865_v46 = vmul.f32 %v7651_v21, %v7437_v28  ;;  %v7829_v1 = vmul.f32 0.5, %v7619_v34  ;;  %v7832_v7 = vmul.f32 0.5, %v7628_v5 }
 0x32f   : > { %v5560_v13 = vpop.eup %5559  ;;  %v2081_v32 = vmul.f32 %v5558_v8, %v7336_v31  ;;  %3384 = vmatmul.mubr.bf16.gmra.mrb[76].mxu0 %v2425_v15  ;;  %v2781_v61 = vmul.f32 %v2749_v47, %v7756_v56  ;;  %v2896_v30 = vsub.f32 %v2831_v19, %v2864_v2  ;;  %v7836_v38 = vmul.f32 0.5, %v2654_v33 }
 0x330   : > { %v2152_v34 = vadd.f32 %v7841_v62, %v2116_v12  ;;  %v2542_v21 = vadd.f32 1.0, %v5560_v13  ;;  %v2897_v43 = vsub.f32 %v2832_v0, %v2865_v46  ;;  %5575 = vtanh.f32 %v7829_v1 }
 0x331   : > { %v5562_v5 = vpop.eup %5561  ;;  %v2117_v31 = vmul.f32 %v7823_v35, %v2081_v32  ;;  %v2810_v20 = vpack.c.bf16 %v2781_v61, %v2780_v14  ;;  %v7846_v4 = vmul.f32 0.5, %v2896_v30  ;;  %5577 = vtanh.f32 %v7832_v7 }
 0x332   : > { %v5564_v56 = vpop.eup %5563  ;;  %v7849_v33 = vmul.f32 0.5, %v2152_v34  ;;  %v2543_v17 = vadd.f32 1.0, %v5562_v5  ;;  %v2574_v41 = vmul.f32 %v2542_v21, %v7765_v27  ;;  %v7852_v60 = vmul.f32 0.5, %v2897_v43 }
 0x333   : > { %v7854_v23 = vpop.eup %5565  ;;  %v2246_v45 = vadd.f32 1.0, %v5564_v56  ;;  %v2153_v25 = vadd.f32 %v7841_v62, %v2117_v31  ;;  %3537 = vmatmul.mubr.bf16.gmra.mrb[72].mxu1 %v2810_v20  ;;  %5579 = vtanh.f32 %v7846_v4  ;;  %v7858_v63 = vmul.f32 0.5, %v2655_v51 }
 0x334   : > { %v7860_v26 = vpop.eup %5567  ;;  %5581 = vtanh.f32 %v7849_v33  ;;  %v2575_v19 = vmul.f32 %v2543_v17, %v7775_v53  ;;  %v7865_v27 = vmul.f32 0.5, %v7722_v16  ;;  %v7868_v54 = vmul.f32 0.5, %v7736_v10 }
 0x335   : > { %v5570_v22 = vpop.eup %5569  ;;  %v7871_v14 = vmul.f32 %v2246_v45, %v7790_v6  ;;  %v7873_v0 = vmul.f32 0.5, %v2153_v25  ;;  %5583 = vtanh.f32 %v7852_v60  ;;  %v2623_v51 = vmul.f32 %v7680_v29, %v7680_v29 }
 0x336   : > { %v5572_v15 = vpop.eup %5571  ;;  %v2247_v47 = vadd.f32 1.0, %v5570_v22  ;;  %v2602_v53 = vpack.c.bf16 %v2575_v19, %v2574_v41  ;;  %5585 = vtanh.f32 %v7836_v38  ;;  %v2624_v2 = vmul.f32 %v7701_v52, %v7701_v52 }
 0x337   : > { %v5574_v8 = vpop.eup %5573  ;;  %5587 = vtanh.f32 %v7871_v14  ;;  %v2082_v6 = vmul.f32 %v5572_v15, %v7343_v50  ;;  %v2656_v12 = vsub.f32 %v2623_v51, %v7446_v40  ;;  %v2866_v46 = vmul.f32 %v7680_v29, %v7437_v28 }
 0x338   : > { %v7887_v13 = vmul.f32 %v2247_v47, %v7802_v3  ;;  %5589 = vtanh.f32 %v7873_v0  ;;  %v2083_v32 = vmul.f32 %v5574_v8, %v7348_v57  ;;  %3391 = vmatprep.mubr.bf16.mxu0 %v2602_v53  ;;  %v2657_v61 = vsub.f32 %v2624_v2, %v7446_v40 }
 0x339   : > { %v2118_v30 = vmul.f32 %v7823_v35, %v2082_v6  ;;  %5591 = vtanh.f32 %v7858_v63  ;;  %v2833_v50 = vmul.f32 %v7680_v29, %v2656_v12  ;;  %v2867_v34 = vmul.f32 %v7701_v52, %v7437_v28 }
 0x33a   : > { %v5576_v21 = vpop.eup %5575  ;;  %5593 = vtanh.f32 %v7887_v13  ;;  %v2119_v3 = vmul.f32 %v7823_v35, %v2083_v32  ;;  %v2834_v43 = vmul.f32 %v7701_v52, %v2657_v61  ;;  %v7901_v57 = vmul.f32 0.5, %v7661_v49 }
 0x33b   : > { %v5578_v5 = vpop.eup %5577  ;;  %v2154_v31 = vadd.f32 %v7841_v62, %v2118_v30  ;;  %v2366_v20 = vadd.f32 1.0, %v5576_v21  ;;  %5595 = vtanh.f32 %v7865_v27  ;;  %v2898_v29 = vsub.f32 %v2833_v50, %v2866_v46 }
 0x33c   : > { %v2155_v56 = vadd.f32 %v7841_v62, %v2119_v3  ;;  %v2367_v17 = vadd.f32 1.0, %v5578_v5  ;;  %5597 = vtanh.f32 %v7868_v54  ;;  %v2899_v41 = vsub.f32 %v2834_v43, %v2867_v34 }
 0x33d   : > { %v5580_v45 = vpop.eup %5579  ;;  %v7907_v25 = vmul.f32 0.5, %v2154_v31  ;;  %v2398_v52 = vmul.f32 %v2366_v20, %v7829_v1  ;;  %v7910_v49 = vmul.f32 0.5, %v2898_v29  ;;  %v7913_v19 = vmul.f32 0.5, %v7683_v37 }
 0x33e   : > { %v5582_v22 = vpop.eup %5581  ;;  %v7915_v51 = vmul.f32 0.5, %v2155_v56  ;;  %v2992_v15 = vadd.f32 1.0, %v5580_v45  ;;  %v2399_v47 = vmul.f32 %v2367_v17, %v7832_v7  ;;  %v7918_v53 = vmul.f32 0.5, %v2899_v41 }
 0x33f   : > { %v5584_v2 = vpop.eup %5583  ;;  %v2248_v8 = vadd.f32 1.0, %v5582_v22  ;;  %5599 = vtanh.f32 %v7907_v25  ;;  %v7921_v6 = vmul.f32 0.5, %v2656_v12  ;;  %v7923_v1 = vmul.f32 0.5, %v2657_v61 }
 0x340   : > { %v5586_v46 = vpop.eup %5585  ;;  %5601 = vtanh.f32 %v7915_v51  ;;  %v2993_v37 = vadd.f32 1.0, %v5584_v2  ;;  %v3024_v32 = vmul.f32 %v2992_v15, %v7846_v4  ;;  %v2426_v30 = vpack.c.bf16 %v2399_v47, %v2398_v52 }
 0x341   : > { %v7927_v50 = vpop.eup %5587  ;;  %v7930_v7 = vmul.f32 %v2248_v8, %v7849_v33  ;;  %v2750_v34 = vadd.f32 1.0, %v5586_v46  ;;  %5603 = vtanh.f32 %v7910_v49  ;;  %v7934_v12 = vmul.f32 0.5, %v7805_v55 }
 0x342   : > { %v5590_v61 = vpop.eup %5589  ;;  %v3025_v21 = vmul.f32 %v2993_v37, %v7852_v60  ;;  %3392 = vmatmul.mubr.bf16.gmra.mrb[80].mxu0 %v2426_v30  ;;  %5605 = vtanh.f32 %v7918_v53  ;;  %v7939_v4 = vmul.f32 0.5, %v7816_v11  ;;  %v2625_v3 = vmul.f32 %v7722_v16, %v7722_v16 }
 0x343   : > { %v5592_v33 = vpop.eup %5591  ;;  %5607 = vtanh.f32 %v7930_v7  ;;  %v2249_v43 = vadd.f32 1.0, %v5590_v61  ;;  %v2782_v5 = vmul.f32 %v2750_v34, %v7836_v38  ;;  %v2626_v31 = vmul.f32 %v7736_v10, %v7736_v10 }
 0x344   : > { %v7947_v20 = vpop.eup %5593  ;;  %v3053_v60 = vpack.c.bf16 %v3025_v21, %v3024_v32  ;;  %v2751_v29 = vadd.f32 1.0, %v5592_v33  ;;  %5609 = vtanh.f32 %v7901_v57  ;;  %v2658_v56 = vsub.f32 %v2625_v3, %v7446_v40 }
 0x345   : > { %v5596_v17 = vpop.eup %5595  ;;  %v7952_v41 = vmul.f32 %v2249_v43, %v7873_v0  ;;  %5611 = vtanh.f32 %v7913_v19  ;;  %v2659_v45 = vsub.f32 %v2626_v31, %v7446_v40  ;;  %v2868_v38 = vmul.f32 %v7722_v16, %v7437_v28 }
 0x346   : > { %v5598_v52 = vpop.eup %5597  ;;  %3544 = vmatprep.mubr.bf16.mxu1 %v3053_v60  ;;  %v2783_v22 = vmul.f32 %v2751_v29, %v7858_v63  ;;  %v2544_v15 = vadd.f32 1.0, %v5596_v17  ;;  %5613 = vtanh.f32 %v7921_v6  ;;  %v2835_v47 = vmul.f32 %v7722_v16, %v2658_v56 }
 0x347   : > { %5615 = vtanh.f32 %v7952_v41  ;;  %v2545_v0 = vadd.f32 1.0, %v5598_v52  ;;  %v2836_v2 = vmul.f32 %v7736_v10, %v2659_v45  ;;  %v2869_v8 = vmul.f32 %v7736_v10, %v7437_v28 }
 0x348   : > { %v2811_v46 = vpack.c.bf16 %v2783_v22, %v2782_v5  ;;  %v2576_v37 = vmul.f32 %v2544_v15, %v7865_v27  ;;  %5617 = vtanh.f32 %v7923_v1  ;;  %v2900_v32 = vsub.f32 %v2835_v47, %v2868_v38 }
 0x349   : > { %v5600_v63 = vpop.eup %5599  ;;  %v2577_v30 = vmul.f32 %v2545_v0, %v7868_v54  ;;  %5619 = vtanh.f32 %v7934_v12  ;;  %v2901_v16 = vsub.f32 %v2836_v2, %v2869_v8  ;;  %v7970_v34 = vmul.f32 0.5, %v7761_v9 }
 0x34a   : > { %v5602_v61 = vpop.eup %5601  ;;  %v2250_v21 = vadd.f32 1.0, %v5600_v63  ;;  %3545 = vmatmul.mubr.bf16.gmra.mrb[76].mxu1 %v2811_v46  ;;  %5621 = vtanh.f32 %v7939_v4  ;;  %v7973_v10 = vmul.f32 0.5, %v2900_v32  ;;  %v7976_v27 = vmul.f32 0.5, %v7772_v42 }
 0x34b   : > { %v5604_v3 = vpop.eup %5603  ;;  %v2251_v33 = vadd.f32 1.0, %v5602_v61  ;;  %v2603_v43 = vpack.c.bf16 %v2577_v30, %v2576_v37  ;;  %v7978_v54 = vmul.f32 0.5, %v2901_v16  ;;  %5623 = vtanh.f32 %v7970_v34 }
 0x34c   : > { %v5606_v5 = vpop.eup %5605  ;;  %v7982_v9 = vmul.f32 %v2250_v21, %v7907_v25  ;;  %v2994_v31 = vadd.f32 1.0, %v5604_v3  ;;  %5625 = vtanh.f32 %v7973_v10  ;;  %v7985_v60 = vmul.f32 0.5, %v2658_v56 }
 0x34d   : > { %v7987_v29 = vpop.eup %5607  ;;  %v7990_v42 = vmul.f32 %v2251_v33, %v7915_v51  ;;  %3399 = vmatprep.mubr.bf16.mxu0 %v2603_v43  ;;  %v2995_v17 = vadd.f32 1.0, %v5606_v5  ;;  %5627 = vtanh.f32 %v7978_v54  ;;  %v7993_v38 = vmul.f32 0.5, %v2659_v45 }
 0x34e   : > { %v5610_v52 = vpop.eup %5609  ;;  %5629 = vtanh.f32 %v7982_v9  ;;  %v3026_v25 = vmul.f32 %v2994_v31, %v7910_v49  ;;  %v7998_v22 = vmul.f32 0.5, %v7854_v23  ;;  %v8001_v56 = vmul.f32 0.5, %v7860_v26 }
 0x34f   : > { %v5612_v15 = vpop.eup %5611  ;;  %5631 = vtanh.f32 %v7990_v42  ;;  %v3027_v51 = vmul.f32 %v2995_v17, %v7918_v53  ;;  %v2368_v47 = vadd.f32 1.0, %v5610_v52  ;;  %v2627_v45 = vmul.f32 %v7805_v55, %v7805_v55 }
 0x350   : > { %v5614_v0 = vpop.eup %5613  ;;  %v2369_v2 = vadd.f32 1.0, %v5612_v15  ;;  %5633 = vtanh.f32 %v7976_v27  ;;  %v2628_v49 = vmul.f32 %v7816_v11, %v7816_v11  ;;  %v2870_v8 = vmul.f32 %v7805_v55, %v7437_v28 }
 0x351   : > { %v8012_v46 = vpop.eup %5615  ;;  %v3054_v37 = vpack.c.bf16 %v3027_v51, %v3026_v25  ;;  %v2400_v32 = vmul.f32 %v2368_v47, %v7901_v57  ;;  %v2752_v53 = vadd.f32 1.0, %v5614_v0  ;;  %5635 = vtanh.f32 %v7985_v60 }
 0x352   : > { %v5618_v63 = vpop.eup %5617  ;;  %v2401_v30 = vmul.f32 %v2369_v2, %v7913_v19  ;;  %5637 = vtanh.f32 %v7993_v38  ;;  %v2660_v16 = vsub.f32 %v2627_v45, %v7446_v40  ;;  %v2661_v61 = vsub.f32 %v2628_v49, %v7446_v40 }
 0x353   : > { %v5620_v21 = vpop.eup %5619  ;;  %3552 = vmatprep.mubr.bf16.mxu1 %v3054_v37  ;;  %v2753_v3 = vadd.f32 1.0, %v5618_v63  ;;  %v2784_v33 = vmul.f32 %v2752_v53, %v7921_v6  ;;  %5639 = vtanh.f32 %v7998_v22  ;;  %v2871_v57 = vmul.f32 %v7816_v11, %v7437_v28 }
 0x354   : > { %v5622_v43 = vpop.eup %5621  ;;  %v2427_v5 = vpack.c.bf16 %v2401_v30, %v2400_v32  ;;  %v2546_v31 = vadd.f32 1.0, %v5620_v21  ;;  %5641 = vtanh.f32 %v8001_v56  ;;  %v2837_v19 = vmul.f32 %v7805_v55, %v2660_v16 }
 0x355   : > { %v5624_v17 = vpop.eup %5623  ;;  %v2785_v52 = vmul.f32 %v2753_v3, %v7923_v1  ;;  %v2547_v25 = vadd.f32 1.0, %v5622_v43  ;;  %v2838_v15 = vmul.f32 %v7816_v11, %v2661_v61  ;;  %v8029_v6 = vmul.f32 0.5, %v7794_v58 }
 0x356   : > { %v5626_v51 = vpop.eup %5625  ;;  %3400 = vmatmul.mubr.bf16.gmra.mrb[84].mxu0 %v2427_v5  ;;  %v2578_v47 = vmul.f32 %v2546_v31, %v7934_v12  ;;  %v2370_v45 = vadd.f32 1.0, %v5624_v17  ;;  %v2902_v0 = vsub.f32 %v2837_v19, %v2870_v8  ;;  %v8033_v2 = vmul.f32 0.5, %v7799_v59 }
 0x357   : > { %v5628_v49 = vpop.eup %5627  ;;  %v2812_v55 = vpack.c.bf16 %v2785_v52, %v2784_v33  ;;  %v2579_v37 = vmul.f32 %v2547_v25, %v7939_v4  ;;  %v2996_v1 = vadd.f32 1.0, %v5626_v51  ;;  %v2903_v32 = vsub.f32 %v2838_v15, %v2871_v57 }
 0x358   : > { %v8036_v53 = vpop.eup %5629  ;;  %v2997_v11 = vadd.f32 1.0, %v5628_v49  ;;  %v2402_v58 = vmul.f32 %v2370_v45, %v7970_v34  ;;  %v8039_v63 = vmul.f32 0.5, %v2902_v0  ;;  %5643 = vtanh.f32 %v8029_v6 }
 0x359   : > { %v8042_v12 = vpop.eup %5631  ;;  %3553 = vmatmul.mubr.bf16.gmra.mrb[80].mxu1 %v2812_v55  ;;  %v2604_v59 = vpack.c.bf16 %v2579_v37, %v2578_v47  ;;  %v3028_v8 = vmul.f32 %v2996_v1, %v7973_v10  ;;  %v8045_v30 = vmul.f32 0.5, %v2903_v32  ;;  %5645 = vtanh.f32 %v8033_v2 }
 0x35a   : > { %v5634_v4 = vpop.eup %5633  ;;  %v3029_v21 = vmul.f32 %v2997_v11, %v7978_v54  ;;  %5647 = vtanh.f32 %v8039_v63  ;;  %v8050_v34 = vmul.f32 0.5, %v2660_v16  ;;  %v8052_v3 = vmul.f32 0.5, %v2661_v61 }
 0x35b   : > { %v5636_v33 = vpop.eup %5635  ;;  %3407 = vmatprep.mubr.bf16.mxu0 %v2604_v59  ;;  %v2371_v57 = vadd.f32 1.0, %v5634_v4  ;;  %5649 = vtanh.f32 %v8045_v30  ;;  %v8056_v10 = vmul.f32 0.5, %v7927_v50  ;;  %v8059_v43 = vmul.f32 0.5, %v7947_v20 }
 0x35c   : > { %v5638_v5 = vpop.eup %5637  ;;  %v3055_v31 = vpack.c.bf16 %v3029_v21, %v3028_v8  ;;  %v2754_v54 = vadd.f32 1.0, %v5636_v33  ;;  %5651 = vtanh.f32 %v8050_v34  ;;  %v2629_v16 = vmul.f32 %v7854_v23, %v7854_v23 }
 0x35d   : > { %v5640_v61 = vpop.eup %5639  ;;  %v2403_v19 = vmul.f32 %v2371_v57, %v7976_v27  ;;  %v2755_v17 = vadd.f32 1.0, %v5638_v5  ;;  %5653 = vtanh.f32 %v8052_v3  ;;  %v2630_v52 = vmul.f32 %v7860_v26, %v7860_v26 }
 0x35e   : > { %v5642_v25 = vpop.eup %5641  ;;  %3560 = vmatprep.mubr.bf16.mxu1 %v3055_v31  ;;  %v2786_v15 = vmul.f32 %v2754_v54, %v7985_v60  ;;  %v2548_v51 = vadd.f32 1.0, %v5640_v61  ;;  %5655 = vtanh.f32 %v8056_v10  ;;  %v2662_v47 = vsub.f32 %v2629_v16, %v7446_v40 }
 0x35f   : > { %v2428_v45 = vpack.c.bf16 %v2403_v19, %v2402_v58  ;;  %v2787_v0 = vmul.f32 %v2755_v17, %v7993_v38  ;;  %v2549_v49 = vadd.f32 1.0, %v5642_v25  ;;  %5657 = vtanh.f32 %v8059_v43 }
 0x360   : > { %v2580_v27 = vmul.f32 %v2548_v51, %v7998_v22  ;;  %v2663_v55 = vsub.f32 %v2630_v52, %v7446_v40  ;;  %v2839_v37 = vmul.f32 %v7854_v23, %v2662_v47  ;;  %v2872_v60 = vmul.f32 %v7854_v23, %v7437_v28 }
 0x361   : > { %3408 = vmatmul.mubr.bf16.gmra.mrb[88].mxu0 %v2428_v45  ;;  %v2813_v1 = vpack.c.bf16 %v2787_v0, %v2786_v15  ;;  %v2581_v32 = vmul.f32 %v2549_v49, %v8001_v56  ;;  %v2873_v11 = vmul.f32 %v7860_v26, %v7437_v28  ;;  %v8082_v38 = vmul.f32 0.5, %v7871_v14 }
 0x362   : > { %v5644_v58 = vpop.eup %5643  ;;  %v2840_v22 = vmul.f32 %v7860_v26, %v2663_v55  ;;  %v2904_v59 = vsub.f32 %v2839_v37, %v2872_v60  ;;  %v8086_v8 = vmul.f32 0.5, %v7887_v13  ;;  %v8088_v4 = vmul.f32 0.5, %v2662_v47 }
 0x363   : > { %v5646_v23 = vpop.eup %5645  ;;  %3561 = vmatmul.mubr.bf16.gmra.mrb[84].mxu1 %v2813_v1  ;;  %v2605_v21 = vpack.c.bf16 %v2581_v32, %v2580_v27  ;;  %v2372_v33 = vadd.f32 1.0, %v5644_v58  ;;  %5659 = vtanh.f32 %v8082_v38  ;;  %v8091_v56 = vmul.f32 0.5, %v2663_v55 }
 0x364   : > { %v5648_v57 = vpop.eup %5647  ;;  %v2373_v14 = vadd.f32 1.0, %v5646_v23  ;;  %v2905_v5 = vsub.f32 %v2840_v22, %v2873_v11  ;;  %v8093_v31 = vmul.f32 0.5, %v2904_v59  ;;  %5661 = vtanh.f32 %v8086_v8 }
 0x365   : > { %v5650_v26 = vpop.eup %5649  ;;  %3415 = vmatprep.mubr.bf16.mxu0 %v2605_v21  ;;  %v2998_v13 = vadd.f32 1.0, %v5648_v57  ;;  %v2404_v54 = vmul.f32 %v2372_v33, %v8029_v6  ;;  %5663 = vtanh.f32 %v8088_v4  ;;  %v8099_v16 = vmul.f32 0.5, %v7987_v29 }
 0x366   : > { %v5652_v61 = vpop.eup %5651  ;;  %v2999_v19 = vadd.f32 1.0, %v5650_v26  ;;  %v2405_v17 = vmul.f32 %v2373_v14, %v8033_v2  ;;  %v8102_v52 = vmul.f32 0.5, %v2905_v5  ;;  %5665 = vtanh.f32 %v8093_v31 }
 0x367   : > { %v5654_v25 = vpop.eup %5653  ;;  %v3030_v15 = vmul.f32 %v2998_v13, %v8039_v63  ;;  %v2756_v51 = vadd.f32 1.0, %v5652_v61  ;;  %5667 = vtanh.f32 %v8091_v56  ;;  %v8108_v6 = vmul.f32 0.5, %v8012_v46 }
 0x368   : > { %v5656_v47 = vpop.eup %5655  ;;  %v3031_v45 = vmul.f32 %v2999_v19, %v8045_v30  ;;  %v2429_v0 = vpack.c.bf16 %v2405_v17, %v2404_v54  ;;  %v2757_v49 = vadd.f32 1.0, %v5654_v25  ;;  %5669 = vtanh.f32 %v8102_v52 }
 0x369   : > { %v5658_v2 = vpop.eup %5657  ;;  %v2788_v27 = vmul.f32 %v2756_v51, %v8050_v34  ;;  %v2550_v55 = vadd.f32 1.0, %v5656_v47  ;;  %5671 = vtanh.f32 %v8099_v16  ;;  %v2631_v63 = vmul.f32 %v7927_v50, %v7927_v50 }
 0x36a   : > { %v3056_v37 = vpack.c.bf16 %v3031_v45, %v3030_v15  ;;  %3416 = vmatmul.mubr.bf16.gmra.mrb[92].mxu0 %v2429_v0  ;;  %v2789_v60 = vmul.f32 %v2757_v49, %v8052_v3  ;;  %v2551_v1 = vadd.f32 1.0, %v5658_v2  ;;  %5673 = vtanh.f32 %v8108_v6 }
 0x36b   : > { %v2582_v30 = vmul.f32 %v2550_v55, %v8056_v10  ;;  %v2632_v32 = vmul.f32 %v7947_v20, %v7947_v20  ;;  %v2664_v34 = vsub.f32 %v2631_v63, %v7446_v40  ;;  %v2874_v11 = vmul.f32 %v7927_v50, %v7437_v28 }
 0x36c   : > { %3568 = vmatprep.mubr.bf16.mxu1 %v3056_v37  ;;  %v2814_v58 = vpack.c.bf16 %v2789_v60, %v2788_v27  ;;  %v2583_v22 = vmul.f32 %v2551_v1, %v8059_v43  ;;  %v2875_v3 = vmul.f32 %v7947_v20, %v7437_v28  ;;  %v8128_v59 = vmul.f32 0.5, %v7930_v7 }
 0x36d   : > { %v5660_v23 = vpop.eup %5659  ;;  %v2665_v10 = vsub.f32 %v2632_v32, %v7446_v40  ;;  %v2841_v21 = vmul.f32 %v7927_v50, %v2664_v34  ;;  %v8133_v33 = vmul.f32 0.5, %v7952_v41  ;;  %v8135_v57 = vmul.f32 0.5, %v2664_v34 }
 0x36e   : > { %v5662_v14 = vpop.eup %5661  ;;  %3569 = vmatmul.mubr.bf16.gmra.mrb[88].mxu1 %v2814_v58  ;;  %v2606_v5 = vpack.c.bf16 %v2583_v22, %v2582_v30  ;;  %v2374_v43 = vadd.f32 1.0, %v5660_v23  ;;  %5675 = vtanh.f32 %v8128_v59  ;;  %v8139_v26 = vmul.f32 0.5, %v8036_v53 }
 0x36f   : > { %v5664_v7 = vpop.eup %5663  ;;  %v2375_v13 = vadd.f32 1.0, %v5662_v14  ;;  %v2842_v54 = vmul.f32 %v7947_v20, %v2665_v10  ;;  %v2906_v61 = vsub.f32 %v2841_v21, %v2874_v11  ;;  %5677 = vtanh.f32 %v8133_v33 }
 0x370   : > { %v5666_v50 = vpop.eup %5665  ;;  %3423 = vmatprep.mubr.bf16.mxu0 %v2606_v5  ;;  %v2406_v41 = vmul.f32 %v2374_v43, %v8082_v38  ;;  %v2758_v19 = vadd.f32 1.0, %v5664_v7  ;;  %v8144_v17 = vmul.f32 0.5, %v2665_v10  ;;  %5679 = vtanh.f32 %v8135_v57 }
 0x371   : > { %v5668_v25 = vpop.eup %5667  ;;  %v3000_v15 = vadd.f32 1.0, %v5666_v50  ;;  %v2407_v51 = vmul.f32 %v2375_v13, %v8086_v8  ;;  %v2907_v47 = vsub.f32 %v2842_v54, %v2875_v3  ;;  %v8148_v45 = vmul.f32 0.5, %v2906_v61  ;;  %v1947_v50 = vpop.xlane.xlu0 %1946 }
 0x372   : > { %v5670_v20 = vpop.eup %5669  ;;  %v2759_v0 = vadd.f32 1.0, %v5668_v25  ;;  %v2790_v49 = vmul.f32 %v2758_v19, %v8088_v4  ;;  %5681 = vtanh.f32 %v8144_v17  ;;  %v8153_v38 = vmul.f32 0.5, %v8042_v12 }
 0x373   : > { %v5672_v2 = vpop.eup %5671  ;;  %v3001_v27 = vadd.f32 1.0, %v5670_v20  ;;  %v3032_v55 = vmul.f32 %v3000_v15, %v8093_v31  ;;  %v2430_v63 = vpack.c.bf16 %v2407_v51, %v2406_v41  ;;  %v8156_v37 = vmul.f32 0.5, %v2907_v47 }
 0x374   : > { %v5674_v8 = vpop.eup %5673  ;;  %v2791_v60 = vmul.f32 %v2759_v0, %v8091_v56  ;;  %v2552_v1 = vadd.f32 1.0, %v5672_v2  ;;  %5683 = vtanh.f32 %v8148_v45  ;;  %v2633_v4 = vmul.f32 %v7987_v29, %v7987_v29 }
 0x375   : > { %v3033_v30 = vmul.f32 %v3001_v27, %v8102_v52  ;;  %3424 = vmatmul.mubr.bf16.gmra.mrb[96].mxu0 %v2430_v63  ;;  %v2553_v32 = vadd.f32 1.0, %v5674_v8  ;;  %5685 = vtanh.f32 %v8156_v37  ;;  %v2634_v31 = vmul.f32 %v8012_v46, %v8012_v46 }
 0x376   : > { %v2815_v34 = vpack.c.bf16 %v2791_v60, %v2790_v49  ;;  %v2584_v11 = vmul.f32 %v2552_v1, %v8099_v16  ;;  %5687 = vtanh.f32 %v8139_v26  ;;  %v2666_v56 = vsub.f32 %v2633_v4, %v7446_v40 }
 0x377   : > { %v3057_v58 = vpack.c.bf16 %v3033_v30, %v3032_v55  ;;  %v2585_v22 = vmul.f32 %v2553_v32, %v8108_v6  ;;  %5689 = vtanh.f32 %v8153_v38  ;;  %v2667_v52 = vsub.f32 %v2634_v31, %v7446_v40 }
 0x378   : > { %v5676_v3 = vpop.eup %5675  ;;  %v2843_v23 = vmul.f32 %v7987_v29, %v2666_v56  ;;  %v2876_v10 = vmul.f32 %v7987_v29, %v7437_v28  ;;  %v2877_v16 = vmul.f32 %v8012_v46, %v7437_v28  ;;  %v8178_v21 = vmul.f32 0.5, %v7982_v9 }
 0x379   : > { %v5678_v14 = vpop.eup %5677  ;;  %3576 = vmatprep.mubr.bf16.mxu1 %v3057_v58  ;;  %v2607_v5 = vpack.c.bf16 %v2585_v22, %v2584_v11  ;;  %v2376_v6 = vadd.f32 1.0, %v5676_v3  ;;  %v2844_v43 = vmul.f32 %v8012_v46, %v2667_v52  ;;  %v8182_v7 = vmul.f32 0.5, %v7990_v42  ;;  %v1949_v46 = vpop.xlane.xlu1 %1948 }
 0x37a   : > { %v5680_v13 = vpop.eup %5679  ;;  %3577 = vmatmul.mubr.bf16.gmra.mrb[92].mxu1 %v2815_v34  ;;  %v2377_v54 = vadd.f32 1.0, %v5678_v14  ;;  %v2908_v61 = vsub.f32 %v2843_v23, %v2876_v10  ;;  %5691 = vtanh.f32 %v8178_v21  ;;  %v8185_v29 = vmul.f32 0.5, %v2666_v56  ;;  %v1951_v56 = vpop.xlane.xlu0 %1950 }
 0x37b   : > { %3431 = vmatprep.mubr.bf16.mxu0 %v2607_v5  ;;  %v2408_v9 = vmul.f32 %v2376_v6, %v8128_v59  ;;  %v2760_v41 = vadd.f32 1.0, %v5680_v13  ;;  %v2909_v19 = vsub.f32 %v2844_v43, %v2877_v16  ;;  %5693 = vtanh.f32 %v8182_v7 }
 0x37c   : > { %v5682_v25 = vpop.eup %5681  ;;  %v2409_v42 = vmul.f32 %v2377_v54, %v8133_v33  ;;  %v8190_v15 = vmul.f32 0.5, %v2908_v61  ;;  %v8192_v51 = vmul.f32 0.5, %v2667_v52  ;;  %5695 = vtanh.f32 %v8185_v29 }
 0x37d   : > { %v2761_v47 = vadd.f32 1.0, %v5682_v25  ;;  %v2792_v20 = vmul.f32 %v2760_v41, %v8135_v57  ;;  %v8196_v0 = vmul.f32 0.5, %v2909_v19  ;;  %v1988_v59 = vmul.f32 0.015625, %v1947_v50 }
 0x37e   : > { %v5684_v49 = vpop.eup %5683  ;;  %v2431_v2 = vpack.c.bf16 %v2409_v42, %v2408_v9  ;;  %5697 = vtanh.f32 %v8190_v15  ;;  %v1989_v27 = vmul.f32 0.015625, %v1949_v46  ;;  %v2635_v33 = vmul.f32 %v8036_v53, %v8036_v53  ;;  %v1955_v50 = vpop.xlane.xlu0 %1954 }
 0x37f   : > { %v5686_v55 = vpop.eup %5685  ;;  %v3002_v63 = vadd.f32 1.0, %v5684_v49  ;;  %v2793_v8 = vmul.f32 %v2761_v47, %v8144_v17  ;;  %5699 = vtanh.f32 %v8196_v0  ;;  %v2020_v60 = vadd.f32 1e-05, %v1988_v59  ;;  %v1953_v17 = vpop.xlane.xlu1 %1952 }
 0x380   : > { %v5688_v1 = vpop.eup %5687  ;;  %v3003_v57 = vadd.f32 1.0, %v5686_v55  ;;  %3432 = vmatmul.mubr.bf16.gmra.mrb[100].mxu0 %v2431_v2  ;;  %5701 = vtanh.f32 %v8192_v51  ;;  %v2021_v4 = vadd.f32 1e-05, %v1989_v27  ;;  %v2636_v30 = vmul.f32 %v8042_v12, %v8042_v12 }
 0x381   : > { %v5690_v32 = vpop.eup %5689  ;;  %v3034_v31 = vmul.f32 %v3002_v63, %v8148_v45  ;;  %v2816_v34 = vpack.c.bf16 %v2793_v8, %v2792_v20  ;;  %v2554_v11 = vadd.f32 1.0, %v5688_v1  ;;  %5703 = vrsqrt.f32 %v2020_v60 }
 0x382   : > { %v3035_v58 = vmul.f32 %v3003_v57, %v8156_v37  ;;  %v2555_v22 = vadd.f32 1.0, %v5690_v32  ;;  %5705 = vrsqrt.f32 %v2021_v4  ;;  %v2668_v52 = vsub.f32 %v2635_v33, %v7446_v40 }
 0x383   : > { %v2586_v3 = vmul.f32 %v2554_v11, %v8139_v26  ;;  %v2669_v23 = vsub.f32 %v2636_v30, %v7446_v40  ;;  %v2878_v10 = vmul.f32 %v8036_v53, %v7437_v28  ;;  %v2879_v45 = vmul.f32 %v8042_v12, %v7437_v28  ;;  %v1957_v9 = vpop.xlane.xlu1 %1956 }
 0x384   : > { %v5692_v16 = vpop.eup %5691  ;;  %v3058_v14 = vpack.c.bf16 %v3035_v58, %v3034_v31  ;;  %v2587_v5 = vmul.f32 %v2555_v22, %v8153_v38  ;;  %v2845_v37 = vmul.f32 %v8036_v53, %v2668_v52  ;;  %v8217_v6 = vmul.f32 0.5, %v2668_v52 }
 0x385   : > { %v5694_v43 = vpop.eup %5693  ;;  %v2378_v13 = vadd.f32 1.0, %v5692_v16  ;;  %v2846_v26 = vmul.f32 %v8042_v12, %v2669_v23  ;;  %v8220_v54 = vmul.f32 0.5, %v2669_v23  ;;  %v1990_v61 = vmul.f32 0.015625, %v1951_v56 }
 0x386   : > { %v5696_v41 = vpop.eup %5695  ;;  %3584 = vmatprep.mubr.bf16.mxu1 %v3058_v14  ;;  %v2608_v19 = vpack.c.bf16 %v2587_v5, %v2586_v3  ;;  %v2379_v46 = vadd.f32 1.0, %v5694_v43  ;;  %v2910_v25 = vsub.f32 %v2845_v37, %v2878_v10  ;;  %5707 = vtanh.f32 %v8217_v6 }
 0x387   : > { %3585 = vmatmul.mubr.bf16.gmra.mrb[96].mxu1 %v2816_v34  ;;  %v2410_v53 = vmul.f32 %v2378_v13, %v8178_v21  ;;  %v2762_v38 = vadd.f32 1.0, %v5696_v41  ;;  %v2911_v42 = vsub.f32 %v2846_v26, %v2879_v45  ;;  %5709 = vtanh.f32 %v8220_v54  ;;  %v1959_v21 = vpop.xlane.xlu0 %1958  ;;  %v1961_v8 = vpop.xlane.xlu1 %1960 }
 0x388   : > { %v5698_v12 = vpop.eup %5697  ;;  %3439 = vmatprep.mubr.bf16.mxu0 %v2608_v19  ;;  %v2411_v47 = vmul.f32 %v2379_v46, %v8182_v7  ;;  %v8226_v20 = vmul.f32 0.5, %v2910_v25  ;;  %v2022_v59 = vadd.f32 1e-05, %v1990_v61  ;;  %v1991_v49 = vmul.f32 0.015625, %v1953_v17 }
 0x389   : > { %v5700_v2 = vpop.eup %5699  ;;  %v3004_v27 = vadd.f32 1.0, %v5698_v12  ;;  %v2794_v33 = vmul.f32 %v2762_v38, %v8185_v29  ;;  %v8229_v55 = vmul.f32 0.5, %v2911_v42  ;;  %v1992_v63 = vmul.f32 0.015625, %v1955_v50 }
 0x38a   : > { %v5702_v60 = vpop.eup %5701  ;;  %v3005_v1 = vadd.f32 1.0, %v5700_v2  ;;  %v2432_v57 = vpack.c.bf16 %v2411_v47, %v2410_v53  ;;  %5711 = vtanh.f32 %v8226_v20  ;;  %v2023_v4 = vadd.f32 1e-05, %v1991_v49 }
 0x38b   : > { %v5704_v7 = vpop.eup %5703  ;;  %v3036_v30 = vmul.f32 %v3004_v27, %v8190_v15  ;;  %v2763_v32 = vadd.f32 1.0, %v5702_v60  ;;  %5713 = vtanh.f32 %v8229_v55  ;;  %v2024_v31 = vadd.f32 1e-05, %v1992_v63  ;;  %v1963_v52 = vpop.xlane.xlu0 %1962 }
 0x38c   : > { %v5706_v34 = vpop.eup %5705  ;;  %v3037_v29 = vmul.f32 %v3005_v1, %v8196_v0  ;;  %3440 = vmatmul.mubr.bf16.gmra.mrb[104].mxu0 %v2432_v57  ;;  %v2084_v11 = vmul.f32 %v5704_v7, %v7354_v18  ;;  %5715 = vrsqrt.f32 %v2022_v59  ;;  %v1993_v56 = vmul.f32 0.015625, %v1957_v9  ;;  %v1965_v15 = vpop.xlane.xlu1 %1964 }
 0x38d   : > { %v2795_v17 = vmul.f32 %v2763_v32, %v8192_v51  ;;  %v2085_v58 = vmul.f32 %v5706_v34, %v7360_v44  ;;  %5717 = vrsqrt.f32 %v2023_v4  ;;  %v1994_v22 = vmul.f32 0.015625, %v1959_v21  ;;  %v9091_v4 = vld [vmem:[#allocation15_spill] sm:$0xff] }
 0x38e   : > { %v3059_v3 = vpack.c.bf16 %v3037_v29, %v3036_v30  ;;  %v2120_v23 = vmul.f32 %v7823_v35, %v2084_v11  ;;  %5719 = vrsqrt.f32 %v2024_v31  ;;  %v2025_v10 = vadd.f32 1e-05, %v1993_v56  ;;  %v9092_v56 = vld [vmem:[#allocation16_spill] sm:$0xff] }
 0x38f   : > { %v2817_v45 = vpack.c.bf16 %v2795_v17, %v2794_v33  ;;  %v2121_v0 = vmul.f32 %v7823_v35, %v2085_v58  ;;  %v2026_v16 = vadd.f32 1e-05, %v1994_v22  ;;  %v1995_v18 = vmul.f32 0.015625, %v1961_v8  ;;  %v5981_v33 = vld [vmem:[%s9061_s3 + $0x1] ss:$0 sm:$0xff] }
 0x390   : > { %v5708_v14 = vpop.eup %5707  ;;  %3592 = vmatprep.mubr.bf16.mxu1 %v3059_v3  ;;  %v2156_v51 = vadd.f32 %v7841_v62, %v2120_v23  ;;  %5721 = vrsqrt.f32 %v2025_v10  ;;  %v1996_v44 = vmul.f32 0.015625, %v1963_v52  ;;  %v1997_v5 = vmul.f32 0.015625, %v1965_v15 }
 0x391   : > { %v5710_v37 = vpop.eup %5709  ;;  %3593 = vmatmul.mubr.bf16.gmra.mrb[100].mxu1 %v2817_v45  ;;  %v2157_v43 = vadd.f32 %v7841_v62, %v2121_v0  ;;  %5723 = vrsqrt.f32 %v2026_v16  ;;  %v2027_v13 = vadd.f32 1e-05, %v1995_v18  ;;  %v2764_v25 = vadd.f32 1.0, %v5708_v14  ;;  %v9093_v18 = vld [vmem:[#allocation17_spill] sm:$0xff] }
 0x392   : > { %v2188_v26 = vmul.f32 0.5, %v2156_v51  ;;  %v2028_v61 = vadd.f32 1e-05, %v1996_v44  ;;  %v2765_v9 = vadd.f32 1.0, %v5710_v37  ;;  %v2029_v35 = vadd.f32 1e-05, %v1997_v5 }
 0x393   : > { %v2189_v50 = vmul.f32 0.5, %v2157_v43  ;;  %5725 = vrsqrt.f32 %v2027_v13  ;;  %v2796_v27 = vmul.f32 %v2764_v25, %v8217_v6  ;;  %v9094_v37 = vld [vmem:[#allocation18_spill] sm:$0xff] }
 0x394   : > { %v5712_v41 = vpop.eup %5711  ;;  %5727 = vtanh.f32 %v2188_v26  ;;  %v2797_v62 = vmul.f32 %v2765_v9, %v8220_v54 }
 0x395   : > { %v5714_v19 = vpop.eup %5713  ;;  %5729 = vtanh.f32 %v2189_v50  ;;  %v3006_v46 = vadd.f32 1.0, %v5712_v41 }
 0x396   : > { %v5716_v53 = vpop.eup %5715  ;;  %v3007_v38 = vadd.f32 1.0, %v5714_v19  ;;  %5731 = vrsqrt.f32 %v2028_v61  ;;  %v2818_v1 = vpack.c.bf16 %v2797_v62, %v2796_v27 }
 0x397   : > { %v5718_v42 = vpop.eup %5717  ;;  %v2086_v12 = vmul.f32 %v5716_v53, %v7377_v36  ;;  %5733 = vrsqrt.f32 %v2029_v35  ;;  %v3038_v59 = vmul.f32 %v3006_v46, %v8226_v20  ;;  %v5982_v20 = vld [vmem:[%s9061_s3 + $0x2] ss:$0 sm:$0xff] }
 0x398   : > { %v5720_v47 = vpop.eup %5719  ;;  %v3039_v49 = vmul.f32 %v3007_v38, %v8229_v55  ;;  %v2087_v2 = vmul.f32 %v5718_v42, %v7386_v39 }
 0x399   : > { %v2122_v63 = vmul.f32 %v5981_v33, %v2086_v12  ;;  %v2088_v21 = vmul.f32 %v5720_v47, %v7396_v24 }
 0x39a   : > { %v5722_v54 = vpop.eup %5721  ;;  %v3060_v8 = vpack.c.bf16 %v3039_v49, %v3038_v59  ;;  %v2123_v36 = vmul.f32 %v5981_v33, %v2087_v2 }
 0x39b   : > { %v5724_v60 = vpop.eup %5723  ;;  %v2158_v55 = vadd.f32 %v5982_v20, %v2122_v63  ;;  %v2124_v39 = vmul.f32 %v5981_v33, %v2088_v21  ;;  %v2089_v6 = vmul.f32 %v5722_v54, %v7404_v48 }
 0x39c   : > { %3600 = vmatprep.mubr.bf16.mxu1 %v3060_v8  ;;  %v2159_v57 = vadd.f32 %v5982_v20, %v2123_v36  ;;  %v2090_v7 = vmul.f32 %v5724_v60, %v9091_v4 }
 0x39d   : > { %v5726_v30 = vpop.eup %5725  ;;  %3601 = vmatmul.mubr.bf16.gmra.mrb[104].mxu1 %v2818_v1  ;;  %v2190_v24 = vmul.f32 0.5, %v2158_v55  ;;  %v2160_v32 = vadd.f32 %v5982_v20, %v2124_v39  ;;  %v2125_v31 = vmul.f32 %v5981_v33, %v2089_v6 }
 0x39e   : > { %v5728_v34 = vpop.eup %5727  ;;  %v2191_v29 = vmul.f32 0.5, %v2159_v57  ;;  %v2126_v11 = vmul.f32 %v5981_v33, %v2090_v7  ;;  %v2091_v17 = vmul.f32 %v5726_v30, %v9092_v56 }
 0x39f   : > { %v5730_v58 = vpop.eup %5729  ;;  %v2252_v22 = vadd.f32 1.0, %v5728_v34  ;;  %5735 = vtanh.f32 %v2190_v24  ;;  %v2192_v52 = vmul.f32 0.5, %v2160_v32  ;;  %v2161_v15 = vadd.f32 %v5982_v20, %v2125_v31 }
 0x3a0   : > { %v5732_v48 = vpop.eup %5731  ;;  %v2253_v3 = vadd.f32 1.0, %v5730_v58  ;;  %5737 = vtanh.f32 %v2191_v29  ;;  %v2162_v23 = vadd.f32 %v5982_v20, %v2126_v11  ;;  %v2127_v10 = vmul.f32 %v5981_v33, %v2091_v17 }
 0x3a1   : > { %v5734_v45 = vpop.eup %5733  ;;  %v2284_v0 = vmul.f32 %v2252_v22, %v2188_v26  ;;  %5739 = vtanh.f32 %v2192_v52  ;;  %v2193_v16 = vmul.f32 0.5, %v2161_v15  ;;  %v2092_v14 = vmul.f32 %v5732_v48, %v9093_v18 }
 0x3a2   : > { %v2285_v51 = vmul.f32 %v2253_v3, %v2189_v50  ;;  %v2194_v44 = vmul.f32 0.5, %v2162_v23  ;;  %v2163_v5 = vadd.f32 %v5982_v20, %v2127_v10  ;;  %v2093_v43 = vmul.f32 %v5734_v45, %v9094_v37 }
 0x3a3   : > { %5741 = vtanh.f32 %v2284_v0  ;;  %v2128_v13 = vmul.f32 %v5981_v33, %v2092_v14  ;;  %v2316_v35 = vmul.f32 0.5, %v2284_v0 }
 0x3a4   : > { %5743 = vtanh.f32 %v2285_v51  ;;  %v2195_v61 = vmul.f32 0.5, %v2163_v5  ;;  %v2129_v9 = vmul.f32 %v5981_v33, %v2093_v43  ;;  %v8260_v46 = vmul.f32 0.5, %v2285_v51 }
 0x3a5   : > { %5745 = vtanh.f32 %v2193_v16  ;;  %v2164_v41 = vadd.f32 %v5982_v20, %v2128_v13 }
 0x3a6   : > { %5747 = vtanh.f32 %v2194_v44  ;;  %v2165_v19 = vadd.f32 %v5982_v20, %v2129_v9 }
 0x3a7   : > { %5749 = vtanh.f32 %v2195_v61  ;;  %v2196_v26 = vmul.f32 0.5, %v2164_v41 }
 0x3a8   : > { %v2197_v25 = vmul.f32 0.5, %v2165_v19  ;;  %5751 = vtanh.f32 %v2316_v35 }
 0x3a9   : > { %v5736_v50 = vpop.eup %5735  ;;  %5753 = vtanh.f32 %v2196_v26 }
 0x3aa   : > { %v5738_v53 = vpop.eup %5737  ;;  %v2254_v38 = vadd.f32 1.0, %v5736_v50  ;;  %5755 = vtanh.f32 %v2197_v25 }
 0x3ab   : > { %v5740_v42 = vpop.eup %5739  ;;  %v2255_v62 = vadd.f32 1.0, %v5738_v53  ;;  %5757 = vtanh.f32 %v8260_v46 }
 0x3ac   : > { %v2286_v12 = vmul.f32 %v2254_v38, %v2190_v24  ;;  %v2256_v47 = vadd.f32 1.0, %v5740_v42 }
 0x3ad   : > { %v5742_v59 = vpop.eup %5741  ;;  %v2287_v49 = vmul.f32 %v2255_v62, %v2191_v29 }
 0x3ae   : > { %v5744_v2 = vpop.eup %5743  ;;  %5759 = vtanh.f32 %v2286_v12  ;;  %v2288_v27 = vmul.f32 %v2256_v47, %v2192_v52  ;;  %v8263_v33 = vmul.f32 0.5, %v5742_v59  ;;  %v2637_v63 = vmul.f32 %v5742_v59, %v5742_v59 }
 0x3af   : > { %v5746_v21 = vpop.eup %5745  ;;  %5761 = vtanh.f32 %v2287_v49  ;;  %v8265_v54 = vmul.f32 0.5, %v5744_v2  ;;  %v2638_v8 = vmul.f32 %v5744_v2, %v5744_v2  ;;  %v2880_v36 = vmul.f32 %v5742_v59, %v7437_v28 }
 0x3b0   : > { %v5748_v60 = vpop.eup %5747  ;;  %5763 = vtanh.f32 %v2288_v27  ;;  %v2257_v1 = vadd.f32 1.0, %v5746_v21  ;;  %v2670_v20 = vsub.f32 %v2637_v63, %v7446_v40  ;;  %v2881_v55 = vmul.f32 %v5744_v2, %v7437_v28 }
 0x3b1   : > { %v5750_v39 = vpop.eup %5749  ;;  %v2258_v6 = vadd.f32 1.0, %v5748_v60  ;;  %5765 = vtanh.f32 %v8263_v33  ;;  %v2671_v57 = vsub.f32 %v2638_v8, %v7446_v40  ;;  %v8272_v4 = vmul.f32 0.5, %v2286_v12 }
 0x3b2   : > { %v5752_v7 = vpop.eup %5751  ;;  %v2289_v30 = vmul.f32 %v2257_v1, %v2193_v16  ;;  %v2259_v24 = vadd.f32 1.0, %v5750_v39  ;;  %5767 = vtanh.f32 %v8265_v54  ;;  %v2847_v32 = vmul.f32 %v5742_v59, %v2670_v20 }
 0x3b3   : > { %v5754_v31 = vpop.eup %5753  ;;  %v8275_v34 = vmul.f32 %v2258_v6, %v2194_v44  ;;  %v2380_v29 = vadd.f32 1.0, %v5752_v7  ;;  %v2848_v11 = vmul.f32 %v5744_v2, %v2671_v57  ;;  %v8277_v56 = vmul.f32 0.5, %v2287_v49 }
 0x3b4   : > { %v5756_v17 = vpop.eup %5755  ;;  %5769 = vtanh.f32 %v2289_v30  ;;  %v8279_v58 = vmul.f32 %v2259_v24, %v2195_v61  ;;  %v2260_v22 = vadd.f32 1.0, %v5754_v31  ;;  %v2912_v52 = vsub.f32 %v2847_v32, %v2880_v36 }
 0x3b5   : > { %v5758_v15 = vpop.eup %5757  ;;  %5771 = vtanh.f32 %v8275_v34  ;;  %v2261_v48 = vadd.f32 1.0, %v5756_v17  ;;  %v8282_v3 = vmul.f32 %v2380_v29, %v2316_v35  ;;  %v2913_v23 = vsub.f32 %v2848_v11, %v2881_v55 }
 0x3b6   : > { %5773 = vtanh.f32 %v8279_v58  ;;  %v8285_v10 = vmul.f32 %v2260_v22, %v2196_v26  ;;  %v2381_v45 = vadd.f32 1.0, %v5758_v15  ;;  %v8287_v0 = vmul.f32 0.5, %v2912_v52 }
 0x3b7   : > { %v8289_v16 = vmul.f32 %v2261_v48, %v2197_v25  ;;  %v8291_v18 = vmul.f32 0.5, %v2913_v23  ;;  %5775 = vtanh.f32 %v8272_v4  ;;  %v8294_v14 = vmul.f32 0.5, %v2670_v20 }
 0x3b8   : > { %v5760_v51 = vpop.eup %5759  ;;  %5777 = vtanh.f32 %v8285_v10  ;;  %v2413_v44 = vmul.f32 %v2381_v45, %v8260_v46  ;;  %v8298_v5 = vmul.f32 0.5, %v2671_v57  ;;  %v8300_v37 = vmul.f32 0.5, %v2288_v27 }
 0x3b9   : > { %v5762_v43 = vpop.eup %5761  ;;  %5779 = vtanh.f32 %v8289_v16  ;;  %v8303_v13 = vmul.f32 0.5, %v5760_v51  ;;  %v2639_v61 = vmul.f32 %v5760_v51, %v5760_v51  ;;  %v2882_v9 = vmul.f32 %v5760_v51, %v7437_v28 }
 0x3ba   : > { %v5764_v35 = vpop.eup %5763  ;;  %v2433_v41 = vpack.c.bf16 %v2413_v44, %v8282_v3  ;;  %v8307_v19 = vmul.f32 0.5, %v5762_v43  ;;  %5781 = vtanh.f32 %v8287_v0  ;;  %v2640_v26 = vmul.f32 %v5762_v43, %v5762_v43 }
 0x3bb   : > { %v5766_v46 = vpop.eup %5765  ;;  %5783 = vtanh.f32 %v8303_v13  ;;  %v8311_v25 = vmul.f32 0.5, %v5764_v35  ;;  %v2672_v50 = vsub.f32 %v2639_v61, %v7446_v40  ;;  %v2883_v53 = vmul.f32 %v5762_v43, %v7437_v28 }
 0x3bc   : > { %v5768_v38 = vpop.eup %5767  ;;  %v2556_v42 = vadd.f32 1.0, %v5766_v46  ;;  %5785 = vtanh.f32 %v8307_v19  ;;  %v2673_v62 = vsub.f32 %v2640_v26, %v7446_v40  ;;  %v8317_v12 = vmul.f32 0.5, %v2289_v30 }
 0x3bd   : > { %v2557_v47 = vadd.f32 1.0, %v5768_v38  ;;  %5787 = vtanh.f32 %v8291_v18  ;;  %v2849_v59 = vmul.f32 %v5760_v51, %v2672_v50  ;;  %v8320_v49 = vmul.f32 0.5, %v2672_v50 }
 0x3be   : > { %v5770_v2 = vpop.eup %5769  ;;  %v2588_v27 = vmul.f32 %v2556_v42, %v8263_v33  ;;  %5789 = vtanh.f32 %v8277_v56  ;;  %v2850_v63 = vmul.f32 %v5762_v43, %v2673_v62  ;;  %v8324_v21 = vmul.f32 0.5, %v2673_v62 }
 0x3bf   : > { %v8326_v8 = vpop.eup %5771  ;;  %v2589_v36 = vmul.f32 %v2557_v47, %v8265_v54  ;;  %5791 = vtanh.f32 %v8294_v14  ;;  %v8330_v60 = vmul.f32 0.5, %v5770_v2  ;;  %v2914_v1 = vsub.f32 %v2849_v59, %v2882_v9 }
 0x3c0   : > { %v8332_v20 = vpop.eup %5773  ;;  %5793 = vtanh.f32 %v8298_v5  ;;  %v2915_v55 = vsub.f32 %v2850_v63, %v2883_v53  ;;  %v8336_v33 = vmul.f32 0.5, %v8326_v8  ;;  %v2641_v39 = vmul.f32 %v5764_v35, %v5764_v35 }
 0x3c1   : > { %v5776_v6 = vpop.eup %5775  ;;  %v2609_v57 = vpack.c.bf16 %v2589_v36, %v2588_v27  ;;  %5795 = vtanh.f32 %v8311_v25  ;;  %v8339_v7 = vmul.f32 0.5, %v2914_v1  ;;  %v8342_v54 = vmul.f32 0.5, %v8332_v20 }
 0x3c2   : > { %v8344_v30 = vpop.eup %5777  ;;  %v2382_v24 = vadd.f32 1.0, %v5776_v6  ;;  %5797 = vtanh.f32 %v8330_v60  ;;  %v8347_v32 = vmul.f32 0.5, %v2915_v55  ;;  %v2642_v31 = vmul.f32 %v5770_v2, %v5770_v2 }
 0x3c3   : > { %v8349_v29 = vpop.eup %5779  ;;  %3447 = vmatprep.mubr.bf16.mxu0 %v2609_v57  ;;  %5799 = vtanh.f32 %v8339_v7  ;;  %v2674_v11 = vsub.f32 %v2641_v39, %v7446_v40  ;;  %v2884_v17 = vmul.f32 %v5764_v35, %v7437_v28  ;;  %v2885_v22 = vmul.f32 %v5770_v2, %v7437_v28 }
 0x3c4   : > { %v5782_v52 = vpop.eup %5781  ;;  %3448 = vmatmul.mubr.bf16.gmra.mrb[108].mxu0 %v2433_v41  ;;  %v2414_v15 = vmul.f32 %v2382_v24, %v8272_v4  ;;  %5801 = vtanh.f32 %v8347_v32  ;;  %v2675_v48 = vsub.f32 %v2642_v31, %v7446_v40  ;;  %v8359_v3 = vmul.f32 0.5, %v8275_v34 }
 0x3c5   : > { %v5784_v23 = vpop.eup %5783  ;;  %v3008_v45 = vadd.f32 1.0, %v5782_v52  ;;  %5803 = vtanh.f32 %v8300_v37  ;;  %v2851_v51 = vmul.f32 %v5764_v35, %v2674_v11  ;;  %v8363_v44 = vmul.f32 0.5, %v8279_v58 }
 0x3c6   : > { %v5786_v43 = vpop.eup %5785  ;;  %v2558_v61 = vadd.f32 1.0, %v5784_v23  ;;  %5805 = vtanh.f32 %v8317_v12  ;;  %v2852_v4 = vmul.f32 %v5770_v2, %v2675_v48  ;;  %v8366_v9 = vmul.f32 0.5, %v2674_v11 }
 0x3c7   : > { %v5788_v41 = vpop.eup %5787  ;;  %v2559_v26 = vadd.f32 1.0, %v5786_v43  ;;  %v3040_v34 = vmul.f32 %v3008_v45, %v8287_v0  ;;  %5807 = vtanh.f32 %v8320_v49  ;;  %v2916_v46 = vsub.f32 %v2851_v51, %v2884_v17 }
 0x3c8   : > { %v5790_v50 = vpop.eup %5789  ;;  %v2590_v35 = vmul.f32 %v2558_v61, %v8303_v13  ;;  %v3009_v53 = vadd.f32 1.0, %v5788_v41  ;;  %5809 = vtanh.f32 %v8324_v21  ;;  %v2917_v58 = vsub.f32 %v2852_v4, %v2885_v22 }
 0x3c9   : > { %v5792_v38 = vpop.eup %5791  ;;  %v2591_v42 = vmul.f32 %v2559_v26, %v8307_v19  ;;  %v2383_v62 = vadd.f32 1.0, %v5790_v50  ;;  %5811 = vtanh.f32 %v8336_v33  ;;  %v8374_v47 = vmul.f32 0.5, %v2916_v46 }
 0x3ca   : > { %v5794_v59 = vpop.eup %5793  ;;  %v3041_v0 = vmul.f32 %v3009_v53, %v8291_v18  ;;  %v2766_v2 = vadd.f32 1.0, %v5792_v38  ;;  %5813 = vtanh.f32 %v8342_v54  ;;  %v8378_v27 = vmul.f32 0.5, %v2917_v58 }
 0x3cb   : > { %v5796_v13 = vpop.eup %5795  ;;  %v2610_v63 = vpack.c.bf16 %v2591_v42, %v2590_v35  ;;  %v2415_v36 = vmul.f32 %v2383_v62, %v8277_v56  ;;  %v2767_v1 = vadd.f32 1.0, %v5794_v59  ;;  %5815 = vtanh.f32 %v8374_v47 }
 0x3cc   : > { %v5798_v19 = vpop.eup %5797  ;;  %v3061_v55 = vpack.c.bf16 %v3041_v0, %v3040_v34  ;;  %v2798_v39 = vmul.f32 %v2766_v2, %v8294_v14  ;;  %v2560_v6 = vadd.f32 1.0, %v5796_v13  ;;  %5817 = vtanh.f32 %v8378_v27 }
 0x3cd   : > { %v5800_v18 = vpop.eup %5799  ;;  %3455 = vmatprep.mubr.bf16.mxu0 %v2610_v63  ;;  %v2434_v57 = vpack.c.bf16 %v2415_v36, %v2414_v15  ;;  %v2799_v24 = vmul.f32 %v2767_v1, %v8298_v5  ;;  %v2561_v31 = vadd.f32 1.0, %v5798_v19  ;;  %5819 = vtanh.f32 %v8359_v3 }
 0x3ce   : > { %v5802_v11 = vpop.eup %5801  ;;  %3608 = vmatprep.mubr.bf16.mxu1 %v3061_v55  ;;  %v2592_v56 = vmul.f32 %v2560_v6, %v8311_v25  ;;  %v3010_v17 = vadd.f32 1.0, %v5800_v18  ;;  %5821 = vtanh.f32 %v8363_v44  ;;  %v8388_v22 = vmul.f32 0.5, %v2675_v48 }
 0x3cf   : > { %v8390_v14 = vpop.f32.mrb[64].mxu0  ;;  %v5804_v52 = vpop.eup %5803  ;;  %3456 = vmatmul.mubr.bf16.gmra.mrb[112].mxu0 %v2434_v57  ;;  %v2819_v23 = vpack.c.bf16 %v2799_v24, %v2798_v39  ;;  %v2593_v15 = vmul.f32 %v2561_v31, %v8330_v60  ;;  %v3011_v5 = vadd.f32 1.0, %v5802_v11  ;;  %5823 = vtanh.f32 %v8366_v9 }
 0x3d0   : > { %v8394_v45 = vpop.f32.mrb[65].mxu0  ;;  %v5806_v51 = vpop.eup %5805  ;;  %v3042_v25 = vmul.f32 %v3010_v17, %v8339_v7  ;;  %v2384_v43 = vadd.f32 1.0, %v5804_v52  ;;  %5825 = vtanh.f32 %v8388_v22  ;;  %v8399_v48 = vmul.f32 0.5, %v8344_v30 }
 0x3d1   : > { %v8401_v61 = vpop.f32.mrb[66].mxu0  ;;  %v5808_v4 = vpop.eup %5807  ;;  %3609 = vmatmul.mubr.bf16.gmra.mrb[108].mxu1 %v2819_v23  ;;  %v2611_v41 = vpack.c.bf16 %v2593_v15, %v2592_v56  ;;  %v3043_v60 = vmul.f32 %v3011_v5, %v8347_v32  ;;  %v2385_v26 = vadd.f32 1.0, %v5806_v51  ;;  %v8405_v34 = vmul.f32 0.5, %v8349_v29 }
 0x3d2   : > { %v8407_v46 = vpop.f32.mrb[67].mxu0  ;;  %v5810_v7 = vpop.eup %5809  ;;  %v2416_v50 = vmul.f32 %v2384_v43, %v8300_v37  ;;  %v2768_v35 = vadd.f32 1.0, %v5808_v4  ;;  %5827 = vtanh.f32 %v8399_v48  ;;  %v2643_v53 = vmul.f32 %v8326_v8, %v8326_v8 }
 0x3d3   : > { %v5812_v58 = vpop.eup %5811  ;;  %3463 = vmatprep.mubr.bf16.mxu0 %v2611_v41  ;;  %v3062_v38 = vpack.c.bf16 %v3043_v60, %v3042_v25  ;;  %v2417_v32 = vmul.f32 %v2385_v26, %v8317_v12  ;;  %v2769_v42 = vadd.f32 1.0, %v5810_v7  ;;  %5829 = vtanh.f32 %v8405_v34 }
 0x3d4   : > { %v5814_v62 = vpop.eup %5813  ;;  %v2800_v59 = vmul.f32 %v2768_v35, %v8320_v49  ;;  %v2562_v0 = vadd.f32 1.0, %v5812_v58  ;;  %v2644_v37 = vmul.f32 %v8332_v20, %v8332_v20  ;;  %v2676_v2 = vsub.f32 %v2643_v53, %v7446_v40 }
 0x3d5   : > { %v5816_v13 = vpop.eup %5815  ;;  %3616 = vmatprep.mubr.bf16.mxu1 %v3062_v38  ;;  %v2435_v63 = vpack.c.bf16 %v2417_v32, %v2416_v50  ;;  %v2801_v36 = vmul.f32 %v2769_v42, %v8324_v21  ;;  %v2563_v1 = vadd.f32 1.0, %v5814_v62  ;;  %v2886_v12 = vmul.f32 %v8326_v8, %v7437_v28 }
 0x3d6   : > { %v5818_v19 = vpop.eup %5817  ;;  %v2594_v55 = vmul.f32 %v2562_v0, %v8336_v33  ;;  %v3012_v39 = vadd.f32 1.0, %v5816_v13  ;;  %v2677_v49 = vsub.f32 %v2644_v37, %v7446_v40  ;;  %v2853_v6 = vmul.f32 %v8326_v8, %v2676_v2 }
 0x3d7   : > { %v5820_v18 = vpop.eup %5819  ;;  %3464 = vmatmul.mubr.bf16.gmra.mrb[116].mxu0 %v2435_v63  ;;  %v2820_v57 = vpack.c.bf16 %v2801_v36, %v2800_v59  ;;  %v2595_v24 = vmul.f32 %v2563_v1, %v8342_v54  ;;  %v3013_v31 = vadd.f32 1.0, %v5818_v19  ;;  %v2887_v21 = vmul.f32 %v8332_v20, %v7437_v28 }
 0x3d8   : > { %v5822_v11 = vpop.eup %5821  ;;  %v3044_v56 = vmul.f32 %v3012_v39, %v8374_v47  ;;  %v2386_v17 = vadd.f32 1.0, %v5820_v18  ;;  %v2854_v33 = vmul.f32 %v8332_v20, %v2677_v49  ;;  %v2918_v52 = vsub.f32 %v2853_v6, %v2886_v12 }
 0x3d9   : > { %v5824_v23 = vpop.eup %5823  ;;  %3617 = vmatmul.mubr.bf16.gmra.mrb[112].mxu1 %v2820_v57  ;;  %v2612_v15 = vpack.c.bf16 %v2595_v24, %v2594_v55  ;;  %v3045_v8 = vmul.f32 %v3013_v31, %v8378_v27  ;;  %v2387_v5 = vadd.f32 1.0, %v5822_v11  ;;  %v8432_v51 = vmul.f32 0.5, %v8285_v10  ;;  %v4734_v54 = vpop.f32.mrb[68].mxu0  ;;  %v8468_v55 = vld [vmem:[%s9063_s5] ss:$0 sm:$0xff] }
 0x3da   : > { %v5826_v25 = vpop.eup %5825  ;;  %v2418_v43 = vmul.f32 %v2386_v17, %v8359_v3  ;;  %v2770_v4 = vadd.f32 1.0, %v5824_v23  ;;  %v2919_v41 = vsub.f32 %v2854_v33, %v2887_v21  ;;  %v8435_v47 = vmul.f32 0.5, %v2918_v52  ;;  %v4735_v60 = vpop.f32.mrb[69].mxu0 }
 0x3db   : > { %3471 = vmatprep.mubr.bf16.mxu0 %v2612_v15  ;;  %v3063_v20 = vpack.c.bf16 %v3045_v8, %v3044_v56  ;;  %v2419_v26 = vmul.f32 %v2387_v5, %v8363_v44  ;;  %v2771_v7 = vadd.f32 1.0, %v5826_v25  ;;  %v8439_v27 = vmul.f32 0.5, %v8289_v16  ;;  %v4737_v50 = vpop.f32.mrb[70].mxu0 }
 0x3dc   : > { %v5828_v10 = vpop.eup %5827  ;;  %v2802_v35 = vmul.f32 %v2770_v4, %v8366_v9  ;;  %v8442_v53 = vmul.f32 0.5, %v2919_v41  ;;  %5831 = vtanh.f32 %v8435_v47  ;;  %v8445_v3 = vmul.f32 0.5, %v2676_v2  ;;  %v4738_v58 = vpop.f32.mrb[71].mxu0 }
 0x3dd   : > { %v5830_v38 = vpop.eup %5829  ;;  %3624 = vmatprep.mubr.bf16.mxu1 %v3063_v20  ;;  %v2436_v32 = vpack.c.bf16 %v2419_v26, %v2418_v43  ;;  %v2803_v44 = vmul.f32 %v2771_v7, %v8388_v22  ;;  %v2564_v42 = vadd.f32 1.0, %v5828_v10  ;;  %5833 = vtanh.f32 %v8432_v51  ;;  %v4840_v16 = vpop.f32.mrb[64].mxu1 }
 0x3de   : > { %v2565_v62 = vadd.f32 1.0, %v5830_v38  ;;  %5835 = vtanh.f32 %v8442_v53  ;;  %v8450_v9 = vmul.f32 0.5, %v2677_v49  ;;  %v2645_v59 = vmul.f32 %v8344_v30, %v8344_v30  ;;  %v4841_v0 = vpop.f32.mrb[65].mxu1 }
 0x3df   : > { %3472 = vmatmul.mubr.bf16.gmra.mrb[120].mxu0 %v2436_v32  ;;  %v2821_v37 = vpack.c.bf16 %v2803_v44, %v2802_v35  ;;  %5837 = vtanh.f32 %v8439_v27  ;;  %v2646_v22 = vmul.f32 %v8349_v29, %v8349_v29  ;;  %v4843_v2 = vpop.f32.mrb[66].mxu1  ;;  %v2596_v13 = vmul.f32 %v2564_v42, %v8399_v48 }
 0x3e0   : > { %v2597_v63 = vmul.f32 %v2565_v62, %v8405_v34  ;;  %5839 = vtanh.f32 %v8445_v3  ;;  %v2678_v36 = vsub.f32 %v2645_v59, %v7446_v40  ;;  %v4844_v1 = vpop.f32.mrb[67].mxu1  ;;  %v2888_v19 = vmul.f32 %v8344_v30, %v7437_v28 }
 0x3e1   : > { %3625 = vmatmul.mubr.bf16.gmra.mrb[116].mxu1 %v2821_v37  ;;  %5841 = vtanh.f32 %v8450_v9  ;;  %v2679_v12 = vsub.f32 %v2646_v22, %v7446_v40  ;;  %v4730_v48 = vadd.f32 %v8394_v45, %v8390_v14  ;;  %v4733_v6 = vadd.f32 %v8407_v46, %v8401_v61 }
 0x3e2   : > { %v2613_v34 = vpack.c.bf16 %v2597_v63, %v2596_v13  ;;  %v2855_v39 = vmul.f32 %v8344_v30, %v2678_v36  ;;  %v8473_v49 = vmul.f32 0.5, %v2678_v36  ;;  %v2889_v18 = vmul.f32 %v8349_v29, %v7437_v28 }
 0x3e3   : > { %v2856_v40 = vmul.f32 %v8349_v29, %v2679_v12  ;;  %v2711_v57 = vmul.f32 0.5, %v2679_v12  ;;  %v4736_v24 = vadd.f32 %v4735_v60, %v4734_v54  ;;  %v3362_v14 = vadd.f32 %v4730_v48, %v8468_v55 }
 0x3e4   : > { %3479 = vmatprep.mubr.bf16.mxu0 %v2613_v34  ;;  %v2920_v31 = vsub.f32 %v2855_v39, %v2888_v19  ;;  %5843 = vtanh.f32 %v8473_v49  ;;  %v4842_v45 = vadd.f32 %v4841_v0, %v4840_v16  ;;  %v4739_v21 = vadd.f32 %v4738_v58, %v4737_v50 }
 0x3e5   : > { %v2921_v30 = vsub.f32 %v2856_v40, %v2889_v18  ;;  %5845 = vtanh.f32 %v2711_v57  ;;  %v3365_v61 = vadd.f32 %v4733_v6, %v8468_v55  ;;  %v4845_v46 = vadd.f32 %v4844_v1, %v4843_v2 }
 0x3e6   : > { %v5832_v11 = vpop.eup %5831  ;;  %v2952_v56 = vmul.f32 0.5, %v2920_v31  ;;  %v8483_v17 = vadd.f32 %v4842_v45, %v3362_v14  ;;  %v3370_v1 = vadd.f32 %v4736_v24, %v8468_v55  ;;  %v3373_v6 = vadd.f32 %v4739_v21, %v8468_v55 }
 0x3e7   : > { %v5834_v28 = vpop.eup %5833  ;;  %v3014_v29 = vadd.f32 1.0, %v5832_v11  ;;  %v2953_v33 = vmul.f32 0.5, %v2921_v30  ;;  %v8486_v15 = vadd.f32 %v4845_v46, %v3365_v61 }
 0x3e8   : > { %v5836_v52 = vpop.eup %5835  ;;  %v2388_v23 = vadd.f32 1.0, %v5834_v28  ;;  %5847 = vtanh.f32 %v2952_v56  ;;  %3652 = vadd.xlane.f32.xlu0 %v8483_v17 }
 0x3e9   : > { %v5838_v8 = vpop.eup %5837  ;;  %v3015_v5 = vadd.f32 1.0, %v5836_v52  ;;  %5849 = vtanh.f32 %v2953_v33  ;;  %3654 = vadd.xlane.f32.xlu1 %v8486_v15  ;;  %v3046_v4 = vmul.f32 %v3014_v29, %v8435_v47 }
 0x3ea   : > { %v5840_v54 = vpop.eup %5839  ;;  %v2389_v25 = vadd.f32 1.0, %v5838_v8  ;;  %v2420_v20 = vmul.f32 %v2388_v23, %v8432_v51 }
 0x3eb   : > { %v5842_v43 = vpop.eup %5841  ;;  %v3047_v41 = vmul.f32 %v3015_v5, %v8442_v53  ;;  %v2772_v60 = vadd.f32 1.0, %v5840_v54 }
 0x3ec   : > { %v2421_v26 = vmul.f32 %v2389_v25, %v8439_v27  ;;  %v2773_v7 = vadd.f32 1.0, %v5842_v43 }
 0x3ed   : > { %v3064_v50 = vpack.c.bf16 %v3047_v41, %v3046_v4  ;;  %v2804_v58 = vmul.f32 %v2772_v60, %v8445_v3 }
 0x3ee   : > { %v5844_v10 = vpop.eup %5843  ;;  %v2437_v35 = vpack.c.bf16 %v2421_v26, %v2420_v20  ;;  %v2805_v38 = vmul.f32 %v2773_v7, %v8450_v9  ;;  %v4740_v32 = vpop.f32.mrb[72].mxu0 }
 0x3ef   : > { %v5846_v44 = vpop.eup %5845  ;;  %3632 = vmatprep.mubr.bf16.mxu1 %v3064_v50  ;;  %v4741_v42 = vpop.f32.mrb[73].mxu0  ;;  %v2774_v22 = vadd.f32 1.0, %v5844_v10 }
 0x3f0   : > { %3480 = vmatmul.mubr.bf16.gmra.mrb[124].mxu0 %v2437_v35  ;;  %v2822_v47 = vpack.c.bf16 %v2805_v38, %v2804_v58  ;;  %v4742_v53 = vadd.f32 %v4741_v42, %v4740_v32  ;;  %v4743_v16 = vpop.f32.mrb[74].mxu0  ;;  %v2775_v62 = vadd.f32 1.0, %v5846_v44 }
 0x3f1   : > { %v4744_v51 = vpop.f32.mrb[75].mxu0  ;;  %v2806_v48 = vmul.f32 %v2774_v22, %v8473_v49 }
 0x3f2   : > { %v5848_v59 = vpop.eup %5847  ;;  %3633 = vmatmul.mubr.bf16.gmra.mrb[120].mxu1 %v2822_v47  ;;  %v4745_v27 = vadd.f32 %v4744_v51, %v4743_v16  ;;  %v2807_v13 = vmul.f32 %v2775_v62, %v2711_v57  ;;  %v3378_v61 = vadd.f32 %v4742_v53, %v8468_v55 }
 0x3f3   : > { %v5850_v0 = vpop.eup %5849  ;;  %v3016_v37 = vadd.f32 1.0, %v5848_v59 }
 0x3f4   : > { %v3017_v2 = vadd.f32 1.0, %v5850_v0  ;;  %v4846_v3 = vpop.f32.mrb[68].mxu1  ;;  %v2823_v31 = vpack.c.bf16 %v2807_v13, %v2806_v48 }
 0x3f5   : > { %v4847_v9 = vpop.f32.mrb[69].mxu1  ;;  %v3048_v63 = vmul.f32 %v3016_v37, %v2952_v56 }
 0x3f6   : > { %v3049_v36 = vmul.f32 %v3017_v2, %v2953_v33  ;;  %v4848_v12 = vadd.f32 %v4847_v9, %v4846_v3  ;;  %v4849_v19 = vpop.f32.mrb[70].mxu1  ;;  %v3381_v33 = vadd.f32 %v4745_v27, %v8468_v55 }
 0x3f7   : > { %v4850_v34 = vpop.f32.mrb[71].mxu1 }
 0x3f8   : > { %v3065_v39 = vpack.c.bf16 %v3049_v36, %v3048_v63  ;;  %v4851_v40 = vadd.f32 %v4850_v34, %v4849_v19  ;;  %v8498_v18 = vadd.f32 %v4848_v12, %v3370_v1 }
 0x3fa   : > { %3640 = vmatprep.mubr.bf16.mxu1 %v3065_v39  ;;  %3656 = vadd.xlane.f32.xlu0 %v8498_v18  ;;  %v8501_v57 = vadd.f32 %v4851_v40, %v3373_v6 }
 0x3fb   : > { %3641 = vmatmul.mubr.bf16.gmra.mrb[124].mxu1 %v2823_v31 }
 0x3fc   : > { %3658 = vadd.xlane.f32.xlu1 %v8501_v57 }
 0x402   : > { %v4746_v24 = vpop.f32.mrb[76].mxu0 }
 0x403   : > { %v4747_v14 = vpop.f32.mrb[77].mxu0 }
 0x404   : > { %v4748_v45 = vadd.f32 %v4747_v14, %v4746_v24  ;;  %v4749_v49 = vpop.f32.mrb[78].mxu0 }
 0x405   : > { %v4750_v30 = vpop.f32.mrb[79].mxu0 }
 0x406   : > { %v4852_v11 = vpop.f32.mrb[72].mxu1  ;;  %v4751_v56 = vadd.f32 %v4750_v30, %v4749_v49  ;;  %v3386_v26 = vadd.f32 %v4748_v45, %v8468_v55 }
 0x407   : > { %v4853_v21 = vpop.f32.mrb[73].mxu1 }
 0x408   : > { %v4854_v46 = vadd.f32 %v4853_v21, %v4852_v11  ;;  %v4855_v28 = vpop.f32.mrb[74].mxu1  ;;  %v3389_v35 = vadd.f32 %v4751_v56, %v8468_v55 }
 0x409   : > { %v4856_v29 = vpop.f32.mrb[75].mxu1 }
 0x40a   : > { %v4857_v52 = vadd.f32 %v4856_v29, %v4855_v28  ;;  %v8506_v23 = vadd.f32 %v4854_v46, %v3378_v61 }
 0x40c   : > { %3660 = vadd.xlane.f32.xlu0 %v8506_v23  ;;  %v8509_v8 = vadd.f32 %v4857_v52, %v3381_v33 }
 0x40e   : > { %3662 = vadd.xlane.f32.xlu1 %v8509_v8 }
 0x415   : > { %v4752_v5 = vpop.f32.mrb[80].mxu0 }
 0x416   : > { %v4753_v54 = vpop.f32.mrb[81].mxu0 }
 0x417   : > { %v4754_v25 = vadd.f32 %v4753_v54, %v4752_v5  ;;  %v4755_v43 = vpop.f32.mrb[82].mxu0 }
 0x418   : > { %v4756_v4 = vpop.f32.mrb[83].mxu0 }
 0x419   : > { %v4757_v41 = vadd.f32 %v4756_v4, %v4755_v43  ;;  %v3394_v27 = vadd.f32 %v4754_v25, %v8468_v55 }
 0x41b   : > { %v3397_v2 = vadd.f32 %v4757_v41, %v8468_v55 }
 0x41d   : > { %v4858_v60 = vpop.f32.mrb[76].mxu1 }
 0x41e   : > { %v4859_v20 = vpop.f32.mrb[77].mxu1 }
 0x41f   : > { %v4860_v7 = vadd.f32 %v4859_v20, %v4858_v60  ;;  %v4861_v50 = vpop.f32.mrb[78].mxu1 }
 0x420   : > { %v4862_v10 = vpop.f32.mrb[79].mxu1 }
 0x421   : > { %v4863_v58 = vadd.f32 %v4862_v10, %v4861_v50  ;;  %v8514_v38 = vadd.f32 %v4860_v7, %v3386_v26 }
 0x423   : > { %3664 = vadd.xlane.f32.xlu0 %v8514_v38  ;;  %v8517_v32 = vadd.f32 %v4863_v58, %v3389_v35 }
 0x425   : > { %3666 = vadd.xlane.f32.xlu1 %v8517_v32 }
 0x429   : > { %v4758_v44 = vpop.f32.mrb[84].mxu0 }
 0x42a   : > { %v4759_v42 = vpop.f32.mrb[85].mxu0 }
 0x42b   : > { %v4760_v47 = vadd.f32 %v4759_v42, %v4758_v44  ;;  %v4761_v53 = vpop.f32.mrb[86].mxu0 }
 0x42c   : > { %v4864_v16 = vpop.f32.mrb[80].mxu1  ;;  %v4762_v62 = vpop.f32.mrb[87].mxu0 }
 0x42d   : > { %v4865_v51 = vpop.f32.mrb[81].mxu1  ;;  %v4763_v59 = vadd.f32 %v4762_v62, %v4761_v53  ;;  %v3402_v39 = vadd.f32 %v4760_v47, %v8468_v55 }
 0x42e   : > { %v4866_v0 = vadd.f32 %v4865_v51, %v4864_v16  ;;  %v4867_v37 = vpop.f32.mrb[82].mxu1 }
 0x42f   : > { %v4868_v22 = vpop.f32.mrb[83].mxu1  ;;  %v3405_v14 = vadd.f32 %v4763_v59, %v8468_v55 }
 0x430   : > { %v4869_v3 = vadd.f32 %v4868_v22, %v4867_v37  ;;  %v8522_v13 = vadd.f32 %v4866_v0, %v3394_v27 }
 0x432   : > { %3668 = vadd.xlane.f32.xlu0 %v8522_v13  ;;  %v8525_v9 = vadd.f32 %v4869_v3, %v3397_v2 }
 0x434   : > { %3670 = vadd.xlane.f32.xlu1 %v8525_v9  ;;  %v4764_v63 = vpop.f32.mrb[88].mxu0 }
 0x435   : > { %v4765_v36 = vpop.f32.mrb[89].mxu0 }
 0x436   : > { %v4870_v1 = vpop.f32.mrb[84].mxu1  ;;  %v4766_v12 = vadd.f32 %v4765_v36, %v4764_v63  ;;  %v4767_v19 = vpop.f32.mrb[90].mxu0 }
 0x437   : > { %v4871_v48 = vpop.f32.mrb[85].mxu1  ;;  %v4768_v34 = vpop.f32.mrb[91].mxu0 }
 0x438   : > { %v4872_v6 = vadd.f32 %v4871_v48, %v4870_v1  ;;  %v4873_v40 = vpop.f32.mrb[86].mxu1  ;;  %v4769_v31 = vadd.f32 %v4768_v34, %v4767_v19  ;;  %v3410_v52 = vadd.f32 %v4766_v12, %v8468_v55 }
 0x439   : > { %v4874_v24 = vpop.f32.mrb[87].mxu1 }
 0x43a   : > { %v4875_v45 = vadd.f32 %v4874_v24, %v4873_v40  ;;  %v8530_v49 = vadd.f32 %v4872_v6, %v3402_v39  ;;  %v3413_v43 = vadd.f32 %v4769_v31, %v8468_v55 }
 0x43c   : > { %3672 = vadd.xlane.f32.xlu0 %v8530_v49  ;;  %v8533_v30 = vadd.f32 %v4875_v45, %v3405_v14 }
 0x43d   : > { %v4770_v11 = vpop.f32.mrb[92].mxu0 }
 0x43e   : > { %3674 = vadd.xlane.f32.xlu1 %v8533_v30  ;;  %v4771_v56 = vpop.f32.mrb[93].mxu0 }
 0x43f   : > { %v4772_v21 = vadd.f32 %v4771_v56, %v4770_v11  ;;  %v4773_v61 = vpop.f32.mrb[94].mxu0 }
 0x440   : > { %v4774_v46 = vpop.f32.mrb[95].mxu0 }
 0x441   : > { %v4876_v28 = vpop.f32.mrb[88].mxu1  ;;  %v4775_v29 = vadd.f32 %v4774_v46, %v4773_v61  ;;  %v3418_v42 = vadd.f32 %v4772_v21, %v8468_v55 }
 0x442   : > { %v4877_v33 = vpop.f32.mrb[89].mxu1 }
 0x443   : > { %v4878_v5 = vadd.f32 %v4877_v33, %v4876_v28  ;;  %v4879_v54 = vpop.f32.mrb[90].mxu1  ;;  %v3421_v62 = vadd.f32 %v4775_v29, %v8468_v55 }
 0x444   : > { %v4880_v25 = vpop.f32.mrb[91].mxu1 }
 0x445   : > { %v4881_v4 = vadd.f32 %v4880_v25, %v4879_v54  ;;  %v8538_v41 = vadd.f32 %v4878_v5, %v3410_v52 }
 0x447   : > { %3676 = vadd.xlane.f32.xlu0 %v8538_v41  ;;  %v8541_v60 = vadd.f32 %v4881_v4, %v3413_v43 }
 0x448   : > { %v4776_v20 = vpop.f32.mrb[96].mxu0 }
 0x449   : > { %3678 = vadd.xlane.f32.xlu1 %v8541_v60  ;;  %v4777_v26 = vpop.f32.mrb[97].mxu0 }
 0x44a   : > { %v4778_v7 = vadd.f32 %v4777_v26, %v4776_v20  ;;  %v4779_v50 = vpop.f32.mrb[98].mxu0 }
 0x44b   : > { %v4780_v10 = vpop.f32.mrb[99].mxu0 }
 0x44c   : > { %v4781_v35 = vadd.f32 %v4780_v10, %v4779_v50  ;;  %v3426_v12 = vadd.f32 %v4778_v7, %v8468_v55 }
 0x44d   : > { %v4882_v58 = vpop.f32.mrb[92].mxu1 }
 0x44e   : > { %v4883_v44 = vpop.f32.mrb[93].mxu1  ;;  %v3429_v39 = vadd.f32 %v4781_v35, %v8468_v55 }
 0x44f   : > { %v4884_v47 = vadd.f32 %v4883_v44, %v4882_v58  ;;  %v4885_v53 = vpop.f32.mrb[94].mxu1 }
 0x450   : > { %v4886_v16 = vpop.f32.mrb[95].mxu1 }
 0x451   : > { %v4887_v51 = vadd.f32 %v4886_v16, %v4885_v53  ;;  %v8546_v59 = vadd.f32 %v4884_v47, %v3418_v42 }
 0x453   : > { %3680 = vadd.xlane.f32.xlu0 %v8546_v59  ;;  %v8549_v27 = vadd.f32 %v4887_v51, %v3421_v62  ;;  %v4782_v0 = vpop.f32.mrb[100].mxu0 }
 0x454   : > { %v4783_v37 = vpop.f32.mrb[101].mxu0 }
 0x455   : > { %3682 = vadd.xlane.f32.xlu1 %v8549_v27  ;;  %v4784_v22 = vadd.f32 %v4783_v37, %v4782_v0  ;;  %v4785_v2 = vpop.f32.mrb[102].mxu0 }
 0x456   : > { %v4786_v3 = vpop.f32.mrb[103].mxu0 }
 0x457   : > { %v4787_v63 = vadd.f32 %v4786_v3, %v4785_v2  ;;  %v3434_v28 = vadd.f32 %v4784_v22, %v8468_v55 }
 0x459   : > { %v3437_v5 = vadd.f32 %v4787_v63, %v8468_v55 }
 0x45a   : > { %v4888_v36 = vpop.f32.mrb[96].mxu1 }
 0x45b   : > { %v4889_v1 = vpop.f32.mrb[97].mxu1 }
 0x45c   : > { %v4890_v19 = vadd.f32 %v4889_v1, %v4888_v36  ;;  %v4891_v48 = vpop.f32.mrb[98].mxu1 }
 0x45d   : > { %v4892_v34 = vpop.f32.mrb[99].mxu1 }
 0x45e   : > { %v4893_v6 = vadd.f32 %v4892_v34, %v4891_v48  ;;  %v8554_v40 = vadd.f32 %v4890_v19, %v3426_v12 }
 0x45f   : > { %v4788_v31 = vpop.f32.mrb[104].mxu0 }
 0x460   : > { %3684 = vadd.xlane.f32.xlu0 %v8554_v40  ;;  %v8557_v24 = vadd.f32 %v4893_v6, %v3429_v39  ;;  %v4789_v14 = vpop.f32.mrb[105].mxu0 }
 0x461   : > { %v4790_v45 = vadd.f32 %v4789_v14, %v4788_v31  ;;  %v4791_v11 = vpop.f32.mrb[106].mxu0 }
 0x462   : > { %3686 = vadd.xlane.f32.xlu1 %v8557_v24  ;;  %v4792_v56 = vpop.f32.mrb[107].mxu0 }
 0x463   : > { %v4793_v21 = vadd.f32 %v4792_v56, %v4791_v11  ;;  %v3442_v26 = vadd.f32 %v4790_v45, %v8468_v55 }
 0x464   : > { %v4894_v61 = vpop.f32.mrb[100].mxu1 }
 0x465   : > { %v4895_v46 = vpop.f32.mrb[101].mxu1  ;;  %v3445_v35 = vadd.f32 %v4793_v21, %v8468_v55 }
 0x466   : > { %v4896_v29 = vadd.f32 %v4895_v46, %v4894_v61  ;;  %v4897_v33 = vpop.f32.mrb[102].mxu1 }
 0x467   : > { %v4898_v52 = vpop.f32.mrb[103].mxu1 }
 0x468   : > { %v4899_v54 = vadd.f32 %v4898_v52, %v4897_v33  ;;  %v8562_v25 = vadd.f32 %v4896_v29, %v3434_v28 }
 0x46a   : > { %3688 = vadd.xlane.f32.xlu0 %v8562_v25  ;;  %v8565_v43 = vadd.f32 %v4899_v54, %v3437_v5 }
 0x46c   : > { %3690 = vadd.xlane.f32.xlu1 %v8565_v43 }
 0x470   : > { %v4900_v4 = vpop.f32.mrb[104].mxu1 }
 0x471   : > { %v4901_v20 = vpop.f32.mrb[105].mxu1 }
 0x472   : > { %v4902_v7 = vadd.f32 %v4901_v20, %v4900_v4  ;;  %v4903_v50 = vpop.f32.mrb[106].mxu1 }
 0x473   : > { %v4904_v10 = vpop.f32.mrb[107].mxu1 }
 0x474   : > { %v4905_v58 = vadd.f32 %v4904_v10, %v4903_v50  ;;  %v8570_v44 = vadd.f32 %v4902_v7, %v3442_v26 }
 0x476   : > { %3692 = vadd.xlane.f32.xlu0 %v8570_v44  ;;  %v8573_v42 = vadd.f32 %v4905_v58, %v3445_v35 }
 0x478   : > { %3694 = vadd.xlane.f32.xlu1 %v8573_v42 }
 0x497   : > { %v4794_v47 = vpop.f32.mrb[108].mxu0 }
 0x498   : > { %v4795_v53 = vpop.f32.mrb[109].mxu0 }
 0x499   : > { %v4796_v16 = vadd.f32 %v4795_v53, %v4794_v47  ;;  %v4797_v62 = vpop.f32.mrb[110].mxu0 }
 0x49a   : > { %v4798_v51 = vpop.f32.mrb[111].mxu0 }
 0x49b   : > { %v4799_v0 = vadd.f32 %v4798_v51, %v4797_v62  ;;  %v3450_v12 = vadd.f32 %v4796_v16, %v8468_v55 }
 0x49d   : > { %v3453_v6 = vadd.f32 %v4799_v0, %v8468_v55 }
 0x4a2   : > { %v4800_v37 = vpop.f32.mrb[112].mxu0 }
 0x4a3   : > { %v4801_v22 = vpop.f32.mrb[113].mxu0 }
 0x4a4   : > { %v4906_v2 = vpop.f32.mrb[108].mxu1  ;;  %v4802_v3 = vadd.f32 %v4801_v22, %v4800_v37  ;;  %v4803_v63 = vpop.f32.mrb[114].mxu0 }
 0x4a5   : > { %v4907_v36 = vpop.f32.mrb[109].mxu1  ;;  %v4804_v1 = vpop.f32.mrb[115].mxu0 }
 0x4a6   : > { %v4908_v19 = vadd.f32 %v4907_v36, %v4906_v2  ;;  %v4909_v48 = vpop.f32.mrb[110].mxu1  ;;  %v4805_v34 = vadd.f32 %v4804_v1, %v4803_v63  ;;  %v3458_v33 = vadd.f32 %v4802_v3, %v8468_v55 }
 0x4a7   : > { %v4910_v39 = vpop.f32.mrb[111].mxu1 }
 0x4a8   : > { %v4911_v31 = vadd.f32 %v4910_v39, %v4909_v48  ;;  %v8578_v14 = vadd.f32 %v4908_v19, %v3450_v12  ;;  %v3461_v20 = vadd.f32 %v4805_v34, %v8468_v55  ;;  %v3653_v19 = vpop.xlane.xlu0 %3652 }
 0x4aa   : > { %3696 = vadd.xlane.f32.xlu0 %v8578_v14  ;;  %v8581_v45 = vadd.f32 %v4911_v31, %v3453_v6  ;;  %v4806_v11 = vpop.f32.mrb[116].mxu0 }
 0x4ab   : > { %v4807_v56 = vpop.f32.mrb[117].mxu0 }
 0x4ac   : > { %3698 = vadd.xlane.f32.xlu1 %v8581_v45  ;;  %v4912_v21 = vpop.f32.mrb[112].mxu1  ;;  %v4808_v61 = vadd.f32 %v4807_v56, %v4806_v11  ;;  %v4809_v46 = vpop.f32.mrb[118].mxu0 }
 0x4ad   : > { %v4913_v28 = vpop.f32.mrb[113].mxu1  ;;  %v4810_v29 = vpop.f32.mrb[119].mxu0 }
 0x4ae   : > { %v4914_v52 = vadd.f32 %v4913_v28, %v4912_v21  ;;  %v4915_v5 = vpop.f32.mrb[114].mxu1  ;;  %v4811_v54 = vadd.f32 %v4810_v29, %v4809_v46  ;;  %v3466_v51 = vadd.f32 %v4808_v61, %v8468_v55  ;;  %v3716_v29 = vmul.f32 0.0625, %v3653_v19 }
 0x4af   : > { %v4916_v4 = vpop.f32.mrb[115].mxu1 }
 0x4b0   : > { %v4917_v26 = vadd.f32 %v4916_v4, %v4915_v5  ;;  %v8586_v7 = vadd.f32 %v4914_v52, %v3458_v33  ;;  %v3469_v3 = vadd.f32 %v4811_v54, %v8468_v55  ;;  %v3655_v33 = vpop.xlane.xlu1 %3654  ;;  %v3657_v4 = vpop.xlane.xlu0 %3656 }
 0x4b2   : > { %3700 = vadd.xlane.f32.xlu0 %v8586_v7  ;;  %v8589_v50 = vadd.f32 %v4917_v26, %v3461_v20  ;;  %v4812_v10 = vpop.f32.mrb[120].mxu0  ;;  %v3717_v26 = vmul.f32 0.0625, %v3655_v33 }
 0x4b3   : > { %v4813_v35 = vpop.f32.mrb[121].mxu0 }
 0x4b4   : > { %3702 = vadd.xlane.f32.xlu1 %v8589_v50  ;;  %v4918_v58 = vpop.f32.mrb[116].mxu1  ;;  %v4814_v47 = vadd.f32 %v4813_v35, %v4812_v10  ;;  %v4815_v53 = vpop.f32.mrb[122].mxu0  ;;  %v3748_v10 = vsub.f32 %v8483_v17, %v3716_v29  ;;  %v3718_v35 = vmul.f32 0.0625, %v3657_v4 }
 0x4b5   : > { %v4919_v16 = vpop.f32.mrb[117].mxu1  ;;  %v4816_v62 = vpop.f32.mrb[123].mxu0 }
 0x4b6   : > { %v4920_v0 = vadd.f32 %v4919_v16, %v4918_v58  ;;  %v4921_v37 = vpop.f32.mrb[118].mxu1  ;;  %v4817_v22 = vadd.f32 %v4816_v62, %v4815_v53  ;;  %v3474_v56 = vadd.f32 %v4814_v47, %v8468_v55  ;;  %v3659_v58 = vpop.xlane.xlu1 %3658  ;;  %v8612_v47 = vld [vmem:[%s9063_s5 + $0x3] ss:$0 sm:$0xff]  ;;  %v3750_v17 = vsub.f32 %v8498_v18, %v3718_v35 }
 0x4b7   : > { %v4922_v2 = vpop.f32.mrb[119].mxu1  ;;  %v3661_v16 = vpop.xlane.xlu0 %3660 }
 0x4b8   : > { %v4923_v63 = vadd.f32 %v4922_v2, %v4921_v37  ;;  %v8594_v36 = vadd.f32 %v4920_v0, %v3466_v51  ;;  %v3477_v52 = vadd.f32 %v4817_v22, %v8468_v55  ;;  %v3749_v51 = vsub.f32 %v8486_v15, %v3717_v26 }
 0x4b9   : > { %v3719_v0 = vmul.f32 0.0625, %v3659_v58  ;;  %v3720_v19 = vmul.f32 0.0625, %v3661_v16 }
 0x4ba   : > { %3704 = vadd.xlane.f32.xlu0 %v8594_v36  ;;  %v8597_v1 = vadd.f32 %v4923_v63, %v3469_v3  ;;  %v3663_v3 = vpop.xlane.xlu1 %3662  ;;  %v8628_v18 = vmul.f32 %v8612_v47, %v3749_v51 }
 0x4bb   : > { %v3751_v15 = vsub.f32 %v8501_v57, %v3719_v0 }
 0x4bc   : > { %3706 = vadd.xlane.f32.xlu1 %v8597_v1 }
 0x4c3   : > { %v4818_v12 = vpop.f32.mrb[124].mxu0 }
 0x4c4   : > { %v4819_v48 = vpop.f32.mrb[125].mxu0 }
 0x4c5   : > { %v4924_v34 = vpop.f32.mrb[120].mxu1  ;;  %v4820_v39 = vadd.f32 %v4819_v48, %v4818_v12  ;;  %v4821_v6 = vpop.f32.mrb[126].mxu0  ;;  %v8618_v12 = vmul.f32 %v8612_v47, %v3748_v10 }
 0x4c6   : > { %v4925_v31 = vpop.f32.mrb[121].mxu1  ;;  %v4822_v11 = vpop.f32.mrb[127].mxu0 }
 0x4c7   : > { %v4926_v21 = vadd.f32 %v4925_v31, %v4924_v34  ;;  %v4927_v61 = vpop.f32.mrb[122].mxu1  ;;  %v4823_v46 = vadd.f32 %v4822_v11, %v4821_v6  ;;  %v3482_v37 = vadd.f32 %v4820_v39, %v8468_v55  ;;  %v3665_v31 = vpop.xlane.xlu0 %3664  ;;  %v3721_v11 = vmul.f32 0.0625, %v3663_v3 }
 0x4c8   : > { %v4928_v28 = vpop.f32.mrb[123].mxu1  ;;  %v3816_v57 = vmul.f32 %v8618_v12, %v8618_v12 }
 0x4c9   : > { %v4929_v5 = vadd.f32 %v4928_v28, %v4927_v61  ;;  %v8602_v54 = vadd.f32 %v4926_v21, %v3474_v56  ;;  %v3485_v48 = vadd.f32 %v4823_v46, %v8468_v55  ;;  %v3667_v56 = vpop.xlane.xlu1 %3666  ;;  %v8631_v21 = vmul.f32 %v8612_v47, %v3750_v17 }
 0x4ca   : > { %v3752_v55 = vsub.f32 %v8506_v23, %v3720_v19  ;;  %v3722_v61 = vmul.f32 0.0625, %v3665_v31  ;;  %v8638_v28 = vmul.f32 %v8612_v47, %v3751_v15  ;;  %v3753_v29 = vsub.f32 %v8509_v8, %v3721_v11 }
 0x4cb   : > { %3708 = vadd.xlane.f32.xlu0 %v8602_v54  ;;  %v8605_v20 = vadd.f32 %v4929_v5, %v3477_v52  ;;  %v3669_v46 = vpop.xlane.xlu0 %3668  ;;  %v3723_v33 = vmul.f32 0.0625, %v3667_v56  ;;  %v3817_v52 = vmul.f32 %v8628_v18, %v8628_v18  ;;  %v3818_v10 = vmul.f32 %v8631_v21, %v8631_v21 }
 0x4cc   : > { %v8644_v23 = vmul.f32 %v8612_v47, %v3752_v55  ;;  %v3754_v4 = vsub.f32 %v8514_v38, %v3722_v61  ;;  %v3724_v26 = vmul.f32 0.0625, %v3669_v46  ;;  %v8650_v58 = vmul.f32 %v8612_v47, %v3753_v29 }
 0x4cd   : > { %3710 = vadd.xlane.f32.xlu1 %v8605_v20  ;;  %v3671_v5 = vpop.xlane.xlu1 %3670  ;;  %v3755_v8 = vsub.f32 %v8517_v32, %v3723_v33  ;;  %v3819_v16 = vmul.f32 %v8638_v28, %v8638_v28 }
 0x4ce   : > { %v4930_v53 = vpop.f32.mrb[124].mxu1  ;;  %v8656_v51 = vmul.f32 %v8612_v47, %v3754_v4  ;;  %v3756_v38 = vsub.f32 %v8522_v13, %v3724_v26  ;;  %v3821_v3 = vmul.f32 %v8650_v58, %v8650_v58 }
 0x4cf   : > { %v4931_v62 = vpop.f32.mrb[125].mxu1  ;;  %v3673_v35 = vpop.xlane.xlu0 %3672 }
 0x4d0   : > { %v4932_v22 = vadd.f32 %v4931_v62, %v4930_v53  ;;  %v4933_v2 = vpop.f32.mrb[126].mxu1  ;;  %v3725_v53 = vmul.f32 0.0625, %v3671_v5  ;;  %v3726_v0 = vmul.f32 0.0625, %v3673_v35  ;;  %v8668_v19 = vmul.f32 %v8612_v47, %v3756_v38 }
 0x4d1   : > { %v4934_v63 = vpop.f32.mrb[127].mxu1  ;;  %v3675_v62 = vpop.xlane.xlu1 %3674 }
 0x4d2   : > { %v4935_v34 = vadd.f32 %v4934_v63, %v4933_v2  ;;  %v8621_v6 = vadd.f32 %v4932_v22, %v3482_v37  ;;  %v3820_v37 = vmul.f32 %v8644_v23, %v8644_v23  ;;  %v8662_v2 = vmul.f32 %v8612_v47, %v3755_v8 }
 0x4d3   : > { %v3757_v32 = vsub.f32 %v8525_v9, %v3725_v53  ;;  %v3727_v17 = vmul.f32 0.0625, %v3675_v62  ;;  %v3758_v13 = vsub.f32 %v8530_v49, %v3726_v0  ;;  %v3824_v46 = vmul.f32 %v8668_v19, %v8668_v19 }
 0x4d4   : > { %3712 = vadd.xlane.f32.xlu0 %v8621_v6  ;;  %v8625_v39 = vadd.f32 %v4935_v34, %v3485_v48  ;;  %v3677_v22 = vpop.xlane.xlu0 %3676  ;;  %v3822_v34 = vmul.f32 %v8656_v51, %v8656_v51  ;;  %v3823_v56 = vmul.f32 %v8662_v2, %v8662_v2 }
 0x4d5   : > { %v3728_v48 = vmul.f32 0.0625, %v3677_v22  ;;  %v8674_v15 = vmul.f32 %v8612_v47, %v3757_v32  ;;  %v3759_v9 = vsub.f32 %v8533_v30, %v3727_v17  ;;  %v8680_v61 = vmul.f32 %v8612_v47, %v3758_v13 }
 0x4d6   : > { %3714 = vadd.xlane.f32.xlu1 %v8625_v39  ;;  %v3679_v63 = vpop.xlane.xlu1 %3678 }
 0x4d7   : > { %v3729_v11 = vmul.f32 0.0625, %v3679_v63  ;;  %v3760_v49 = vsub.f32 %v8538_v41, %v3728_v48  ;;  %v8686_v29 = vmul.f32 %v8612_v47, %v3759_v9  ;;  %v3826_v4 = vmul.f32 %v8680_v61, %v8680_v61 }
 0x4d8   : > { %3848 = vadd.xlane.f32.xlu0 %v3816_v57 }
 0x4d9   : > { %v3761_v30 = vsub.f32 %v8541_v60, %v3729_v11  ;;  %v8692_v5 = vmul.f32 %v8612_v47, %v3760_v49  ;;  %v3827_v60 = vmul.f32 %v8686_v29, %v8686_v29 }
 0x4da   : > { %3850 = vadd.xlane.f32.xlu1 %v3817_v52  ;;  %v3825_v52 = vmul.f32 %v8674_v15, %v8674_v15 }
 0x4db   : > { %v8698_v26 = vmul.f32 %v8612_v47, %v3761_v30 }
 0x4dc   : > { %3852 = vadd.xlane.f32.xlu0 %v3818_v10 }
 0x4dd   : > { %v3829_v0 = vmul.f32 %v8698_v26, %v8698_v26 }
 0x4de   : > { %3854 = vadd.xlane.f32.xlu1 %v3819_v16 }
 0x4e0   : > { %3856 = vadd.xlane.f32.xlu0 %v3820_v37  ;;  %v3681_v31 = vpop.xlane.xlu0 %3680 }
 0x4e1   : > { %v3730_v57 = vmul.f32 0.0625, %v3681_v31 }
 0x4e2   : > { %3858 = vadd.xlane.f32.xlu1 %v3821_v3  ;;  %v3683_v55 = vpop.xlane.xlu1 %3682 }
 0x4e3   : > { %v3731_v33 = vmul.f32 0.0625, %v3683_v55  ;;  %v3762_v41 = vsub.f32 %v8546_v59, %v3730_v57  ;;  %v3828_v59 = vmul.f32 %v8692_v5, %v8692_v5 }
 0x4e4   : > { %3860 = vadd.xlane.f32.xlu0 %v3822_v34 }
 0x4e5   : > { %v3763_v10 = vsub.f32 %v8549_v27, %v3731_v33  ;;  %v8704_v8 = vmul.f32 %v8612_v47, %v3762_v41 }
 0x4e6   : > { %3862 = vadd.xlane.f32.xlu1 %v3823_v56 }
 0x4e7   : > { %v8709_v62 = vmul.f32 %v8612_v47, %v3763_v10  ;;  %v3830_v32 = vmul.f32 %v8704_v8, %v8704_v8 }
 0x4e8   : > { %3864 = vadd.xlane.f32.xlu0 %v3824_v46 }
 0x4ea   : > { %3866 = vadd.xlane.f32.xlu1 %v3825_v52 }
 0x4ec   : > { %3868 = vadd.xlane.f32.xlu0 %v3826_v4 }
 0x4ed   : > { %v3685_v35 = vpop.xlane.xlu0 %3684 }
 0x4ee   : > { %v3732_v53 = vmul.f32 0.0625, %v3685_v35  ;;  %3870 = vadd.xlane.f32.xlu1 %v3827_v60 }
 0x4ef   : > { %v3687_v16 = vpop.xlane.xlu1 %3686 }
 0x4f0   : > { %v3764_v38 = vsub.f32 %v8554_v40, %v3732_v53  ;;  %v3733_v27 = vmul.f32 0.0625, %v3687_v16  ;;  %3872 = vadd.xlane.f32.xlu0 %v3828_v59  ;;  %v3831_v40 = vmul.f32 %v8709_v62, %v8709_v62 }
 0x4f2   : > { %v8715_v37 = vmul.f32 %v8612_v47, %v3764_v38  ;;  %v3765_v22 = vsub.f32 %v8557_v24, %v3733_v27  ;;  %3874 = vadd.xlane.f32.xlu1 %v3829_v0 }
 0x4f4   : > { %v8721_v17 = vmul.f32 %v8612_v47, %v3765_v22  ;;  %3876 = vadd.xlane.f32.xlu0 %v3830_v32  ;;  %v3832_v3 = vmul.f32 %v8715_v37, %v8715_v37 }
 0x4f6   : > { %3878 = vadd.xlane.f32.xlu1 %v3831_v40  ;;  %v3833_v24 = vmul.f32 %v8721_v17, %v8721_v17 }
 0x4f7   : > { %v3689_v63 = vpop.xlane.xlu0 %3688 }
 0x4f8   : > { %v3734_v13 = vmul.f32 0.0625, %v3689_v63  ;;  %3880 = vadd.xlane.f32.xlu0 %v3832_v3 }
 0x4f9   : > { %v3691_v48 = vpop.xlane.xlu1 %3690 }
 0x4fa   : > { %v3766_v34 = vsub.f32 %v8562_v25, %v3734_v13  ;;  %v3735_v31 = vmul.f32 0.0625, %v3691_v48  ;;  %3882 = vadd.xlane.f32.xlu1 %v3833_v24 }
 0x4fc   : > { %v8731_v9 = vmul.f32 %v8612_v47, %v3766_v34  ;;  %v3767_v11 = vsub.f32 %v8565_v43, %v3735_v31 }
 0x4fe   : > { %v8735_v56 = vmul.f32 %v8612_v47, %v3767_v11  ;;  %v3834_v55 = vmul.f32 %v8731_v9, %v8731_v9 }
 0x500   : > { %3884 = vadd.xlane.f32.xlu0 %v3834_v55  ;;  %v3835_v49 = vmul.f32 %v8735_v56, %v8735_v56 }
 0x502   : > { %3886 = vadd.xlane.f32.xlu1 %v3835_v49 }
 0x503   : > { %v3693_v57 = vpop.xlane.xlu0 %3692 }
 0x504   : > { %v3736_v25 = vmul.f32 0.0625, %v3693_v57 }
 0x505   : > { %v3695_v46 = vpop.xlane.xlu1 %3694 }
 0x506   : > { %v3768_v30 = vsub.f32 %v8570_v44, %v3736_v25  ;;  %v3737_v33 = vmul.f32 0.0625, %v3695_v46 }
 0x508   : > { %v8743_v52 = vmul.f32 %v8612_v47, %v3768_v30  ;;  %v3769_v43 = vsub.f32 %v8573_v42, %v3737_v33 }
 0x50a   : > { %v8747_v41 = vmul.f32 %v8612_v47, %v3769_v43  ;;  %v3836_v4 = vmul.f32 %v8743_v52, %v8743_v52 }
 0x50c   : > { %3888 = vadd.xlane.f32.xlu0 %v3836_v4  ;;  %v3837_v10 = vmul.f32 %v8747_v41, %v8747_v41 }
 0x50e   : > { %3890 = vadd.xlane.f32.xlu1 %v3837_v10 }
 0x537   : > { %v3697_v60 = vpop.xlane.xlu0 %3696 }
 0x538   : > { %v3738_v35 = vmul.f32 0.0625, %v3697_v60 }
 0x539   : > { %v3699_v44 = vpop.xlane.xlu1 %3698 }
 0x53a   : > { %v3770_v53 = vsub.f32 %v8578_v14, %v3738_v35  ;;  %v3739_v59 = vmul.f32 0.0625, %v3699_v44 }
 0x53c   : > { %v8755_v16 = vmul.f32 %v8612_v47, %v3770_v53  ;;  %v3771_v42 = vsub.f32 %v8581_v45, %v3739_v59 }
 0x53e   : > { %v8759_v38 = vmul.f32 %v8612_v47, %v3771_v42  ;;  %v3838_v27 = vmul.f32 %v8755_v16, %v8755_v16 }
 0x53f   : > { %v3701_v0 = vpop.xlane.xlu0 %3700 }
 0x540   : > { %v3740_v22 = vmul.f32 0.0625, %v3701_v0  ;;  %3892 = vadd.xlane.f32.xlu0 %v3838_v27  ;;  %v3839_v32 = vmul.f32 %v8759_v38, %v8759_v38 }
 0x541   : > { %v3703_v40 = vpop.xlane.xlu1 %3702 }
 0x542   : > { %v3772_v14 = vsub.f32 %v8586_v7, %v3740_v22  ;;  %v3741_v3 = vmul.f32 0.0625, %v3703_v40  ;;  %3894 = vadd.xlane.f32.xlu1 %v3839_v32 }
 0x544   : > { %v8767_v63 = vmul.f32 %v8612_v47, %v3772_v14  ;;  %v3773_v45 = vsub.f32 %v8589_v50, %v3741_v3 }
 0x546   : > { %v8771_v13 = vmul.f32 %v8612_v47, %v3773_v45  ;;  %v3840_v24 = vmul.f32 %v8767_v63, %v8767_v63 }
 0x547   : > { %v3705_v48 = vpop.xlane.xlu0 %3704 }
 0x548   : > { %v3742_v34 = vmul.f32 0.0625, %v3705_v48  ;;  %3896 = vadd.xlane.f32.xlu0 %v3840_v24  ;;  %v3841_v31 = vmul.f32 %v8771_v13, %v8771_v13 }
 0x549   : > { %v3707_v7 = vpop.xlane.xlu1 %3706 }
 0x54a   : > { %v3774_v11 = vsub.f32 %v8594_v36, %v3742_v34  ;;  %v3743_v55 = vmul.f32 0.0625, %v3707_v7  ;;  %3898 = vadd.xlane.f32.xlu1 %v3841_v31 }
 0x54c   : > { %v8779_v49 = vmul.f32 %v8612_v47, %v3774_v11  ;;  %v3775_v50 = vsub.f32 %v8597_v1, %v3743_v55 }
 0x54e   : > { %v8783_v57 = vmul.f32 %v8612_v47, %v3775_v50  ;;  %v3842_v25 = vmul.f32 %v8779_v49, %v8779_v49 }
 0x550   : > { %3900 = vadd.xlane.f32.xlu0 %v3842_v25  ;;  %v3843_v46 = vmul.f32 %v8783_v57, %v8783_v57 }
 0x552   : > { %3902 = vadd.xlane.f32.xlu1 %v3843_v46 }
 0x558   : > { %v3709_v30 = vpop.xlane.xlu0 %3708 }
 0x559   : > { %v3744_v36 = vmul.f32 0.0625, %v3709_v30 }
 0x55a   : > { %v3711_v33 = vpop.xlane.xlu1 %3710 }
 0x55b   : > { %v3776_v43 = vsub.f32 %v8602_v54, %v3744_v36  ;;  %v3745_v4 = vmul.f32 0.0625, %v3711_v33 }
 0x55d   : > { %v8791_v10 = vmul.f32 %v8612_v47, %v3776_v43  ;;  %v3777_v1 = vsub.f32 %v8605_v20, %v3745_v4 }
 0x55f   : > { %v8795_v60 = vmul.f32 %v8612_v47, %v3777_v1  ;;  %v3844_v35 = vmul.f32 %v8791_v10, %v8791_v10 }
 0x561   : > { %v3713_v44 = vpop.xlane.xlu0 %3712  ;;  %3904 = vadd.xlane.f32.xlu0 %v3844_v35  ;;  %v3845_v53 = vmul.f32 %v8795_v60, %v8795_v60  ;;  %v8816_v35 = vld [vmem:[%s9063_s5 + $0x1] ss:$0 sm:$0xff] }
 0x562   : > { %v3746_v59 = vmul.f32 0.0625, %v3713_v44 }
 0x563   : > { %v3715_v42 = vpop.xlane.xlu1 %3714  ;;  %3906 = vadd.xlane.f32.xlu1 %v3845_v53 }
 0x564   : > { %v3778_v54 = vsub.f32 %v8621_v6, %v3746_v59  ;;  %v3747_v27 = vmul.f32 0.0625, %v3715_v42 }
 0x565   : > { %v3849_v0 = vpop.xlane.xlu0 %3848 }
 0x566   : > { %v8803_v20 = vmul.f32 %v8612_v47, %v3778_v54  ;;  %v3779_v22 = vsub.f32 %v8625_v39, %v3747_v27  ;;  %v3912_v32 = vmul.f32 0.0625, %v3849_v0  ;;  %v8822_v27 = vld [vmem:[%s9063_s5 + $0x2] ss:$0 sm:$0xff] }
 0x567   : > { %v3851_v40 = vpop.xlane.xlu1 %3850 }
 0x568   : > { %v8807_v14 = vmul.f32 %v8612_v47, %v3779_v22  ;;  %v3944_v3 = vadd.f32 1e-05, %v3912_v32  ;;  %v3913_v45 = vmul.f32 0.0625, %v3851_v40  ;;  %v3846_v24 = vmul.f32 %v8803_v20, %v8803_v20 }
 0x569   : > { %v3853_v48 = vpop.xlane.xlu0 %3852 }
 0x56a   : > { %5851 = vrsqrt.f32 %v3944_v3  ;;  %v3945_v6 = vadd.f32 1e-05, %v3913_v45  ;;  %v3914_v34 = vmul.f32 0.0625, %v3853_v48  ;;  %3908 = vadd.xlane.f32.xlu0 %v3846_v24  ;;  %v3847_v31 = vmul.f32 %v8807_v14, %v8807_v14 }
 0x56b   : > { %v3855_v7 = vpop.xlane.xlu1 %3854 }
 0x56c   : > { %5853 = vrsqrt.f32 %v3945_v6  ;;  %v3946_v39 = vadd.f32 1e-05, %v3914_v34  ;;  %v3915_v11 = vmul.f32 0.0625, %v3855_v7  ;;  %3910 = vadd.xlane.f32.xlu1 %v3847_v31 }
 0x56d   : > { %v3857_v47 = vpop.xlane.xlu0 %3856 }
 0x56e   : > { %5855 = vrsqrt.f32 %v3946_v39  ;;  %v3947_v55 = vadd.f32 1e-05, %v3915_v11  ;;  %v3916_v50 = vmul.f32 0.0625, %v3857_v47 }
 0x56f   : > { %v3859_v25 = vpop.xlane.xlu1 %3858 }
 0x570   : > { %5857 = vrsqrt.f32 %v3947_v55  ;;  %v3948_v46 = vadd.f32 1e-05, %v3916_v50  ;;  %v3917_v30 = vmul.f32 0.0625, %v3859_v25 }
 0x571   : > { %v3861_v36 = vpop.xlane.xlu0 %3860 }
 0x572   : > { %5859 = vrsqrt.f32 %v3948_v46  ;;  %v3949_v33 = vadd.f32 1e-05, %v3917_v30  ;;  %v3918_v43 = vmul.f32 0.0625, %v3861_v36 }
 0x573   : > { %v3863_v4 = vpop.xlane.xlu1 %3862 }
 0x574   : > { %v5852_v1 = vpop.eup %5851  ;;  %5861 = vrsqrt.f32 %v3949_v33  ;;  %v3950_v44 = vadd.f32 1e-05, %v3918_v43  ;;  %v3919_v53 = vmul.f32 0.0625, %v3863_v4 }
 0x575   : > { %v4008_v59 = vmul.f32 %v5852_v1, %v8618_v12  ;;  %v3865_v42 = vpop.xlane.xlu0 %3864 }
 0x576   : > { %v5854_v54 = vpop.eup %5853  ;;  %5863 = vrsqrt.f32 %v3950_v44  ;;  %v3951_v0 = vadd.f32 1e-05, %v3919_v53  ;;  %v3920_v22 = vmul.f32 0.0625, %v3865_v42 }
 0x577   : > { %v4044_v32 = vmul.f32 %v8816_v35, %v4008_v59  ;;  %v4009_v40 = vmul.f32 %v5854_v54, %v8628_v18  ;;  %v3867_v3 = vpop.xlane.xlu1 %3866 }
 0x578   : > { %v5856_v45 = vpop.eup %5855  ;;  %5865 = vrsqrt.f32 %v3951_v0  ;;  %v3952_v24 = vadd.f32 1e-05, %v3920_v22  ;;  %v3921_v48 = vmul.f32 0.0625, %v3867_v3 }
 0x579   : > { %v4080_v12 = vadd.f32 %v8822_v27, %v4044_v32  ;;  %v4045_v6 = vmul.f32 %v8816_v35, %v4009_v40  ;;  %v4010_v34 = vmul.f32 %v5856_v45, %v8631_v21  ;;  %v3869_v31 = vpop.xlane.xlu0 %3868 }
 0x57a   : > { %v5858_v7 = vpop.eup %5857  ;;  %5867 = vrsqrt.f32 %v3952_v24  ;;  %v3953_v39 = vadd.f32 1e-05, %v3921_v48  ;;  %v3922_v11 = vmul.f32 0.0625, %v3869_v31 }
 0x57b   : > { %v8829_v47 = vmul.f32 0.5, %v4080_v12  ;;  %v4081_v18 = vadd.f32 %v8822_v27, %v4045_v6  ;;  %v4046_v55 = vmul.f32 %v8816_v35, %v4010_v34  ;;  %v4011_v50 = vmul.f32 %v5858_v7, %v8638_v28  ;;  %v3871_v25 = vpop.xlane.xlu1 %3870 }
 0x57c   : > { %v5860_v46 = vpop.eup %5859  ;;  %5869 = vrsqrt.f32 %v3953_v39  ;;  %v3954_v30 = vadd.f32 1e-05, %v3922_v11  ;;  %v3923_v36 = vmul.f32 0.0625, %v3871_v25 }
 0x57d   : > { %5871 = vtanh.f32 %v8829_v47  ;;  %v8835_v21 = vmul.f32 0.5, %v4081_v18  ;;  %v4082_v33 = vadd.f32 %v8822_v27, %v4046_v55  ;;  %v4047_v43 = vmul.f32 %v8816_v35, %v4011_v50  ;;  %v3873_v4 = vpop.xlane.xlu0 %3872 }
 0x57e   : > { %v5862_v1 = vpop.eup %5861  ;;  %v4012_v44 = vmul.f32 %v5860_v46, %v8644_v23  ;;  %5873 = vrsqrt.f32 %v3954_v30  ;;  %v3955_v53 = vadd.f32 1e-05, %v3923_v36  ;;  %v3924_v28 = vmul.f32 0.0625, %v3873_v4 }
 0x57f   : > { %5875 = vtanh.f32 %v8835_v21  ;;  %v8841_v59 = vmul.f32 0.5, %v4082_v33  ;;  %v4083_v42 = vadd.f32 %v8822_v27, %v4047_v43  ;;  %v4013_v54 = vmul.f32 %v5862_v1, %v8650_v58  ;;  %v3875_v0 = vpop.xlane.xlu1 %3874 }
 0x580   : > { %v5864_v22 = vpop.eup %5863  ;;  %v4048_v32 = vmul.f32 %v8816_v35, %v4012_v44  ;;  %5877 = vrsqrt.f32 %v3955_v53  ;;  %v3956_v40 = vadd.f32 1e-05, %v3924_v28  ;;  %v3925_v3 = vmul.f32 0.0625, %v3875_v0 }
 0x581   : > { %5879 = vtanh.f32 %v8841_v59  ;;  %v8847_v23 = vmul.f32 0.5, %v4083_v42  ;;  %v4049_v45 = vmul.f32 %v8816_v35, %v4013_v54  ;;  %v4014_v24 = vmul.f32 %v5864_v22, %v8656_v51  ;;  %v3877_v48 = vpop.xlane.xlu0 %3876 }
 0x582   : > { %v5866_v12 = vpop.eup %5865  ;;  %v4084_v6 = vadd.f32 %v8822_v27, %v4048_v32  ;;  %5881 = vrsqrt.f32 %v3956_v40  ;;  %v3957_v58 = vadd.f32 1e-05, %v3925_v3  ;;  %v3926_v34 = vmul.f32 0.0625, %v3877_v48 }
 0x583   : > { %5883 = vtanh.f32 %v8847_v23  ;;  %v4085_v31 = vadd.f32 %v8822_v27, %v4049_v45  ;;  %v4050_v7 = vmul.f32 %v8816_v35, %v4014_v24  ;;  %v4015_v39 = vmul.f32 %v5866_v12, %v8662_v2  ;;  %v3879_v11 = vpop.xlane.xlu1 %3878 }
 0x584   : > { %v5868_v18 = vpop.eup %5867  ;;  %v8856_v55 = vmul.f32 0.5, %v4084_v6  ;;  %5885 = vrsqrt.f32 %v3957_v58  ;;  %v3958_v51 = vadd.f32 1e-05, %v3926_v34  ;;  %v3927_v50 = vmul.f32 0.0625, %v3879_v11 }
 0x585   : > { %v8858_v25 = vmul.f32 0.5, %v4085_v31  ;;  %v4086_v46 = vadd.f32 %v8822_v27, %v4050_v7  ;;  %v4051_v30 = vmul.f32 %v8816_v35, %v4015_v39  ;;  %v4016_v36 = vmul.f32 %v5868_v18, %v8668_v19  ;;  %v3881_v33 = vpop.xlane.xlu0 %3880 }
 0x586   : > { %v5870_v43 = vpop.eup %5869  ;;  %5887 = vtanh.f32 %v8856_v55  ;;  %v3959_v2 = vadd.f32 1e-05, %v3927_v50  ;;  %v3928_v4 = vmul.f32 0.0625, %v3881_v33 }
 0x587   : > { %v5872_v1 = vpop.eup %5871  ;;  %5889 = vtanh.f32 %v8858_v25  ;;  %v8865_v44 = vmul.f32 0.5, %v4086_v46  ;;  %v4087_v53 = vadd.f32 %v8822_v27, %v4051_v30  ;;  %v4052_v28 = vmul.f32 %v8816_v35, %v4016_v36  ;;  %v3883_v31 = vpop.xlane.xlu1 %3882 }
 0x588   : > { %v5874_v42 = vpop.eup %5873  ;;  %v4176_v54 = vadd.f32 1.0, %v5872_v1  ;;  %v4017_v0 = vmul.f32 %v5870_v43, %v8674_v15  ;;  %5891 = vrsqrt.f32 %v3958_v51  ;;  %v3960_v19 = vadd.f32 1e-05, %v3928_v4 }
 0x589   : > { %v5876_v22 = vpop.eup %5875  ;;  %5893 = vtanh.f32 %v8865_v44  ;;  %v8871_v32 = vmul.f32 0.5, %v4087_v53  ;;  %v4088_v40 = vadd.f32 %v8822_v27, %v4052_v28  ;;  %v4018_v3 = vmul.f32 %v5874_v42, %v8680_v61 }
 0x58a   : > { %v5878_v45 = vpop.eup %5877  ;;  %v4208_v24 = vmul.f32 %v4176_v54, %v8829_v47  ;;  %v4177_v48 = vadd.f32 1.0, %v5876_v22  ;;  %v4053_v12 = vmul.f32 %v8816_v35, %v4017_v0  ;;  %5895 = vrsqrt.f32 %v3959_v2 }
 0x58b   : > { %v5880_v15 = vpop.eup %5879  ;;  %5897 = vtanh.f32 %v8871_v32  ;;  %v8878_v6 = vmul.f32 0.5, %v4088_v40  ;;  %v4054_v58 = vmul.f32 %v8816_v35, %v4018_v3  ;;  %v4019_v34 = vmul.f32 %v5878_v45, %v8686_v29 }
 0x58c   : > { %v5882_v7 = vpop.eup %5881  ;;  %4240 = vst [vmem:[%s8884_s26] sm:$0xff] %v4208_v24  ;;  %v4209_v61 = vmul.f32 %v4177_v48, %v8835_v21  ;;  %v4178_v47 = vadd.f32 1.0, %v5880_v15  ;;  %v4089_v39 = vadd.f32 %v8822_v27, %v4053_v12  ;;  %5899 = vrsqrt.f32 %v3960_v19 }
 0x58d   : > { %v5884_v11 = vpop.eup %5883  ;;  %5901 = vtanh.f32 %v8878_v6  ;;  %v4090_v29 = vadd.f32 %v8822_v27, %v4054_v58  ;;  %v4055_v18 = vmul.f32 %v8816_v35, %v4019_v34  ;;  %v4020_v51 = vmul.f32 %v5882_v7, %v8692_v5  ;;  %v3885_v50 = vpop.xlane.xlu0 %3884 }
 0x58e   : > { %v5886_v46 = vpop.eup %5885  ;;  %4241 = vst [vmem:[%s8884_s26 + $0x8] sm:$0xff] %v4209_v61  ;;  %v4210_v30 = vmul.f32 %v4178_v47, %v8841_v59  ;;  %v4179_v21 = vadd.f32 1.0, %v5884_v11  ;;  %v8895_v36 = vmul.f32 0.5, %v4089_v39  ;;  %v3929_v33 = vmul.f32 0.0625, %v3883_v31 }
 0x58f   : > { %v8897_v43 = vmul.f32 0.5, %v4090_v29  ;;  %v4091_v2 = vadd.f32 %v8822_v27, %v4055_v18  ;;  %v4056_v4 = vmul.f32 %v8816_v35, %v4020_v51  ;;  %v4021_v1 = vmul.f32 %v5886_v46, %v8698_v26  ;;  %v3887_v3 = vpop.xlane.xlu1 %3886 }
 0x590   : > { %v5888_v53 = vpop.eup %5887  ;;  %4242 = vst [vmem:[%s8884_s26 + $0x10] sm:$0xff] %v4210_v30  ;;  %v4211_v5 = vmul.f32 %v4179_v21, %v8847_v23  ;;  %5903 = vtanh.f32 %v8895_v36  ;;  %v3961_v59 = vadd.f32 1e-05, %v3929_v33  ;;  %v3930_v28 = vmul.f32 0.0625, %v3885_v50 }
 0x591   : > { %v5890_v42 = vpop.eup %5889  ;;  %v4180_v54 = vadd.f32 1.0, %v5888_v53  ;;  %5905 = vtanh.f32 %v8897_v43  ;;  %v8906_v0 = vmul.f32 0.5, %v4091_v2  ;;  %v4092_v19 = vadd.f32 %v8822_v27, %v4056_v4 }
 0x592   : > { %v5892_v22 = vpop.eup %5891  ;;  %4243 = vst [vmem:[%s8884_s26 + $0x18] sm:$0xff] %v4211_v5  ;;  %v4181_v40 = vadd.f32 1.0, %v5890_v42  ;;  %v4057_v26 = vmul.f32 %v8816_v35, %v4021_v1  ;;  %5907 = vrsqrt.f32 %v3961_v59  ;;  %v3962_v23 = vadd.f32 1e-05, %v3930_v28 }
 0x593   : > { %v5894_v45 = vpop.eup %5893  ;;  %v4212_v24 = vmul.f32 %v4180_v54, %v8856_v55  ;;  %5909 = vtanh.f32 %v8906_v0  ;;  %v8913_v48 = vmul.f32 0.5, %v4092_v19  ;;  %v4022_v12 = vmul.f32 %v5892_v22, %v8704_v8 }
 0x594   : > { %v5896_v15 = vpop.eup %5895  ;;  %v4213_v58 = vmul.f32 %v4181_v40, %v8858_v25  ;;  %v4182_v34 = vadd.f32 1.0, %v5894_v45  ;;  %v4093_v31 = vadd.f32 %v8822_v27, %v4057_v26  ;;  %5911 = vrsqrt.f32 %v3962_v23 }
 0x595   : > { %v5898_v7 = vpop.eup %5897  ;;  %4244 = vst [vmem:[%s8884_s26 + $0x20] sm:$0xff] %v4212_v24  ;;  %5913 = vtanh.f32 %v8913_v48  ;;  %v4058_v55 = vmul.f32 %v8816_v35, %v4022_v12  ;;  %v4023_v61 = vmul.f32 %v5896_v15, %v8709_v62  ;;  %v3931_v47 = vmul.f32 0.0625, %v3887_v3 }
 0x596   : > { %v5900_v39 = vpop.eup %5899  ;;  %4245 = vst [vmem:[%s8884_s26 + $0x28] sm:$0xff] %v4213_v58  ;;  %v4214_v8 = vmul.f32 %v4182_v34, %v8865_v44  ;;  %v4183_v11 = vadd.f32 1.0, %v5898_v7  ;;  %v4125_v25 = vmul.f32 0.5, %v4093_v31 }
 0x597   : > { %v5902_v29 = vpop.eup %5901  ;;  %v4094_v18 = vadd.f32 %v8822_v27, %v4058_v55  ;;  %v4059_v51 = vmul.f32 %v8816_v35, %v4023_v61  ;;  %v4024_v50 = vmul.f32 %v5900_v39, %v8715_v37  ;;  %v3963_v46 = vadd.f32 1e-05, %v3931_v47 }
 0x598   : > { %4246 = vst [vmem:[%s8884_s26 + $0x30] sm:$0xff] %v4214_v8  ;;  %v4215_v30 = vmul.f32 %v4183_v11, %v8871_v32  ;;  %v4184_v62 = vadd.f32 1.0, %v5902_v29  ;;  %5915 = vtanh.f32 %v4125_v25 }
 0x599   : > { %v4126_v21 = vmul.f32 0.5, %v4094_v18  ;;  %v4095_v44 = vadd.f32 %v8822_v27, %v4059_v51  ;;  %v4060_v33 = vmul.f32 %v8816_v35, %v4024_v50  ;;  %5917 = vrsqrt.f32 %v3963_v46  ;;  %v3889_v2 = vpop.xlane.xlu0 %3888 }
 0x59a   : > { %v5904_v4 = vpop.eup %5903  ;;  %4247 = vst [vmem:[%s8884_s26 + $0x38] sm:$0xff] %v4215_v30  ;;  %v4216_v1 = vmul.f32 %v4184_v62, %v8878_v6  ;;  %v3932_v53 = vmul.f32 0.0625, %v3889_v2 }
 0x59b   : > { %v5906_v37 = vpop.eup %5905  ;;  %v4185_v5 = vadd.f32 1.0, %v5904_v4  ;;  %5919 = vtanh.f32 %v4126_v21  ;;  %v4127_v59 = vmul.f32 0.5, %v4095_v44  ;;  %v4096_v32 = vadd.f32 %v8822_v27, %v4060_v33  ;;  %v3891_v28 = vpop.xlane.xlu1 %3890 }
 0x59c   : > { %v5908_v42 = vpop.eup %5907  ;;  %4248 = vst [vmem:[%s8884_s26 + $0x40] sm:$0xff] %v4216_v1  ;;  %v4186_v54 = vadd.f32 1.0, %v5906_v37  ;;  %v3964_v19 = vadd.f32 1e-05, %v3932_v53  ;;  %v3933_v22 = vmul.f32 0.0625, %v3891_v28 }
 0x59d   : > { %v5910_v40 = vpop.eup %5909  ;;  %v4217_v26 = vmul.f32 %v4185_v5, %v8895_v36  ;;  %5921 = vtanh.f32 %v4127_v59  ;;  %v4128_v6 = vmul.f32 0.5, %v4096_v32  ;;  %v4025_v23 = vmul.f32 %v5908_v42, %v8721_v17 }
 0x59e   : > { %v5912_v3 = vpop.eup %5911  ;;  %v4218_v45 = vmul.f32 %v4186_v54, %v8897_v43  ;;  %v4187_v24 = vadd.f32 1.0, %v5910_v40  ;;  %5923 = vrsqrt.f32 %v3964_v19  ;;  %v3965_v12 = vadd.f32 1e-05, %v3933_v22 }
 0x59f   : > { %v5914_v15 = vpop.eup %5913  ;;  %4249 = vst [vmem:[%s8884_s26 + $0x48] sm:$0xff] %v4217_v26  ;;  %5925 = vtanh.f32 %v4128_v6  ;;  %v4061_v58 = vmul.f32 %v8816_v35, %v4025_v23  ;;  %v4026_v34 = vmul.f32 %v5912_v3, %v8731_v9 }
 0x5a0   : > { %4250 = vst [vmem:[%s8884_s26 + $0x50] sm:$0xff] %v4218_v45  ;;  %v4219_v36 = vmul.f32 %v4187_v24, %v8906_v0  ;;  %v4188_v31 = vadd.f32 1.0, %v5914_v15  ;;  %5927 = vrsqrt.f32 %v3965_v12 }
 0x5a1   : > { %v4097_v17 = vadd.f32 %v8822_v27, %v4061_v58  ;;  %v4062_v43 = vmul.f32 %v8816_v35, %v4026_v34 }
 0x5a2   : > { %v5916_v7 = vpop.eup %5915  ;;  %4251 = vst [vmem:[%s8884_s26 + $0x58] sm:$0xff] %v4219_v36  ;;  %v4220_v55 = vmul.f32 %v4188_v31, %v8913_v48 }
 0x5a3   : > { %v5918_v61 = vpop.eup %5917  ;;  %v4189_v47 = vadd.f32 1.0, %v5916_v7  ;;  %v4129_v39 = vmul.f32 0.5, %v4097_v17  ;;  %v4098_v8 = vadd.f32 %v8822_v27, %v4062_v43 }
 0x5a4   : > { %4252 = vst [vmem:[%s8884_s26 + $0x60] sm:$0xff] %v4220_v55  ;;  %v4027_v9 = vmul.f32 %v5918_v61, %v8735_v56 }
 0x5a5   : > { %v5920_v0 = vpop.eup %5919  ;;  %v4221_v11 = vmul.f32 %v4189_v47, %v4125_v25  ;;  %5929 = vtanh.f32 %v4129_v39  ;;  %v4130_v29 = vmul.f32 0.5, %v4098_v8 }
 0x5a6   : > { %v4190_v18 = vadd.f32 1.0, %v5920_v0  ;;  %v4063_v51 = vmul.f32 %v8816_v35, %v4027_v9 }
 0x5a7   : > { %v5922_v50 = vpop.eup %5921  ;;  %4253 = vst [vmem:[%s8884_s26 + $0x68] sm:$0xff] %v4221_v11  ;;  %5931 = vtanh.f32 %v4130_v29 }
 0x5a8   : > { %v5924_v48 = vpop.eup %5923  ;;  %v4222_v46 = vmul.f32 %v4190_v18, %v4126_v21  ;;  %v4191_v30 = vadd.f32 1.0, %v5922_v50  ;;  %v4099_v62 = vadd.f32 %v8822_v27, %v4063_v51 }
 0x5a9   : > { %v5926_v44 = vpop.eup %5925  ;;  %v4028_v56 = vmul.f32 %v5924_v48, %v8743_v52 }
 0x5aa   : > { %v5928_v33 = vpop.eup %5927  ;;  %4254 = vst [vmem:[%s8884_s26 + $0x70] sm:$0xff] %v4222_v46  ;;  %v4223_v25 = vmul.f32 %v4191_v30, %v4127_v59  ;;  %v4192_v2 = vadd.f32 1.0, %v5926_v44  ;;  %v4131_v4 = vmul.f32 0.5, %v4099_v62 }
 0x5ab   : > { %v4064_v1 = vmul.f32 %v8816_v35, %v4028_v56  ;;  %v4029_v53 = vmul.f32 %v5928_v33, %v8747_v41 }
 0x5ac   : > { %4255 = vst [vmem:[%s8884_s26 + $0x78] sm:$0xff] %v4223_v25  ;;  %v4224_v37 = vmul.f32 %v4192_v2, %v4128_v6  ;;  %5933 = vtanh.f32 %v4131_v4 }
 0x5ad   : > { %v4100_v21 = vadd.f32 %v8822_v27, %v4064_v1  ;;  %v4065_v5 = vmul.f32 %v8816_v35, %v4029_v53 }
 0x5ae   : > { %4256 = vst [vmem:[%s8884_s26 + $0x80] sm:$0xff] %v4224_v37 }
 0x5af   : > { %v5930_v52 = vpop.eup %5929  ;;  %v4132_v32 = vmul.f32 0.5, %v4100_v21  ;;  %v4101_v59 = vadd.f32 %v8822_v27, %v4065_v5 }
 0x5b0   : > { %v4193_v28 = vadd.f32 1.0, %v5930_v52 }
 0x5b1   : > { %v5932_v42 = vpop.eup %5931  ;;  %5935 = vtanh.f32 %v4132_v32  ;;  %v4133_v54 = vmul.f32 0.5, %v4101_v59 }
 0x5b2   : > { %v4225_v41 = vmul.f32 %v4193_v28, %v4129_v39  ;;  %v4194_v19 = vadd.f32 1.0, %v5932_v42 }
 0x5b3   : > { %5937 = vtanh.f32 %v4133_v54 }
 0x5b4   : > { %4257 = vst [vmem:[%s8884_s26 + $0x88] sm:$0xff] %v4225_v41  ;;  %v4226_v22 = vmul.f32 %v4194_v19, %v4130_v29 }
 0x5b6   : > { %v5934_v40 = vpop.eup %5933  ;;  %4258 = vst [vmem:[%s8884_s26 + $0x90] sm:$0xff] %v4226_v22 }
 0x5b7   : > { %v4195_v26 = vadd.f32 1.0, %v5934_v40 }
 0x5b9   : > { %v4227_v6 = vmul.f32 %v4195_v26, %v4131_v4 }
 0x5bb   : > { %v5936_v23 = vpop.eup %5935  ;;  %4259 = vst [vmem:[%s8884_s26 + $0x98] sm:$0xff] %v4227_v6 }
 0x5bc   : > { %v4196_v3 = vadd.f32 1.0, %v5936_v23 }
 0x5bd   : > { %v5938_v45 = vpop.eup %5937 }
 0x5be   : > { %v4228_v24 = vmul.f32 %v4196_v3, %v4132_v32  ;;  %v4197_v12 = vadd.f32 1.0, %v5938_v45 }
 0x5c0   : > { %4260 = vst [vmem:[%s8884_s26 + $0xa0] sm:$0xff] %v4228_v24  ;;  %v4229_v15 = vmul.f32 %v4197_v12, %v4133_v54 }
 0x5c2   : > { %4261 = vst [vmem:[%s8884_s26 + $0xa8] sm:$0xff] %v4229_v15 }
 0x5cd   : > { %v3893_v58 = vpop.xlane.xlu0 %3892 }
 0x5ce   : > { %v3934_v34 = vmul.f32 0.0625, %v3893_v58 }
 0x5cf   : > { %v3895_v36 = vpop.xlane.xlu1 %3894 }
 0x5d0   : > { %v3966_v31 = vadd.f32 1e-05, %v3934_v34  ;;  %v3935_v17 = vmul.f32 0.0625, %v3895_v36 }
 0x5d2   : > { %5939 = vrsqrt.f32 %v3966_v31  ;;  %v3967_v43 = vadd.f32 1e-05, %v3935_v17 }
 0x5d4   : > { %5941 = vrsqrt.f32 %v3967_v43 }
 0x5d5   : > { %v3897_v7 = vpop.xlane.xlu0 %3896 }
 0x5d6   : > { %v3936_v55 = vmul.f32 0.0625, %v3897_v7 }
 0x5d7   : > { %v3899_v61 = vpop.xlane.xlu1 %3898 }
 0x5d8   : > { %v3968_v47 = vadd.f32 1e-05, %v3936_v55  ;;  %v3937_v39 = vmul.f32 0.0625, %v3899_v61 }
 0x5da   : > { %5943 = vrsqrt.f32 %v3968_v47  ;;  %v3969_v8 = vadd.f32 1e-05, %v3937_v39 }
 0x5dc   : > { %v5940_v9 = vpop.eup %5939  ;;  %5945 = vrsqrt.f32 %v3969_v8 }
 0x5dd   : > { %v4030_v0 = vmul.f32 %v5940_v9, %v8755_v16  ;;  %v3901_v11 = vpop.xlane.xlu0 %3900 }
 0x5de   : > { %v5942_v29 = vpop.eup %5941  ;;  %v3938_v18 = vmul.f32 0.0625, %v3901_v11 }
 0x5df   : > { %v4066_v51 = vmul.f32 %v8816_v35, %v4030_v0  ;;  %v4031_v50 = vmul.f32 %v5942_v29, %v8759_v38  ;;  %v3903_v48 = vpop.xlane.xlu1 %3902 }
 0x5e0   : > { %v3970_v46 = vadd.f32 1e-05, %v3938_v18  ;;  %v3939_v30 = vmul.f32 0.0625, %v3903_v48 }
 0x5e1   : > { %v4102_v62 = vadd.f32 %v8822_v27, %v4066_v51  ;;  %v4067_v44 = vmul.f32 %v8816_v35, %v4031_v50 }
 0x5e2   : > { %5947 = vrsqrt.f32 %v3970_v46  ;;  %v3971_v56 = vadd.f32 1e-05, %v3939_v30 }
 0x5e3   : > { %v4134_v33 = vmul.f32 0.5, %v4102_v62  ;;  %v4103_v25 = vadd.f32 %v8822_v27, %v4067_v44 }
 0x5e4   : > { %v5944_v16 = vpop.eup %5943  ;;  %5949 = vrsqrt.f32 %v3971_v56 }
 0x5e5   : > { %5951 = vtanh.f32 %v4134_v33  ;;  %v4135_v2 = vmul.f32 0.5, %v4103_v25  ;;  %v4032_v4 = vmul.f32 %v5944_v16, %v8767_v63 }
 0x5e6   : > { %v5946_v1 = vpop.eup %5945 }
 0x5e7   : > { %5953 = vtanh.f32 %v4135_v2  ;;  %v4068_v38 = vmul.f32 %v8816_v35, %v4032_v4  ;;  %v4033_v53 = vmul.f32 %v5946_v1, %v8771_v13 }
 0x5e9   : > { %v4104_v37 = vadd.f32 %v8822_v27, %v4068_v38  ;;  %v4069_v21 = vmul.f32 %v8816_v35, %v4033_v53 }
 0x5eb   : > { %v4136_v5 = vmul.f32 0.5, %v4104_v37  ;;  %v4105_v52 = vadd.f32 %v8822_v27, %v4069_v21 }
 0x5ec   : > { %v5948_v32 = vpop.eup %5947 }
 0x5ed   : > { %5955 = vtanh.f32 %v4136_v5  ;;  %v4137_v59 = vmul.f32 0.5, %v4105_v52  ;;  %v4034_v28 = vmul.f32 %v5948_v32, %v8779_v49 }
 0x5ee   : > { %v5950_v42 = vpop.eup %5949  ;;  %v3905_v63 = vpop.xlane.xlu0 %3904 }
 0x5ef   : > { %v5952_v54 = vpop.eup %5951  ;;  %5957 = vtanh.f32 %v4137_v59  ;;  %v4070_v41 = vmul.f32 %v8816_v35, %v4034_v28  ;;  %v4035_v13 = vmul.f32 %v5950_v42, %v8783_v57  ;;  %v3940_v19 = vmul.f32 0.0625, %v3905_v63 }
 0x5f0   : > { %v4198_v22 = vadd.f32 1.0, %v5952_v54  ;;  %v3907_v40 = vpop.xlane.xlu1 %3906 }
 0x5f1   : > { %v5954_v26 = vpop.eup %5953  ;;  %v4106_v6 = vadd.f32 %v8822_v27, %v4070_v41  ;;  %v4071_v23 = vmul.f32 %v8816_v35, %v4035_v13  ;;  %v3972_v3 = vadd.f32 1e-05, %v3940_v19  ;;  %v3941_v49 = vmul.f32 0.0625, %v3907_v40 }
 0x5f2   : > { %v4230_v45 = vmul.f32 %v4198_v22, %v4134_v33  ;;  %v4199_v24 = vadd.f32 1.0, %v5954_v26 }
 0x5f3   : > { %v4138_v12 = vmul.f32 0.5, %v4106_v6  ;;  %v4107_v15 = vadd.f32 %v8822_v27, %v4071_v23  ;;  %5959 = vrsqrt.f32 %v3972_v3  ;;  %v3973_v58 = vadd.f32 1e-05, %v3941_v49 }
 0x5f4   : > { %4262 = vst [vmem:[%s8884_s26 + $0xb0] sm:$0xff] %v4230_v45  ;;  %v4231_v57 = vmul.f32 %v4199_v24, %v4135_v2 }
 0x5f5   : > { %5961 = vtanh.f32 %v4138_v12  ;;  %v4139_v34 = vmul.f32 0.5, %v4107_v15 }
 0x5f6   : > { %4263 = vst [vmem:[%s8884_s26 + $0xb8] sm:$0xff] %v4231_v57  ;;  %5963 = vrsqrt.f32 %v3973_v58 }
 0x5f7   : > { %v5956_v36 = vpop.eup %5955  ;;  %5965 = vtanh.f32 %v4139_v34  ;;  %v3909_v31 = vpop.xlane.xlu0 %3908 }
 0x5f8   : > { %v4200_v17 = vadd.f32 1.0, %v5956_v36  ;;  %v3942_v43 = vmul.f32 0.0625, %v3909_v31 }
 0x5f9   : > { %v5958_v7 = vpop.eup %5957  ;;  %v3911_v55 = vpop.xlane.xlu1 %3910 }
 0x5fa   : > { %v4232_v61 = vmul.f32 %v4200_v17, %v4136_v5  ;;  %v4201_v47 = vadd.f32 1.0, %v5958_v7  ;;  %v3974_v39 = vadd.f32 1e-05, %v3942_v43  ;;  %v3943_v8 = vmul.f32 0.0625, %v3911_v55 }
 0x5fc   : > { %4264 = vst [vmem:[%s8884_s26 + $0xc0] sm:$0xff] %v4232_v61  ;;  %v4233_v9 = vmul.f32 %v4201_v47, %v4137_v59  ;;  %5967 = vrsqrt.f32 %v3974_v39  ;;  %v3975_v0 = vadd.f32 1e-05, %v3943_v8 }
 0x5fd   : > { %v5960_v11 = vpop.eup %5959 }
 0x5fe   : > { %4265 = vst [vmem:[%s8884_s26 + $0xc8] sm:$0xff] %v4233_v9  ;;  %v4036_v29 = vmul.f32 %v5960_v11, %v8791_v10  ;;  %5969 = vrsqrt.f32 %v3975_v0 }
 0x5ff   : > { %v5962_v18 = vpop.eup %5961 }
 0x600   : > { %v5964_v51 = vpop.eup %5963  ;;  %v4202_v50 = vadd.f32 1.0, %v5962_v18  ;;  %v4072_v48 = vmul.f32 %v8816_v35, %v4036_v29 }
 0x601   : > { %v5966_v46 = vpop.eup %5965  ;;  %v4037_v30 = vmul.f32 %v5964_v51, %v8795_v60 }
 0x602   : > { %v4234_v62 = vmul.f32 %v4202_v50, %v4138_v12  ;;  %v4203_v44 = vadd.f32 1.0, %v5966_v46  ;;  %v4108_v56 = vadd.f32 %v8822_v27, %v4072_v48 }
 0x603   : > { %v4073_v33 = vmul.f32 %v8816_v35, %v4037_v30 }
 0x604   : > { %4266 = vst [vmem:[%s8884_s26 + $0xd0] sm:$0xff] %v4234_v62  ;;  %v4235_v25 = vmul.f32 %v4203_v44, %v4139_v34  ;;  %v4140_v16 = vmul.f32 0.5, %v4108_v56 }
 0x605   : > { %v4109_v10 = vadd.f32 %v8822_v27, %v4073_v33 }
 0x606   : > { %v5968_v2 = vpop.eup %5967  ;;  %4267 = vst [vmem:[%s8884_s26 + $0xd8] sm:$0xff] %v4235_v25  ;;  %5971 = vtanh.f32 %v4140_v16 }
 0x607   : > { %v4141_v4 = vmul.f32 0.5, %v4109_v10  ;;  %v4038_v1 = vmul.f32 %v5968_v2, %v8803_v20 }
 0x608   : > { %v5970_v38 = vpop.eup %5969 }
 0x609   : > { %5973 = vtanh.f32 %v4141_v4  ;;  %v4074_v60 = vmul.f32 %v8816_v35, %v4038_v1  ;;  %v4039_v53 = vmul.f32 %v5970_v38, %v8807_v14 }
 0x60b   : > { %v4110_v37 = vadd.f32 %v8822_v27, %v4074_v60  ;;  %v4075_v21 = vmul.f32 %v8816_v35, %v4039_v53 }
 0x60d   : > { %v4142_v5 = vmul.f32 0.5, %v4110_v37  ;;  %v4111_v52 = vadd.f32 %v8822_v27, %v4075_v21 }
 0x60f   : > { %5975 = vtanh.f32 %v4142_v5  ;;  %v4143_v32 = vmul.f32 0.5, %v4111_v52 }
 0x610   : > { %v5972_v20 = vpop.eup %5971 }
 0x611   : > { %v4204_v59 = vadd.f32 1.0, %v5972_v20  ;;  %5977 = vtanh.f32 %v4143_v32 }
 0x613   : > { %v5974_v28 = vpop.eup %5973  ;;  %v4236_v42 = vmul.f32 %v4204_v59, %v4140_v16 }
 0x614   : > { %v4205_v63 = vadd.f32 1.0, %v5974_v28 }
 0x615   : > { %4268 = vst [vmem:[%s8884_s26 + $0xe0] sm:$0xff] %v4236_v42 }
 0x616   : > { %v4237_v14 = vmul.f32 %v4205_v63, %v4141_v4 }
 0x618   : > { %4269 = vst [vmem:[%s8884_s26 + $0xe8] sm:$0xff] %v4237_v14 }
 0x619   : > { %v5976_v35 = vpop.eup %5975 }
 0x61a   : > { %v4206_v54 = vadd.f32 1.0, %v5976_v35 }
 0x61b   : > { %v5978_v27 = vpop.eup %5977 }
 0x61c   : > { %v4238_v41 = vmul.f32 %v4206_v54, %v4142_v5  ;;  %v4207_v13 = vadd.f32 1.0, %v5978_v27 }
 0x61e   : > { %4270 = vst [vmem:[%s8884_s26 + $0xf0] sm:$0xff] %v4238_v41  ;;  %v4239_v19 = vmul.f32 %v4207_v13, %v4143_v32 }
 0x620   : > { %4271 = vst [vmem:[%s8884_s26 + $0xf8] sm:$0xff] %v4239_v19 }
 0x621   : > { %6097 = shalt.err (!%p6094_p4)
}
 0x622   : > { %s6098_s8 = scalar_lea.hbm %s9010_s9, 4096  ;;  %s6102_s29 = scalar_lea.hbm %s9064_s6, 8192 }
 0x623   : > { %p6099_p6 = scmp.ne.s32.totalorder %s9010_s9, %s6098_s8  ;;  %p6103_p8 = scmp.lt.u32.totalorder %s9010_s9, %s9064_s6 }
 0x624   : > { %p6104_p13 = scmp.lt.u32.totalorder %s6102_s29, %s6098_s8  ;;  %p6106_p12 = scmp.lt.u32.totalorder %s6098_s8, %s9010_s9 }
 0x625   : > { %p6100_p3 = pnand %p6099_p6, %p6346_p2 }
 0x626   : > { %p6105_p9 = por %p6104_p13, %p6103_p8 }
 0x627   : > { %p6101_p11 = pneg %p6100_p3 }
 0x628   : > { %p6107_p0 = por %p6106_p12, %p6105_p9 }
 0x62a   : > { %p6108_p1 = pnand %p6107_p0, %p6101_p11 }
 0x62c   : > { %6111 = shalt.err (!%p6108_p1)
}
 0x62d   : > { %s6169_s14 = smov 128   ;;  %s6170_s10 = smov 8  }
 0x62e   : > { %4950 = dma.vmem_to_hbm [thread:$0]  (%p6346_p2), %s9012_s12, 4096, %s9010_s9, %s4273_s30, %s6169_s14, %s6169_s14, %s6170_s10  }
 0x62f PF: > { %s4301_s11 = sand.u32 1, %s6146_s21   ;;  %p9095_p10 = scmp.ne.s32.totalorder %s9073_s28, 0 }
 0x630   : > { %p9096_p5 = scmp.ge.s32.totalorder %s6158_s24, 2  ;;  %s4302_s25 = scalar_lea.sflag [#allocation4], %s4301_s11 }
 0x632   : > { %p4967_p7 = pnand %p9096_p5, %p9095_p10 }
 0x634   : > { %6141 = dma.done.wait (!%p4967_p7), %s4302_s25, 4096  }
 0x635   : > { %6143 = vsyncadd (!%p4967_p7), %s4302_s25, 4294963200  ;;  %p21_p4 = scmp.ge.s32.totalorder %s6332_s19, 4   ;;  %s9097_s21 = smov %s6150_s22 }
 0x636   : > { %s9098_s22 = smov %s6154_s23  ;;  %s9099_s23 = smov %s6342_s7 }
 0x637   : > { %s9100_s24 = smov %s6332_s19  ;;  %23 = sbr.rel (!%p21_p4) target bundleno = 7 (0x7), region = 102 }
 0x63e   :  { %4307 = vsyncpa [#allocation3], 1 }
 0x63f   :  { %4309 = vsyncpa [#allocation3 + $0x1], 1 }
 0x640   :  { %4310 = vsyncpa [#allocation8], 1 }
 0x641   :  { %4311 = vsyncpa [#allocation4], 1 }
 0x642   :  { %4313 = vsyncpa [#allocation4 + $0x1], 1 }
 0x643   :  { %4314 = vsyncpa [#allocation5], 1 }
 0x644   :  { %4316 = vsyncpa [#allocation5 + $0x1], 1 }

</bundles_post_ra>
